<compile_context>
chip_gen: v7x
topology: tpu7x:2x2x1
jax: 0.10.0
libtpu: 0.0.40
codegen_flags: <defaults>
</compile_context>

<pallas_src>
import jax
import jax.numpy as jnp
from jax.experimental import pallas as pl
from jax.experimental.pallas import tpu as pltpu


def _make_kernel(T, H, HL, E, L_gru, L_lstm, scale, GS, GSL):
    """Fused GRU + FC + 1-step LSTM + FC kernel for one batch tile."""
    NG = 3 * GS     # lane-aligned GRU gate width (r | z | n slots)
    NL = 3 * GSL    # lane-aligned LSTM gate width (i | g | o slots, f dropped)
    n_params = 6 + (1 if L_gru > 1 else 0) + (1 if L_lstm > 1 else 0)

    def kernel(dedx_ref, len_ref, extras_ref, *refs):
        assert len(refs) == n_params + 2            # params + out + scratch
        it = iter(refs)
        gru_vec_ref = next(it)                      # (2*L_gru+1, NG)
        gru_whh_ref = next(it)                      # (L_gru, H, NG)
        gru_wih_ref = next(it) if L_gru > 1 else None   # (L_gru-1, H, NG)
        lstm_w0_ref = next(it)                      # (H+E, NL)
        lstm_wr_ref = next(it) if L_lstm > 1 else None  # (L_lstm-1, HL, NL)
        lstm_vec_ref = next(it)                     # (L_lstm, NL)
        fc_wb_ref = next(it)                        # (H+1, 1)
        adj_wb_ref = next(it)                       # (HL+1, 1)
        out_ref = next(it)                          # (B, 1)
        gi0_ref = next(it)                          # scratch (T, B, NG)

        f32 = jnp.float32
        B = dedx_ref.shape[0]

        dedx = dedx_ref[...]                        # (B, T) f32
        lengths = len_ref[...]                      # (B, 1) int32

        # Length mask for every timestep, computed once.
        tpos = jax.lax.broadcasted_iota(jnp.int32, (B, T), 1)
        mask_bt = tpos < lengths                    # (B, T) bool

        # ---- precompute all layer-0 input projections (state independent;
        #      the VMEM scratch bounds vreg live ranges of the unrolled loop).
        w_ih0 = gru_vec_ref[0:1, :]                 # (1, NG)
        b_ih0 = gru_vec_ref[1:2, :]                 # (1, NG)
        for t in range(T):
            gi0_ref[t] = dedx[:, t:t + 1] * w_ih0 + b_ih0

        def gru_step(gi, gh, h):
            # Gate slots start at lane offsets 0 / GS / 2*GS -> pure VPU math.
            r = jax.nn.sigmoid(gi[:, 0:H] + gh[:, 0:H])
            z = jax.nn.sigmoid(gi[:, GS:GS + H] + gh[:, GS:GS + H])
            n = jnp.tanh(gi[:, 2 * GS:2 * GS + H] + r * gh[:, 2 * GS:2 * GS + H])
            return (1.0 - z) * n + z * h

        hs = [jnp.zeros((B, H), f32) for _ in range(L_gru)]

        # ---- fully unrolled, length-masked multi-layer GRU recurrence ------
        for t in range(T):
            mvec = jnp.broadcast_to(mask_bt[:, t:t + 1], (B, H))  # shared by layers

            # layer 0 (input projection read from scratch)
            gi = gi0_ref[t]                                        # (B, NG)
            gh = (jnp.dot(hs[0], gru_whh_ref[0], preferred_element_type=f32)
                  + gru_vec_ref[1 + L_gru:2 + L_gru, :])
            hs[0] = jnp.where(mvec, gru_step(gi, gh, hs[0]), hs[0])

            x = hs[0]
            for l in range(1, L_gru):
                gi = (jnp.dot(x, gru_wih_ref[l - 1], preferred_element_type=f32)
                      + gru_vec_ref[1 + l:2 + l, :])
                gh = (jnp.dot(hs[l], gru_whh_ref[l], preferred_element_type=f32)
                      + gru_vec_ref[1 + L_gru + l:2 + L_gru + l, :])
                hs[l] = jnp.where(mvec, gru_step(gi, gh, hs[l]), hs[l])
                x = hs[l]

        h_last = hs[L_gru - 1]                                     # (B, H)

        # ---- dE/dx head (only needed for the final residual add) ----------
        dedx_pred = (jnp.dot(h_last, fc_wb_ref[0:H, :], preferred_element_type=f32)
                     + fc_wb_ref[H:H + 1, :])                      # (B, 1)

        def lstm_step(g):
            # 1-step LSTM from (h0, c0) == 0: f-gate / W_hh never contribute.
            # i / g / o slots at lane offsets 0 / GSL / 2*GSL.
            i_g = jax.nn.sigmoid(g[:, 0:HL])
            g_g = jnp.tanh(g[:, GSL:GSL + HL])
            o_g = jax.nn.sigmoid(g[:, 2 * GSL:2 * GSL + HL])
            return o_g * jnp.tanh(i_g * g_g)

        # fc head is folded into the layer-0 input projection (wrapper), so
        # this matmul chain does not wait on dedx_pred above.
        g0 = (jnp.dot(h_last, lstm_w0_ref[0:H, :], preferred_element_type=f32)
              + jnp.dot(extras_ref[...], lstm_w0_ref[H:H + E, :],
                        preferred_element_type=f32)
              + lstm_vec_ref[0:1, :])                              # (B, NL)
        h = lstm_step(g0)
        for l in range(1, L_lstm):
            g = (jnp.dot(h, lstm_wr_ref[l - 1], preferred_element_type=f32)
                 + lstm_vec_ref[l:l + 1, :])
            h = lstm_step(g)

        adjustment = (jnp.dot(h, adj_wb_ref[0:HL, :], preferred_element_type=f32)
                      + adj_wb_ref[HL:HL + 1, :])
        out_ref[...] = dedx_pred + scale * adjustment

    return kernel, n_params


def _pick_batch_tile(B):
    """Generation-aware batch tile for the 1-D "parallel" grid.

    - B < 16           : single tile (tiny batch).
    - 16 <= B <= 128   : split in two (rounded to the 8-row sublane quantum)
                         so both v7x TensorCores get a tile.
    - B > 128          : 256-row tiles fill the 256-wide MXU M dim on
                         v6e/v7x; 128 on v5e (and when 128 < B < 256).
    Note: a partial last tile computes on out-of-range rows; their outputs are
    dropped at writeback and no cross-row reductions exist, so results for
    valid rows are unaffected.
    """
    if B < 16:
        return B
    if B <= 128:
        return ((-(-B // 2)) + 7) // 8 * 8
    try:
        kind = jax.devices()[0].device_kind.lower()
    except Exception:
        kind = ""
    if "v5" in kind or B < 256:
        return 128
    return 256


def lstm_model_forward(dedx_seq, lengths, extras, params, *, adjustment_scale):
    """dedx_seq: (B, T, 1), lengths: (B,), extras: (B, E) -> (B, 1) f32."""
    gru_params, fc_params, lstm_params, adj_params = params
    B, T, _ = dedx_seq.shape
    H = gru_params[0][1].shape[0]      # W_hh^T is (H, 3H)
    HL = lstm_params[0][1].shape[0]    # W_hh^T is (HL, 4HL)
    L_gru = len(gru_params)
    L_lstm = len(lstm_params)
    E = extras.shape[1]
    f32 = jnp.float32

    GS = pl.cdiv(H, 128) * 128         # per-gate lane slot width (GRU)
    GSL = pl.cdiv(HL, 128) * 128       # per-gate lane slot width (LSTM)
    NG, NL = 3 * GS, 3 * GSL

    dedx_bt = dedx_seq.astype(f32)[:, :, 0]              # (B, T)
    len_2d = lengths.astype(jnp.int32).reshape(B, 1)
    extras = extras.astype(f32)

    # ---- parameter folding / lane-aligned repacking (tiny, trace-time) ----
    def align3(w):
        # (K, 3H) -> (K, NG): gates r/z/n each in their own 128-lane slot.
        k = w.shape[0]
        out = jnp.zeros((k, NG), f32)
        for g in range(3):
            out = out.at[:, g * GS:g * GS + H].set(w[:, g * H:(g + 1) * H])
        return out

    def align_lstm(w):
        # (K, 4HL) in i,f,g,o order -> (K, NL) keeping i/g/o (f-gate is dead).
        k = w.shape[0]
        out = jnp.zeros((k, NL), f32)
        out = out.at[:, 0:HL].set(w[:, 0:HL])                          # i
        out = out.at[:, GSL:GSL + HL].set(w[:, 2 * HL:3 * HL])         # g
        out = out.at[:, 2 * GSL:2 * GSL + HL].set(w[:, 3 * HL:4 * HL])  # o
        return out

    # GRU: one vector slab (w_ih0 row + all biases), stacked W_hh, stacked W_ih.
    gru_vec_rows = [align3(gru_params[0][0].astype(f32).reshape(1, 3 * H))]
    gru_vec_rows += [align3(gru_params[l][2].astype(f32)) for l in range(L_gru)]  # b_ih
    gru_vec_rows += [align3(gru_params[l][3].astype(f32)) for l in range(L_gru)]  # b_hh
    gru_vec = jnp.concatenate(gru_vec_rows, axis=0)                 # (2L+1, NG)
    gru_whh = jnp.stack([align3(gru_params[l][1].astype(f32))
                         for l in range(L_gru)], axis=0)            # (L, H, NG)
    flat = [gru_vec, gru_whh]
    if L_gru > 1:
        gru_wih = jnp.stack([align3(gru_params[l][0].astype(f32))
                             for l in range(1, L_gru)], axis=0)     # (L-1, H, NG)
        flat.append(gru_wih)

    # LSTM: fc head folded into layer-0 input projection, f-gate dropped.
    fc_w, fc_b = (p.astype(f32) for p in fc_params)                 # (H,1), (1,1)
    wih0_l, _, bih0_l, bhh0_l = (p.astype(f32) for p in lstm_params[0])
    w_h4 = align_lstm(jnp.dot(fc_w, wih0_l[0:1, :]))                # (H, NL)
    w_e4 = align_lstm(wih0_l[1:1 + E, :])                           # (E, NL)
    lstm_w0 = jnp.concatenate([w_h4, w_e4], axis=0)                 # (H+E, NL)
    flat.append(lstm_w0)
    if L_lstm > 1:
        lstm_wr = jnp.stack([align_lstm(lstm_params[l][0].astype(f32))
                             for l in range(1, L_lstm)], axis=0)    # (L-1, HL, NL)
        flat.append(lstm_wr)
    lstm_vec_rows = [align_lstm(fc_b * wih0_l[0:1, :] + bih0_l + bhh0_l)]
    for l in range(1, L_lstm):
        _, _, bih, bhh = (p.astype(f32) for p in lstm_params[l])
        lstm_vec_rows.append(align_lstm(bih + bhh))
    lstm_vec = jnp.concatenate(lstm_vec_rows, axis=0)               # (L_lstm, NL)
    flat.append(lstm_vec)

    adj_w, adj_b = (p.astype(f32) for p in adj_params)
    fc_wb = jnp.concatenate([fc_w, fc_b], axis=0)                   # (H+1, 1)
    adj_wb = jnp.concatenate([adj_w, adj_b], axis=0)                # (HL+1, 1)
    flat += [fc_wb, adj_wb]

    kernel, n_params = _make_kernel(T, H, HL, E, L_gru, L_lstm,
                                    float(adjustment_scale), GS, GSL)
    assert len(flat) == n_params

    # ---- batch-tiled parallel grid ----------------------------------------
    B_TILE = _pick_batch_tile(B)
    grid = (pl.cdiv(B, B_TILE),)

    data_specs = [
        pl.BlockSpec((B_TILE, T), lambda i: (i, 0)),   # dedx (B, T)
        pl.BlockSpec((B_TILE, 1), lambda i: (i, 0)),   # lengths
        pl.BlockSpec((B_TILE, E), lambda i: (i, 0)),   # extras
    ]
    # Grid-invariant parameter slabs (block index never changes -> one DMA).
    param_specs = [pl.BlockSpec(p.shape, (lambda i, _nd=p.ndim: (0,) * _nd))
                   for p in flat]
    out_spec = pl.BlockSpec((B_TILE, 1), lambda i: (i, 0))

    return pl.pallas_call(
        kernel,
        out_shape=jax.ShapeDtypeStruct((B, 1), f32),
        grid_spec=pltpu.PrefetchScalarGridSpec(
            num_scalar_prefetch=0,
            grid=grid,
            in_specs=data_specs + param_specs,
            out_specs=out_spec,
            scratch_shapes=[pltpu.VMEM((T, B_TILE, NG), f32)],
        ),
        compiler_params=pltpu.CompilerParams(
            dimension_semantics=("parallel",)),
    )(dedx_bt, len_2d, extras, *flat)


def _reference_forward(dedx_seq, lengths, extras, params, *, adjustment_scale):
    """Pure-JAX reference of the PyTorch forward (eval mode)."""
    gru_params, fc_params, lstm_params, adj_params = params
    B, T, _ = dedx_seq.shape
    H = gru_params[0][1].shape[0]
    HL = lstm_params[0][1].shape[0]
    x_seq = dedx_seq.astype(jnp.float32)
    hs = [jnp.zeros((B, H), jnp.float32) for _ in gru_params]
    for t in range(T):
        mask = (t < lengths.astype(jnp.int32))[:, None]
        layer_in = x_seq[:, t, :]
        for l, (wih_t, whh_t, bih, bhh) in enumerate(gru_params):
            gi = layer_in @ wih_t + bih
            gh = hs[l] @ whh_t + bhh
            r = jax.nn.sigmoid(gi[:, :H] + gh[:, :H])
            z = jax.nn.sigmoid(gi[:, H:2 * H] + gh[:, H:2 * H])
            n = jnp.tanh(gi[:, 2 * H:] + r * gh[:, 2 * H:])
            h_new = (1.0 - z) * n + z * hs[l]
            hs[l] = jnp.where(mask, h_new, hs[l])
            layer_in = hs[l]
    fc_w, fc_b = fc_params
    dedx_pred = hs[-1] @ fc_w + fc_b
    layer_in = jnp.concatenate([dedx_pred, extras.astype(jnp.float32)], axis=1)
    h = None
    for wih_t, whh_t, bih, bhh in lstm_params:
        g = layer_in @ wih_t + bih + bhh
        i_g = jax.nn.sigmoid(g[:, :HL])
        g_g = jnp.tanh(g[:, 2 * HL:3 * HL])
        o_g = jax.nn.sigmoid(g[:, 3 * HL:])
        h = o_g * jnp.tanh(i_g * g_g)
        layer_in = h
    adj_w, adj_b = adj_params
    return dedx_pred + adjustment_scale * (h @ adj_w + adj_b)


def init_params(key, dedx_hidden, dedx_layers, lstm_hidden, lstm_layers):
    """Deterministic PyTorch-style U(-1/sqrt(H), 1/sqrt(H)) init."""
    n_keys = 4 * (dedx_layers + lstm_layers) + 4
    keys = iter(jax.random.split(key, n_keys))

    def u(k, shape, bound):
        return jax.random.uniform(k, shape, jnp.float32, -bound, bound)

    gru = []
    kH = (1.0 / dedx_hidden) ** 0.5
    for l in range(dedx_layers):
        in_sz = 1 if l == 0 else dedx_hidden
        gru.append((
            u(next(keys), (in_sz, 3 * dedx_hidden), kH),         # W_ih^T
            u(next(keys), (dedx_hidden, 3 * dedx_hidden), kH),   # W_hh^T
            u(next(keys), (1, 3 * dedx_hidden), kH),             # b_ih
            u(next(keys), (1, 3 * dedx_hidden), kH),             # b_hh
        ))
    fc = (u(next(keys), (dedx_hidden, 1), kH),                   # W^T
          u(next(keys), (1, 1), kH))                             # b

    lstm = []
    kL = (1.0 / lstm_hidden) ** 0.5
    for l in range(lstm_layers):
        in_sz = 5 if l == 0 else lstm_hidden
        lstm.append((
            u(next(keys), (in_sz, 4 * lstm_hidden), kL),         # W_ih^T
            u(next(keys), (lstm_hidden, 4 * lstm_hidden), kL),   # W_hh^T
            u(next(keys), (1, 4 * lstm_hidden), kL),             # b_ih
            u(next(keys), (1, 4 * lstm_hidden), kL),             # b_hh
        ))
    adj = (u(next(keys), (lstm_hidden, 1), kL),
           u(next(keys), (1, 1), kL))
    return gru, fc, lstm, adj


if __name__ == "__main__":
    key = jax.random.PRNGKey(0)
    B, T = 8, 12
    dedx_hidden, dedx_layers = 32, 2
    lstm_hidden, lstm_layers = 32, 2
    adjustment_scale = 0.1

    k1, k2, k3, kp = jax.random.split(key, 4)
    dedx_seq = jax.random.normal(k1, (B, T, 1), jnp.float32)
    lengths = jax.random.randint(k2, (B,), 3, T + 1)     # valid lengths in [3, T]
    extras = jax.random.normal(k3, (B, 4), jnp.float32)  # LSTM input_size=5 => 4 extras

    params = init_params(kp, dedx_hidden, dedx_layers, lstm_hidden, lstm_layers)
    out = lstm_model_forward(dedx_seq, lengths, extras, params,
                             adjustment_scale=adjustment_scale)
    out = jax.block_until_ready(out)
    assert out.shape == (B, 1) and out.dtype == jnp.float32

    ref = _reference_forward(dedx_seq, lengths, extras, params,
                             adjustment_scale=adjustment_scale)
    err = float(jnp.max(jnp.abs(out - ref)))
    # Tolerance covers default-precision MXU f32 matmul passes on both the
    # kernel and the XLA reference; a real gate/masking bug is O(0.1-1).
    assert err < 2e-3, f"max abs error vs reference: {err}"
    print("KERNEL_OK")
</pallas_src>

<mosaic_0001>
module attributes {stable_mosaic.version = 11 : i64} {
  func.func @kernel(%arg0: i32, %arg1: memref<8x12xf32, #tpu.memory_space<vmem>>, %arg2: memref<8x1xi32, #tpu.memory_space<vmem>>, %arg3: memref<8x4xf32, #tpu.memory_space<vmem>>, %arg4: memref<5x384xf32, #tpu.memory_space<vmem>>, %arg5: memref<2x32x384xf32, #tpu.memory_space<vmem>>, %arg6: memref<1x32x384xf32, #tpu.memory_space<vmem>>, %arg7: memref<36x384xf32, #tpu.memory_space<vmem>>, %arg8: memref<1x32x384xf32, #tpu.memory_space<vmem>>, %arg9: memref<2x384xf32, #tpu.memory_space<vmem>>, %arg10: memref<33x1xf32, #tpu.memory_space<vmem>>, %arg11: memref<33x1xf32, #tpu.memory_space<vmem>>, %arg12: memref<8x1xf32, #tpu.memory_space<vmem>>, %arg13: memref<12x8x384xf32, #tpu.memory_space<vmem>>) attributes {dimension_semantics = [#tpu.dimension_semantics<parallel>], iteration_bounds = array<i64: 1>, scalar_prefetch = 0 : i64, scratch_operands = 1 : i64, tpu.core_type = #tpu.core_type<tc>, window_params = [{transform_indices = @transform_0, window_bounds = array<i64: 8, 12>}, {transform_indices = @transform_1, window_bounds = array<i64: 8, 1>}, {transform_indices = @transform_2, window_bounds = array<i64: 8, 4>}, {pipeline_mode = #tpu.pipeline_mode<synchronous>, transform_indices = @transform_3, window_bounds = array<i64: 5, 384>}, {pipeline_mode = #tpu.pipeline_mode<synchronous>, transform_indices = @transform_4, window_bounds = array<i64: 2, 32, 384>}, {pipeline_mode = #tpu.pipeline_mode<synchronous>, transform_indices = @transform_5, window_bounds = array<i64: 1, 32, 384>}, {pipeline_mode = #tpu.pipeline_mode<synchronous>, transform_indices = @transform_6, window_bounds = array<i64: 36, 384>}, {pipeline_mode = #tpu.pipeline_mode<synchronous>, transform_indices = @transform_7, window_bounds = array<i64: 1, 32, 384>}, {pipeline_mode = #tpu.pipeline_mode<synchronous>, transform_indices = @transform_8, window_bounds = array<i64: 2, 384>}, {pipeline_mode = #tpu.pipeline_mode<synchronous>, transform_indices = @transform_9, window_bounds = array<i64: 33, 1>}, {pipeline_mode = #tpu.pipeline_mode<synchronous>, transform_indices = @transform_10, window_bounds = array<i64: 33, 1>}, {transform_indices = @transform_11, window_bounds = array<i64: 8, 1>}]} {
    %c0 = arith.constant 0 : index
    %c0_0 = arith.constant 0 : index
    %0 = vector.load %arg1[%c0, %c0_0] : memref<8x12xf32, #tpu.memory_space<vmem>>, vector<8x12xf32>
    %c0_1 = arith.constant 0 : index
    %c0_2 = arith.constant 0 : index
    %1 = vector.load %arg2[%c0_1, %c0_2] : memref<8x1xi32, #tpu.memory_space<vmem>>, vector<8x1xi32>
    %2 = tpu.iota {dimensions = array<i32: 1>} : vector<8x12xi32>
    %3 = vector.broadcast %1 : vector<8x1xi32> to vector<8x12xi32>
    %4 = arith.cmpi slt, %2, %3 : vector<8x12xi32>
    %c0_3 = arith.constant 0 : index
    %c0_4 = arith.constant 0 : index
    %5 = vector.load %arg4[%c0_3, %c0_4] : memref<5x384xf32, #tpu.memory_space<vmem>>, vector<1x384xf32>
    %c1 = arith.constant 1 : index
    %c0_5 = arith.constant 0 : index
    %6 = vector.load %arg4[%c1, %c0_5] : memref<5x384xf32, #tpu.memory_space<vmem>>, vector<1x384xf32>
    %7 = vector.extract_strided_slice %0 {offsets = [0, 0], sizes = [8, 1], strides = [1, 1]} : vector<8x12xf32> to vector<8x1xf32>
    %8 = vector.broadcast %7 : vector<8x1xf32> to vector<8x384xf32>
    %9 = vector.broadcast %5 : vector<1x384xf32> to vector<8x384xf32>
    %10 = arith.mulf %8, %9 : vector<8x384xf32>
    %11 = vector.broadcast %6 : vector<1x384xf32> to vector<8x384xf32>
    %12 = arith.addf %10, %11 : vector<8x384xf32>
    %c0_6 = arith.constant 0 : index
    %c0_7 = arith.constant 0 : index
    %c0_8 = arith.constant 0 : index
    %13 = vector.load %arg13[%c0_6, %c0_7, %c0_8] : memref<12x8x384xf32, #tpu.memory_space<vmem>>, vector<1x8x384xf32>
    %14 = vector.shape_cast %13 : vector<1x8x384xf32> to vector<8x384xf32>
    %15 = vector.shape_cast %12 : vector<8x384xf32> to vector<1x8x384xf32>
    tpu.vector_store %arg13[%c0_6, %c0_7, %c0_8], %15 {strides = array<i32>} : memref<12x8x384xf32, #tpu.memory_space<vmem>>, vector<1x8x384xf32>,
    %16 = vector.extract_strided_slice %0 {offsets = [0, 1], sizes = [8, 1], strides = [1, 1]} : vector<8x12xf32> to vector<8x1xf32>
    %17 = vector.broadcast %16 : vector<8x1xf32> to vector<8x384xf32>
    %18 = vector.broadcast %5 : vector<1x384xf32> to vector<8x384xf32>
    %19 = arith.mulf %17, %18 : vector<8x384xf32>
    %20 = vector.broadcast %6 : vector<1x384xf32> to vector<8x384xf32>
    %21 = arith.addf %19, %20 : vector<8x384xf32>
    %c1_9 = arith.constant 1 : index
    %c0_10 = arith.constant 0 : index
    %c0_11 = arith.constant 0 : index
    %22 = vector.load %arg13[%c1_9, %c0_10, %c0_11] : memref<12x8x384xf32, #tpu.memory_space<vmem>>, vector<1x8x384xf32>
    %23 = vector.shape_cast %22 : vector<1x8x384xf32> to vector<8x384xf32>
    %24 = vector.shape_cast %21 : vector<8x384xf32> to vector<1x8x384xf32>
    tpu.vector_store %arg13[%c1_9, %c0_10, %c0_11], %24 {strides = array<i32>} : memref<12x8x384xf32, #tpu.memory_space<vmem>>, vector<1x8x384xf32>,
    %25 = vector.extract_strided_slice %0 {offsets = [0, 2], sizes = [8, 1], strides = [1, 1]} : vector<8x12xf32> to vector<8x1xf32>
    %26 = vector.broadcast %25 : vector<8x1xf32> to vector<8x384xf32>
    %27 = vector.broadcast %5 : vector<1x384xf32> to vector<8x384xf32>
    %28 = arith.mulf %26, %27 : vector<8x384xf32>
    %29 = vector.broadcast %6 : vector<1x384xf32> to vector<8x384xf32>
    %30 = arith.addf %28, %29 : vector<8x384xf32>
    %c2 = arith.constant 2 : index
    %c0_12 = arith.constant 0 : index
    %c0_13 = arith.constant 0 : index
    %31 = vector.load %arg13[%c2, %c0_12, %c0_13] : memref<12x8x384xf32, #tpu.memory_space<vmem>>, vector<1x8x384xf32>
    %32 = vector.shape_cast %31 : vector<1x8x384xf32> to vector<8x384xf32>
    %33 = vector.shape_cast %30 : vector<8x384xf32> to vector<1x8x384xf32>
    tpu.vector_store %arg13[%c2, %c0_12, %c0_13], %33 {strides = array<i32>} : memref<12x8x384xf32, #tpu.memory_space<vmem>>, vector<1x8x384xf32>,
    %34 = vector.extract_strided_slice %0 {offsets = [0, 3], sizes = [8, 1], strides = [1, 1]} : vector<8x12xf32> to vector<8x1xf32>
    %35 = vector.broadcast %34 : vector<8x1xf32> to vector<8x384xf32>
    %36 = vector.broadcast %5 : vector<1x384xf32> to vector<8x384xf32>
    %37 = arith.mulf %35, %36 : vector<8x384xf32>
    %38 = vector.broadcast %6 : vector<1x384xf32> to vector<8x384xf32>
    %39 = arith.addf %37, %38 : vector<8x384xf32>
    %c3 = arith.constant 3 : index
    %c0_14 = arith.constant 0 : index
    %c0_15 = arith.constant 0 : index
    %40 = vector.load %arg13[%c3, %c0_14, %c0_15] : memref<12x8x384xf32, #tpu.memory_space<vmem>>, vector<1x8x384xf32>
    %41 = vector.shape_cast %40 : vector<1x8x384xf32> to vector<8x384xf32>
    %42 = vector.shape_cast %39 : vector<8x384xf32> to vector<1x8x384xf32>
    tpu.vector_store %arg13[%c3, %c0_14, %c0_15], %42 {strides = array<i32>} : memref<12x8x384xf32, #tpu.memory_space<vmem>>, vector<1x8x384xf32>,
    %43 = vector.extract_strided_slice %0 {offsets = [0, 4], sizes = [8, 1], strides = [1, 1]} : vector<8x12xf32> to vector<8x1xf32>
    %44 = vector.broadcast %43 : vector<8x1xf32> to vector<8x384xf32>
    %45 = vector.broadcast %5 : vector<1x384xf32> to vector<8x384xf32>
    %46 = arith.mulf %44, %45 : vector<8x384xf32>
    %47 = vector.broadcast %6 : vector<1x384xf32> to vector<8x384xf32>
    %48 = arith.addf %46, %47 : vector<8x384xf32>
    %c4 = arith.constant 4 : index
    %c0_16 = arith.constant 0 : index
    %c0_17 = arith.constant 0 : index
    %49 = vector.load %arg13[%c4, %c0_16, %c0_17] : memref<12x8x384xf32, #tpu.memory_space<vmem>>, vector<1x8x384xf32>
    %50 = vector.shape_cast %49 : vector<1x8x384xf32> to vector<8x384xf32>
    %51 = vector.shape_cast %48 : vector<8x384xf32> to vector<1x8x384xf32>
    tpu.vector_store %arg13[%c4, %c0_16, %c0_17], %51 {strides = array<i32>} : memref<12x8x384xf32, #tpu.memory_space<vmem>>, vector<1x8x384xf32>,
    %52 = vector.extract_strided_slice %0 {offsets = [0, 5], sizes = [8, 1], strides = [1, 1]} : vector<8x12xf32> to vector<8x1xf32>
    %53 = vector.broadcast %52 : vector<8x1xf32> to vector<8x384xf32>
    %54 = vector.broadcast %5 : vector<1x384xf32> to vector<8x384xf32>
    %55 = arith.mulf %53, %54 : vector<8x384xf32>
    %56 = vector.broadcast %6 : vector<1x384xf32> to vector<8x384xf32>
    %57 = arith.addf %55, %56 : vector<8x384xf32>
    %c5 = arith.constant 5 : index
    %c0_18 = arith.constant 0 : index
    %c0_19 = arith.constant 0 : index
    %58 = vector.load %arg13[%c5, %c0_18, %c0_19] : memref<12x8x384xf32, #tpu.memory_space<vmem>>, vector<1x8x384xf32>
    %59 = vector.shape_cast %58 : vector<1x8x384xf32> to vector<8x384xf32>
    %60 = vector.shape_cast %57 : vector<8x384xf32> to vector<1x8x384xf32>
    tpu.vector_store %arg13[%c5, %c0_18, %c0_19], %60 {strides = array<i32>} : memref<12x8x384xf32, #tpu.memory_space<vmem>>, vector<1x8x384xf32>,
    %61 = vector.extract_strided_slice %0 {offsets = [0, 6], sizes = [8, 1], strides = [1, 1]} : vector<8x12xf32> to vector<8x1xf32>
    %62 = vector.broadcast %61 : vector<8x1xf32> to vector<8x384xf32>
    %63 = vector.broadcast %5 : vector<1x384xf32> to vector<8x384xf32>
    %64 = arith.mulf %62, %63 : vector<8x384xf32>
    %65 = vector.broadcast %6 : vector<1x384xf32> to vector<8x384xf32>
    %66 = arith.addf %64, %65 : vector<8x384xf32>
    %c6 = arith.constant 6 : index
    %c0_20 = arith.constant 0 : index
    %c0_21 = arith.constant 0 : index
    %67 = vector.load %arg13[%c6, %c0_20, %c0_21] : memref<12x8x384xf32, #tpu.memory_space<vmem>>, vector<1x8x384xf32>
    %68 = vector.shape_cast %67 : vector<1x8x384xf32> to vector<8x384xf32>
    %69 = vector.shape_cast %66 : vector<8x384xf32> to vector<1x8x384xf32>
    tpu.vector_store %arg13[%c6, %c0_20, %c0_21], %69 {strides = array<i32>} : memref<12x8x384xf32, #tpu.memory_space<vmem>>, vector<1x8x384xf32>,
    %70 = vector.extract_strided_slice %0 {offsets = [0, 7], sizes = [8, 1], strides = [1, 1]} : vector<8x12xf32> to vector<8x1xf32>
    %71 = vector.broadcast %70 : vector<8x1xf32> to vector<8x384xf32>
    %72 = vector.broadcast %5 : vector<1x384xf32> to vector<8x384xf32>
    %73 = arith.mulf %71, %72 : vector<8x384xf32>
    %74 = vector.broadcast %6 : vector<1x384xf32> to vector<8x384xf32>
    %75 = arith.addf %73, %74 : vector<8x384xf32>
    %c7 = arith.constant 7 : index
    %c0_22 = arith.constant 0 : index
    %c0_23 = arith.constant 0 : index
    %76 = vector.load %arg13[%c7, %c0_22, %c0_23] : memref<12x8x384xf32, #tpu.memory_space<vmem>>, vector<1x8x384xf32>
    %77 = vector.shape_cast %76 : vector<1x8x384xf32> to vector<8x384xf32>
    %78 = vector.shape_cast %75 : vector<8x384xf32> to vector<1x8x384xf32>
    tpu.vector_store %arg13[%c7, %c0_22, %c0_23], %78 {strides = array<i32>} : memref<12x8x384xf32, #tpu.memory_space<vmem>>, vector<1x8x384xf32>,
    %79 = vector.extract_strided_slice %0 {offsets = [0, 8], sizes = [8, 1], strides = [1, 1]} : vector<8x12xf32> to vector<8x1xf32>
    %80 = vector.broadcast %79 : vector<8x1xf32> to vector<8x384xf32>
    %81 = vector.broadcast %5 : vector<1x384xf32> to vector<8x384xf32>
    %82 = arith.mulf %80, %81 : vector<8x384xf32>
    %83 = vector.broadcast %6 : vector<1x384xf32> to vector<8x384xf32>
    %84 = arith.addf %82, %83 : vector<8x384xf32>
    %c8 = arith.constant 8 : index
    %c0_24 = arith.constant 0 : index
    %c0_25 = arith.constant 0 : index
    %85 = vector.load %arg13[%c8, %c0_24, %c0_25] : memref<12x8x384xf32, #tpu.memory_space<vmem>>, vector<1x8x384xf32>
    %86 = vector.shape_cast %85 : vector<1x8x384xf32> to vector<8x384xf32>
    %87 = vector.shape_cast %84 : vector<8x384xf32> to vector<1x8x384xf32>
    tpu.vector_store %arg13[%c8, %c0_24, %c0_25], %87 {strides = array<i32>} : memref<12x8x384xf32, #tpu.memory_space<vmem>>, vector<1x8x384xf32>,
    %88 = vector.extract_strided_slice %0 {offsets = [0, 9], sizes = [8, 1], strides = [1, 1]} : vector<8x12xf32> to vector<8x1xf32>
    %89 = vector.broadcast %88 : vector<8x1xf32> to vector<8x384xf32>
    %90 = vector.broadcast %5 : vector<1x384xf32> to vector<8x384xf32>
    %91 = arith.mulf %89, %90 : vector<8x384xf32>
    %92 = vector.broadcast %6 : vector<1x384xf32> to vector<8x384xf32>
    %93 = arith.addf %91, %92 : vector<8x384xf32>
    %c9 = arith.constant 9 : index
    %c0_26 = arith.constant 0 : index
    %c0_27 = arith.constant 0 : index
    %94 = vector.load %arg13[%c9, %c0_26, %c0_27] : memref<12x8x384xf32, #tpu.memory_space<vmem>>, vector<1x8x384xf32>
    %95 = vector.shape_cast %94 : vector<1x8x384xf32> to vector<8x384xf32>
    %96 = vector.shape_cast %93 : vector<8x384xf32> to vector<1x8x384xf32>
    tpu.vector_store %arg13[%c9, %c0_26, %c0_27], %96 {strides = array<i32>} : memref<12x8x384xf32, #tpu.memory_space<vmem>>, vector<1x8x384xf32>,
    %97 = vector.extract_strided_slice %0 {offsets = [0, 10], sizes = [8, 1], strides = [1, 1]} : vector<8x12xf32> to vector<8x1xf32>
    %98 = vector.broadcast %97 : vector<8x1xf32> to vector<8x384xf32>
    %99 = vector.broadcast %5 : vector<1x384xf32> to vector<8x384xf32>
    %100 = arith.mulf %98, %99 : vector<8x384xf32>
    %101 = vector.broadcast %6 : vector<1x384xf32> to vector<8x384xf32>
    %102 = arith.addf %100, %101 : vector<8x384xf32>
    %c10 = arith.constant 10 : index
    %c0_28 = arith.constant 0 : index
    %c0_29 = arith.constant 0 : index
    %103 = vector.load %arg13[%c10, %c0_28, %c0_29] : memref<12x8x384xf32, #tpu.memory_space<vmem>>, vector<1x8x384xf32>
    %104 = vector.shape_cast %103 : vector<1x8x384xf32> to vector<8x384xf32>
    %105 = vector.shape_cast %102 : vector<8x384xf32> to vector<1x8x384xf32>
    tpu.vector_store %arg13[%c10, %c0_28, %c0_29], %105 {strides = array<i32>} : memref<12x8x384xf32, #tpu.memory_space<vmem>>, vector<1x8x384xf32>,
    %106 = vector.extract_strided_slice %0 {offsets = [0, 11], sizes = [8, 1], strides = [1, 1]} : vector<8x12xf32> to vector<8x1xf32>
    %107 = vector.broadcast %106 : vector<8x1xf32> to vector<8x384xf32>
    %108 = vector.broadcast %5 : vector<1x384xf32> to vector<8x384xf32>
    %109 = arith.mulf %107, %108 : vector<8x384xf32>
    %110 = vector.broadcast %6 : vector<1x384xf32> to vector<8x384xf32>
    %111 = arith.addf %109, %110 : vector<8x384xf32>
    %c11 = arith.constant 11 : index
    %c0_30 = arith.constant 0 : index
    %c0_31 = arith.constant 0 : index
    %112 = vector.load %arg13[%c11, %c0_30, %c0_31] : memref<12x8x384xf32, #tpu.memory_space<vmem>>, vector<1x8x384xf32>
    %113 = vector.shape_cast %112 : vector<1x8x384xf32> to vector<8x384xf32>
    %114 = vector.shape_cast %111 : vector<8x384xf32> to vector<1x8x384xf32>
    tpu.vector_store %arg13[%c11, %c0_30, %c0_31], %114 {strides = array<i32>} : memref<12x8x384xf32, #tpu.memory_space<vmem>>, vector<1x8x384xf32>,
    %cst = arith.constant 0.000000e+00 : f32
    %115 = vector.broadcast %cst : f32 to vector<8x32xf32>
    %cst_32 = arith.constant 0.000000e+00 : f32
    %116 = vector.broadcast %cst_32 : f32 to vector<8x32xf32>
    %117 = vector.extract_strided_slice %4 {offsets = [0, 0], sizes = [8, 1], strides = [1, 1]} : vector<8x12xi1> to vector<8x1xi1>
    %118 = vector.shape_cast %117 : vector<8x1xi1> to vector<8x1xi1>
    %119 = vector.broadcast %118 : vector<8x1xi1> to vector<8x32xi1>
    %c0_33 = arith.constant 0 : index
    %c0_34 = arith.constant 0 : index
    %c0_35 = arith.constant 0 : index
    %120 = vector.load %arg13[%c0_33, %c0_34, %c0_35] : memref<12x8x384xf32, #tpu.memory_space<vmem>>, vector<1x8x384xf32>
    %121 = vector.shape_cast %120 : vector<1x8x384xf32> to vector<8x384xf32>
    %c0_36 = arith.constant 0 : index
    %c0_37 = arith.constant 0 : index
    %c0_38 = arith.constant 0 : index
    %122 = vector.load %arg5[%c0_36, %c0_37, %c0_38] : memref<2x32x384xf32, #tpu.memory_space<vmem>>, vector<1x32x384xf32>
    %123 = vector.shape_cast %122 : vector<1x32x384xf32> to vector<32x384xf32>
    %cst_39 = arith.constant dense<0.000000e+00> : vector<8x384xf32>
    %124 = tpu.matmul %115, %123, %cst_39 {dimension_numbers = #tpu.dot_dimension_numbers<[1], [0], [0], [1], [0, 0, 1, 1], [], []>} : vector<8x32xf32>, vector<32x384xf32>, vector<8x384xf32> -> vector<8x384xf32>
    %c3_40 = arith.constant 3 : index
    %c0_41 = arith.constant 0 : index
    %125 = vector.load %arg4[%c3_40, %c0_41] : memref<5x384xf32, #tpu.memory_space<vmem>>, vector<1x384xf32>
    %126 = vector.broadcast %125 : vector<1x384xf32> to vector<8x384xf32>
    %127 = arith.addf %124, %126 : vector<8x384xf32>
    %128 = vector.extract_strided_slice %121 {offsets = [0, 0], sizes = [8, 32], strides = [1, 1]} : vector<8x384xf32> to vector<8x32xf32>
    %129 = vector.extract_strided_slice %127 {offsets = [0, 0], sizes = [8, 32], strides = [1, 1]} : vector<8x384xf32> to vector<8x32xf32>
    %130 = arith.addf %128, %129 : vector<8x32xf32>
    %131 = arith.negf %130 : vector<8x32xf32>
    %132 = math.exp %131 : vector<8x32xf32>
    %cst_42 = arith.constant 1.000000e+00 : f32
    %133 = vector.broadcast %cst_42 : f32 to vector<8x32xf32>
    %134 = arith.addf %133, %132 : vector<8x32xf32>
    %135 = arith.divf %133, %134 : vector<8x32xf32>
    %136 = vector.extract_strided_slice %121 {offsets = [0, 128], sizes = [8, 32], strides = [1, 1]} : vector<8x384xf32> to vector<8x32xf32>
    %137 = vector.extract_strided_slice %127 {offsets = [0, 128], sizes = [8, 32], strides = [1, 1]} : vector<8x384xf32> to vector<8x32xf32>
    %138 = arith.addf %136, %137 : vector<8x32xf32>
    %139 = arith.negf %138 : vector<8x32xf32>
    %140 = math.exp %139 : vector<8x32xf32>
    %cst_43 = arith.constant 1.000000e+00 : f32
    %141 = vector.broadcast %cst_43 : f32 to vector<8x32xf32>
    %142 = arith.addf %141, %140 : vector<8x32xf32>
    %143 = arith.divf %141, %142 : vector<8x32xf32>
    %144 = vector.extract_strided_slice %121 {offsets = [0, 256], sizes = [8, 32], strides = [1, 1]} : vector<8x384xf32> to vector<8x32xf32>
    %145 = vector.extract_strided_slice %127 {offsets = [0, 256], sizes = [8, 32], strides = [1, 1]} : vector<8x384xf32> to vector<8x32xf32>
    %146 = arith.mulf %135, %145 : vector<8x32xf32>
    %147 = arith.addf %144, %146 : vector<8x32xf32>
    %148 = math.tanh %147 : vector<8x32xf32>
    %cst_44 = arith.constant 1.000000e+00 : f32
    %149 = vector.broadcast %cst_44 : f32 to vector<8x32xf32>
    %150 = arith.subf %149, %143 : vector<8x32xf32>
    %151 = arith.mulf %150, %148 : vector<8x32xf32>
    %152 = arith.mulf %143, %115 : vector<8x32xf32>
    %153 = arith.addf %151, %152 : vector<8x32xf32>
    %154 = arith.select %119, %153, %115 : vector<8x32xi1>, vector<8x32xf32>
    %c0_45 = arith.constant 0 : index
    %c0_46 = arith.constant 0 : index
    %c0_47 = arith.constant 0 : index
    %155 = vector.load %arg6[%c0_45, %c0_46, %c0_47] : memref<1x32x384xf32, #tpu.memory_space<vmem>>, vector<1x32x384xf32>
    %156 = vector.shape_cast %155 : vector<1x32x384xf32> to vector<32x384xf32>
    %cst_48 = arith.constant dense<0.000000e+00> : vector<8x384xf32>
    %157 = tpu.matmul %154, %156, %cst_48 {dimension_numbers = #tpu.dot_dimension_numbers<[1], [0], [0], [1], [0, 0, 1, 1], [], []>} : vector<8x32xf32>, vector<32x384xf32>, vector<8x384xf32> -> vector<8x384xf32>
    %c2_49 = arith.constant 2 : index
    %c0_50 = arith.constant 0 : index
    %158 = vector.load %arg4[%c2_49, %c0_50] : memref<5x384xf32, #tpu.memory_space<vmem>>, vector<1x384xf32>
    %159 = vector.broadcast %158 : vector<1x384xf32> to vector<8x384xf32>
    %160 = arith.addf %157, %159 : vector<8x384xf32>
    %c1_51 = arith.constant 1 : index
    %c0_52 = arith.constant 0 : index
    %c0_53 = arith.constant 0 : index
    %161 = vector.load %arg5[%c1_51, %c0_52, %c0_53] : memref<2x32x384xf32, #tpu.memory_space<vmem>>, vector<1x32x384xf32>
    %162 = vector.shape_cast %161 : vector<1x32x384xf32> to vector<32x384xf32>
    %cst_54 = arith.constant dense<0.000000e+00> : vector<8x384xf32>
    %163 = tpu.matmul %116, %162, %cst_54 {dimension_numbers = #tpu.dot_dimension_numbers<[1], [0], [0], [1], [0, 0, 1, 1], [], []>} : vector<8x32xf32>, vector<32x384xf32>, vector<8x384xf32> -> vector<8x384xf32>
    %c4_55 = arith.constant 4 : index
    %c0_56 = arith.constant 0 : index
    %164 = vector.load %arg4[%c4_55, %c0_56] : memref<5x384xf32, #tpu.memory_space<vmem>>, vector<1x384xf32>
    %165 = vector.broadcast %164 : vector<1x384xf32> to vector<8x384xf32>
    %166 = arith.addf %163, %165 : vector<8x384xf32>
    %167 = vector.extract_strided_slice %160 {offsets = [0, 0], sizes = [8, 32], strides = [1, 1]} : vector<8x384xf32> to vector<8x32xf32>
    %168 = vector.extract_strided_slice %166 {offsets = [0, 0], sizes = [8, 32], strides = [1, 1]} : vector<8x384xf32> to vector<8x32xf32>
    %169 = arith.addf %167, %168 : vector<8x32xf32>
    %170 = arith.negf %169 : vector<8x32xf32>
    %171 = math.exp %170 : vector<8x32xf32>
    %cst_57 = arith.constant 1.000000e+00 : f32
    %172 = vector.broadcast %cst_57 : f32 to vector<8x32xf32>
    %173 = arith.addf %172, %171 : vector<8x32xf32>
    %174 = arith.divf %172, %173 : vector<8x32xf32>
    %175 = vector.extract_strided_slice %160 {offsets = [0, 128], sizes = [8, 32], strides = [1, 1]} : vector<8x384xf32> to vector<8x32xf32>
    %176 = vector.extract_strided_slice %166 {offsets = [0, 128], sizes = [8, 32], strides = [1, 1]} : vector<8x384xf32> to vector<8x32xf32>
    %177 = arith.addf %175, %176 : vector<8x32xf32>
    %178 = arith.negf %177 : vector<8x32xf32>
    %179 = math.exp %178 : vector<8x32xf32>
    %cst_58 = arith.constant 1.000000e+00 : f32
    %180 = vector.broadcast %cst_58 : f32 to vector<8x32xf32>
    %181 = arith.addf %180, %179 : vector<8x32xf32>
    %182 = arith.divf %180, %181 : vector<8x32xf32>
    %183 = vector.extract_strided_slice %160 {offsets = [0, 256], sizes = [8, 32], strides = [1, 1]} : vector<8x384xf32> to vector<8x32xf32>
    %184 = vector.extract_strided_slice %166 {offsets = [0, 256], sizes = [8, 32], strides = [1, 1]} : vector<8x384xf32> to vector<8x32xf32>
    %185 = arith.mulf %174, %184 : vector<8x32xf32>
    %186 = arith.addf %183, %185 : vector<8x32xf32>
    %187 = math.tanh %186 : vector<8x32xf32>
    %cst_59 = arith.constant 1.000000e+00 : f32
    %188 = vector.broadcast %cst_59 : f32 to vector<8x32xf32>
    %189 = arith.subf %188, %182 : vector<8x32xf32>
    %190 = arith.mulf %189, %187 : vector<8x32xf32>
    %191 = arith.mulf %182, %116 : vector<8x32xf32>
    %192 = arith.addf %190, %191 : vector<8x32xf32>
    %193 = arith.select %119, %192, %116 : vector<8x32xi1>, vector<8x32xf32>
    %194 = vector.extract_strided_slice %4 {offsets = [0, 1], sizes = [8, 1], strides = [1, 1]} : vector<8x12xi1> to vector<8x1xi1>
    %195 = vector.shape_cast %194 : vector<8x1xi1> to vector<8x1xi1>
    %196 = vector.broadcast %195 : vector<8x1xi1> to vector<8x32xi1>
    %c1_60 = arith.constant 1 : index
    %c0_61 = arith.constant 0 : index
    %c0_62 = arith.constant 0 : index
    %197 = vector.load %arg13[%c1_60, %c0_61, %c0_62] : memref<12x8x384xf32, #tpu.memory_space<vmem>>, vector<1x8x384xf32>
    %198 = vector.shape_cast %197 : vector<1x8x384xf32> to vector<8x384xf32>
    %c0_63 = arith.constant 0 : index
    %c0_64 = arith.constant 0 : index
    %c0_65 = arith.constant 0 : index
    %199 = vector.load %arg5[%c0_63, %c0_64, %c0_65] : memref<2x32x384xf32, #tpu.memory_space<vmem>>, vector<1x32x384xf32>
    %200 = vector.shape_cast %199 : vector<1x32x384xf32> to vector<32x384xf32>
    %cst_66 = arith.constant dense<0.000000e+00> : vector<8x384xf32>
    %201 = tpu.matmul %154, %200, %cst_66 {dimension_numbers = #tpu.dot_dimension_numbers<[1], [0], [0], [1], [0, 0, 1, 1], [], []>} : vector<8x32xf32>, vector<32x384xf32>, vector<8x384xf32> -> vector<8x384xf32>
    %c3_67 = arith.constant 3 : index
    %c0_68 = arith.constant 0 : index
    %202 = vector.load %arg4[%c3_67, %c0_68] : memref<5x384xf32, #tpu.memory_space<vmem>>, vector<1x384xf32>
    %203 = vector.broadcast %202 : vector<1x384xf32> to vector<8x384xf32>
    %204 = arith.addf %201, %203 : vector<8x384xf32>
    %205 = vector.extract_strided_slice %198 {offsets = [0, 0], sizes = [8, 32], strides = [1, 1]} : vector<8x384xf32> to vector<8x32xf32>
    %206 = vector.extract_strided_slice %204 {offsets = [0, 0], sizes = [8, 32], strides = [1, 1]} : vector<8x384xf32> to vector<8x32xf32>
    %207 = arith.addf %205, %206 : vector<8x32xf32>
    %208 = arith.negf %207 : vector<8x32xf32>
    %209 = math.exp %208 : vector<8x32xf32>
    %cst_69 = arith.constant 1.000000e+00 : f32
    %210 = vector.broadcast %cst_69 : f32 to vector<8x32xf32>
    %211 = arith.addf %210, %209 : vector<8x32xf32>
    %212 = arith.divf %210, %211 : vector<8x32xf32>
    %213 = vector.extract_strided_slice %198 {offsets = [0, 128], sizes = [8, 32], strides = [1, 1]} : vector<8x384xf32> to vector<8x32xf32>
    %214 = vector.extract_strided_slice %204 {offsets = [0, 128], sizes = [8, 32], strides = [1, 1]} : vector<8x384xf32> to vector<8x32xf32>
    %215 = arith.addf %213, %214 : vector<8x32xf32>
    %216 = arith.negf %215 : vector<8x32xf32>
    %217 = math.exp %216 : vector<8x32xf32>
    %cst_70 = arith.constant 1.000000e+00 : f32
    %218 = vector.broadcast %cst_70 : f32 to vector<8x32xf32>
    %219 = arith.addf %218, %217 : vector<8x32xf32>
    %220 = arith.divf %218, %219 : vector<8x32xf32>
    %221 = vector.extract_strided_slice %198 {offsets = [0, 256], sizes = [8, 32], strides = [1, 1]} : vector<8x384xf32> to vector<8x32xf32>
    %222 = vector.extract_strided_slice %204 {offsets = [0, 256], sizes = [8, 32], strides = [1, 1]} : vector<8x384xf32> to vector<8x32xf32>
    %223 = arith.mulf %212, %222 : vector<8x32xf32>
    %224 = arith.addf %221, %223 : vector<8x32xf32>
    %225 = math.tanh %224 : vector<8x32xf32>
    %cst_71 = arith.constant 1.000000e+00 : f32
    %226 = vector.broadcast %cst_71 : f32 to vector<8x32xf32>
    %227 = arith.subf %226, %220 : vector<8x32xf32>
    %228 = arith.mulf %227, %225 : vector<8x32xf32>
    %229 = arith.mulf %220, %154 : vector<8x32xf32>
    %230 = arith.addf %228, %229 : vector<8x32xf32>
    %231 = arith.select %196, %230, %154 : vector<8x32xi1>, vector<8x32xf32>
    %c0_72 = arith.constant 0 : index
    %c0_73 = arith.constant 0 : index
    %c0_74 = arith.constant 0 : index
    %232 = vector.load %arg6[%c0_72, %c0_73, %c0_74] : memref<1x32x384xf32, #tpu.memory_space<vmem>>, vector<1x32x384xf32>
    %233 = vector.shape_cast %232 : vector<1x32x384xf32> to vector<32x384xf32>
    %cst_75 = arith.constant dense<0.000000e+00> : vector<8x384xf32>
    %234 = tpu.matmul %231, %233, %cst_75 {dimension_numbers = #tpu.dot_dimension_numbers<[1], [0], [0], [1], [0, 0, 1, 1], [], []>} : vector<8x32xf32>, vector<32x384xf32>, vector<8x384xf32> -> vector<8x384xf32>
    %c2_76 = arith.constant 2 : index
    %c0_77 = arith.constant 0 : index
    %235 = vector.load %arg4[%c2_76, %c0_77] : memref<5x384xf32, #tpu.memory_space<vmem>>, vector<1x384xf32>
    %236 = vector.broadcast %235 : vector<1x384xf32> to vector<8x384xf32>
    %237 = arith.addf %234, %236 : vector<8x384xf32>
    %c1_78 = arith.constant 1 : index
    %c0_79 = arith.constant 0 : index
    %c0_80 = arith.constant 0 : index
    %238 = vector.load %arg5[%c1_78, %c0_79, %c0_80] : memref<2x32x384xf32, #tpu.memory_space<vmem>>, vector<1x32x384xf32>
    %239 = vector.shape_cast %238 : vector<1x32x384xf32> to vector<32x384xf32>
    %cst_81 = arith.constant dense<0.000000e+00> : vector<8x384xf32>
    %240 = tpu.matmul %193, %239, %cst_81 {dimension_numbers = #tpu.dot_dimension_numbers<[1], [0], [0], [1], [0, 0, 1, 1], [], []>} : vector<8x32xf32>, vector<32x384xf32>, vector<8x384xf32> -> vector<8x384xf32>
    %c4_82 = arith.constant 4 : index
    %c0_83 = arith.constant 0 : index
    %241 = vector.load %arg4[%c4_82, %c0_83] : memref<5x384xf32, #tpu.memory_space<vmem>>, vector<1x384xf32>
    %242 = vector.broadcast %241 : vector<1x384xf32> to vector<8x384xf32>
    %243 = arith.addf %240, %242 : vector<8x384xf32>
    %244 = vector.extract_strided_slice %237 {offsets = [0, 0], sizes = [8, 32], strides = [1, 1]} : vector<8x384xf32> to vector<8x32xf32>
    %245 = vector.extract_strided_slice %243 {offsets = [0, 0], sizes = [8, 32], strides = [1, 1]} : vector<8x384xf32> to vector<8x32xf32>
    %246 = arith.addf %244, %245 : vector<8x32xf32>
    %247 = arith.negf %246 : vector<8x32xf32>
    %248 = math.exp %247 : vector<8x32xf32>
    %cst_84 = arith.constant 1.000000e+00 : f32
    %249 = vector.broadcast %cst_84 : f32 to vector<8x32xf32>
    %250 = arith.addf %249, %248 : vector<8x32xf32>
    %251 = arith.divf %249, %250 : vector<8x32xf32>
    %252 = vector.extract_strided_slice %237 {offsets = [0, 128], sizes = [8, 32], strides = [1, 1]} : vector<8x384xf32> to vector<8x32xf32>
    %253 = vector.extract_strided_slice %243 {offsets = [0, 128], sizes = [8, 32], strides = [1, 1]} : vector<8x384xf32> to vector<8x32xf32>
    %254 = arith.addf %252, %253 : vector<8x32xf32>
    %255 = arith.negf %254 : vector<8x32xf32>
    %256 = math.exp %255 : vector<8x32xf32>
    %cst_85 = arith.constant 1.000000e+00 : f32
    %257 = vector.broadcast %cst_85 : f32 to vector<8x32xf32>
    %258 = arith.addf %257, %256 : vector<8x32xf32>
    %259 = arith.divf %257, %258 : vector<8x32xf32>
    %260 = vector.extract_strided_slice %237 {offsets = [0, 256], sizes = [8, 32], strides = [1, 1]} : vector<8x384xf32> to vector<8x32xf32>
    %261 = vector.extract_strided_slice %243 {offsets = [0, 256], sizes = [8, 32], strides = [1, 1]} : vector<8x384xf32> to vector<8x32xf32>
    %262 = arith.mulf %251, %261 : vector<8x32xf32>
    %263 = arith.addf %260, %262 : vector<8x32xf32>
    %264 = math.tanh %263 : vector<8x32xf32>
    %cst_86 = arith.constant 1.000000e+00 : f32
    %265 = vector.broadcast %cst_86 : f32 to vector<8x32xf32>
    %266 = arith.subf %265, %259 : vector<8x32xf32>
    %267 = arith.mulf %266, %264 : vector<8x32xf32>
    %268 = arith.mulf %259, %193 : vector<8x32xf32>
    %269 = arith.addf %267, %268 : vector<8x32xf32>
    %270 = arith.select %196, %269, %193 : vector<8x32xi1>, vector<8x32xf32>
    %271 = vector.extract_strided_slice %4 {offsets = [0, 2], sizes = [8, 1], strides = [1, 1]} : vector<8x12xi1> to vector<8x1xi1>
    %272 = vector.shape_cast %271 : vector<8x1xi1> to vector<8x1xi1>
    %273 = vector.broadcast %272 : vector<8x1xi1> to vector<8x32xi1>
    %c2_87 = arith.constant 2 : index
    %c0_88 = arith.constant 0 : index
    %c0_89 = arith.constant 0 : index
    %274 = vector.load %arg13[%c2_87, %c0_88, %c0_89] : memref<12x8x384xf32, #tpu.memory_space<vmem>>, vector<1x8x384xf32>
    %275 = vector.shape_cast %274 : vector<1x8x384xf32> to vector<8x384xf32>
    %c0_90 = arith.constant 0 : index
    %c0_91 = arith.constant 0 : index
    %c0_92 = arith.constant 0 : index
    %276 = vector.load %arg5[%c0_90, %c0_91, %c0_92] : memref<2x32x384xf32, #tpu.memory_space<vmem>>, vector<1x32x384xf32>
    %277 = vector.shape_cast %276 : vector<1x32x384xf32> to vector<32x384xf32>
    %cst_93 = arith.constant dense<0.000000e+00> : vector<8x384xf32>
    %278 = tpu.matmul %231, %277, %cst_93 {dimension_numbers = #tpu.dot_dimension_numbers<[1], [0], [0], [1], [0, 0, 1, 1], [], []>} : vector<8x32xf32>, vector<32x384xf32>, vector<8x384xf32> -> vector<8x384xf32>
    %c3_94 = arith.constant 3 : index
    %c0_95 = arith.constant 0 : index
    %279 = vector.load %arg4[%c3_94, %c0_95] : memref<5x384xf32, #tpu.memory_space<vmem>>, vector<1x384xf32>
    %280 = vector.broadcast %279 : vector<1x384xf32> to vector<8x384xf32>
    %281 = arith.addf %278, %280 : vector<8x384xf32>
    %282 = vector.extract_strided_slice %275 {offsets = [0, 0], sizes = [8, 32], strides = [1, 1]} : vector<8x384xf32> to vector<8x32xf32>
    %283 = vector.extract_strided_slice %281 {offsets = [0, 0], sizes = [8, 32], strides = [1, 1]} : vector<8x384xf32> to vector<8x32xf32>
    %284 = arith.addf %282, %283 : vector<8x32xf32>
    %285 = arith.negf %284 : vector<8x32xf32>
    %286 = math.exp %285 : vector<8x32xf32>
    %cst_96 = arith.constant 1.000000e+00 : f32
    %287 = vector.broadcast %cst_96 : f32 to vector<8x32xf32>
    %288 = arith.addf %287, %286 : vector<8x32xf32>
    %289 = arith.divf %287, %288 : vector<8x32xf32>
    %290 = vector.extract_strided_slice %275 {offsets = [0, 128], sizes = [8, 32], strides = [1, 1]} : vector<8x384xf32> to vector<8x32xf32>
    %291 = vector.extract_strided_slice %281 {offsets = [0, 128], sizes = [8, 32], strides = [1, 1]} : vector<8x384xf32> to vector<8x32xf32>
    %292 = arith.addf %290, %291 : vector<8x32xf32>
    %293 = arith.negf %292 : vector<8x32xf32>
    %294 = math.exp %293 : vector<8x32xf32>
    %cst_97 = arith.constant 1.000000e+00 : f32
    %295 = vector.broadcast %cst_97 : f32 to vector<8x32xf32>
    %296 = arith.addf %295, %294 : vector<8x32xf32>
    %297 = arith.divf %295, %296 : vector<8x32xf32>
    %298 = vector.extract_strided_slice %275 {offsets = [0, 256], sizes = [8, 32], strides = [1, 1]} : vector<8x384xf32> to vector<8x32xf32>
    %299 = vector.extract_strided_slice %281 {offsets = [0, 256], sizes = [8, 32], strides = [1, 1]} : vector<8x384xf32> to vector<8x32xf32>
    %300 = arith.mulf %289, %299 : vector<8x32xf32>
    %301 = arith.addf %298, %300 : vector<8x32xf32>
    %302 = math.tanh %301 : vector<8x32xf32>
    %cst_98 = arith.constant 1.000000e+00 : f32
    %303 = vector.broadcast %cst_98 : f32 to vector<8x32xf32>
    %304 = arith.subf %303, %297 : vector<8x32xf32>
    %305 = arith.mulf %304, %302 : vector<8x32xf32>
    %306 = arith.mulf %297, %231 : vector<8x32xf32>
    %307 = arith.addf %305, %306 : vector<8x32xf32>
    %308 = arith.select %273, %307, %231 : vector<8x32xi1>, vector<8x32xf32>
    %c0_99 = arith.constant 0 : index
    %c0_100 = arith.constant 0 : index
    %c0_101 = arith.constant 0 : index
    %309 = vector.load %arg6[%c0_99, %c0_100, %c0_101] : memref<1x32x384xf32, #tpu.memory_space<vmem>>, vector<1x32x384xf32>
    %310 = vector.shape_cast %309 : vector<1x32x384xf32> to vector<32x384xf32>
    %cst_102 = arith.constant dense<0.000000e+00> : vector<8x384xf32>
    %311 = tpu.matmul %308, %310, %cst_102 {dimension_numbers = #tpu.dot_dimension_numbers<[1], [0], [0], [1], [0, 0, 1, 1], [], []>} : vector<8x32xf32>, vector<32x384xf32>, vector<8x384xf32> -> vector<8x384xf32>
    %c2_103 = arith.constant 2 : index
    %c0_104 = arith.constant 0 : index
    %312 = vector.load %arg4[%c2_103, %c0_104] : memref<5x384xf32, #tpu.memory_space<vmem>>, vector<1x384xf32>
    %313 = vector.broadcast %312 : vector<1x384xf32> to vector<8x384xf32>
    %314 = arith.addf %311, %313 : vector<8x384xf32>
    %c1_105 = arith.constant 1 : index
    %c0_106 = arith.constant 0 : index
    %c0_107 = arith.constant 0 : index
    %315 = vector.load %arg5[%c1_105, %c0_106, %c0_107] : memref<2x32x384xf32, #tpu.memory_space<vmem>>, vector<1x32x384xf32>
    %316 = vector.shape_cast %315 : vector<1x32x384xf32> to vector<32x384xf32>
    %cst_108 = arith.constant dense<0.000000e+00> : vector<8x384xf32>
    %317 = tpu.matmul %270, %316, %cst_108 {dimension_numbers = #tpu.dot_dimension_numbers<[1], [0], [0], [1], [0, 0, 1, 1], [], []>} : vector<8x32xf32>, vector<32x384xf32>, vector<8x384xf32> -> vector<8x384xf32>
    %c4_109 = arith.constant 4 : index
    %c0_110 = arith.constant 0 : index
    %318 = vector.load %arg4[%c4_109, %c0_110] : memref<5x384xf32, #tpu.memory_space<vmem>>, vector<1x384xf32>
    %319 = vector.broadcast %318 : vector<1x384xf32> to vector<8x384xf32>
    %320 = arith.addf %317, %319 : vector<8x384xf32>
    %321 = vector.extract_strided_slice %314 {offsets = [0, 0], sizes = [8, 32], strides = [1, 1]} : vector<8x384xf32> to vector<8x32xf32>
    %322 = vector.extract_strided_slice %320 {offsets = [0, 0], sizes = [8, 32], strides = [1, 1]} : vector<8x384xf32> to vector<8x32xf32>
    %323 = arith.addf %321, %322 : vector<8x32xf32>
    %324 = arith.negf %323 : vector<8x32xf32>
    %325 = math.exp %324 : vector<8x32xf32>
    %cst_111 = arith.constant 1.000000e+00 : f32
    %326 = vector.broadcast %cst_111 : f32 to vector<8x32xf32>
    %327 = arith.addf %326, %325 : vector<8x32xf32>
    %328 = arith.divf %326, %327 : vector<8x32xf32>
    %329 = vector.extract_strided_slice %314 {offsets = [0, 128], sizes = [8, 32], strides = [1, 1]} : vector<8x384xf32> to vector<8x32xf32>
    %330 = vector.extract_strided_slice %320 {offsets = [0, 128], sizes = [8, 32], strides = [1, 1]} : vector<8x384xf32> to vector<8x32xf32>
    %331 = arith.addf %329, %330 : vector<8x32xf32>
    %332 = arith.negf %331 : vector<8x32xf32>
    %333 = math.exp %332 : vector<8x32xf32>
    %cst_112 = arith.constant 1.000000e+00 : f32
    %334 = vector.broadcast %cst_112 : f32 to vector<8x32xf32>
    %335 = arith.addf %334, %333 : vector<8x32xf32>
    %336 = arith.divf %334, %335 : vector<8x32xf32>
    %337 = vector.extract_strided_slice %314 {offsets = [0, 256], sizes = [8, 32], strides = [1, 1]} : vector<8x384xf32> to vector<8x32xf32>
    %338 = vector.extract_strided_slice %320 {offsets = [0, 256], sizes = [8, 32], strides = [1, 1]} : vector<8x384xf32> to vector<8x32xf32>
    %339 = arith.mulf %328, %338 : vector<8x32xf32>
    %340 = arith.addf %337, %339 : vector<8x32xf32>
    %341 = math.tanh %340 : vector<8x32xf32>
    %cst_113 = arith.constant 1.000000e+00 : f32
    %342 = vector.broadcast %cst_113 : f32 to vector<8x32xf32>
    %343 = arith.subf %342, %336 : vector<8x32xf32>
    %344 = arith.mulf %343, %341 : vector<8x32xf32>
    %345 = arith.mulf %336, %270 : vector<8x32xf32>
    %346 = arith.addf %344, %345 : vector<8x32xf32>
    %347 = arith.select %273, %346, %270 : vector<8x32xi1>, vector<8x32xf32>
    %348 = vector.extract_strided_slice %4 {offsets = [0, 3], sizes = [8, 1], strides = [1, 1]} : vector<8x12xi1> to vector<8x1xi1>
    %349 = vector.shape_cast %348 : vector<8x1xi1> to vector<8x1xi1>
    %350 = vector.broadcast %349 : vector<8x1xi1> to vector<8x32xi1>
    %c3_114 = arith.constant 3 : index
    %c0_115 = arith.constant 0 : index
    %c0_116 = arith.constant 0 : index
    %351 = vector.load %arg13[%c3_114, %c0_115, %c0_116] : memref<12x8x384xf32, #tpu.memory_space<vmem>>, vector<1x8x384xf32>
    %352 = vector.shape_cast %351 : vector<1x8x384xf32> to vector<8x384xf32>
    %c0_117 = arith.constant 0 : index
    %c0_118 = arith.constant 0 : index
    %c0_119 = arith.constant 0 : index
    %353 = vector.load %arg5[%c0_117, %c0_118, %c0_119] : memref<2x32x384xf32, #tpu.memory_space<vmem>>, vector<1x32x384xf32>
    %354 = vector.shape_cast %353 : vector<1x32x384xf32> to vector<32x384xf32>
    %cst_120 = arith.constant dense<0.000000e+00> : vector<8x384xf32>
    %355 = tpu.matmul %308, %354, %cst_120 {dimension_numbers = #tpu.dot_dimension_numbers<[1], [0], [0], [1], [0, 0, 1, 1], [], []>} : vector<8x32xf32>, vector<32x384xf32>, vector<8x384xf32> -> vector<8x384xf32>
    %c3_121 = arith.constant 3 : index
    %c0_122 = arith.constant 0 : index
    %356 = vector.load %arg4[%c3_121, %c0_122] : memref<5x384xf32, #tpu.memory_space<vmem>>, vector<1x384xf32>
    %357 = vector.broadcast %356 : vector<1x384xf32> to vector<8x384xf32>
    %358 = arith.addf %355, %357 : vector<8x384xf32>
    %359 = vector.extract_strided_slice %352 {offsets = [0, 0], sizes = [8, 32], strides = [1, 1]} : vector<8x384xf32> to vector<8x32xf32>
    %360 = vector.extract_strided_slice %358 {offsets = [0, 0], sizes = [8, 32], strides = [1, 1]} : vector<8x384xf32> to vector<8x32xf32>
    %361 = arith.addf %359, %360 : vector<8x32xf32>
    %362 = arith.negf %361 : vector<8x32xf32>
    %363 = math.exp %362 : vector<8x32xf32>
    %cst_123 = arith.constant 1.000000e+00 : f32
    %364 = vector.broadcast %cst_123 : f32 to vector<8x32xf32>
    %365 = arith.addf %364, %363 : vector<8x32xf32>
    %366 = arith.divf %364, %365 : vector<8x32xf32>
    %367 = vector.extract_strided_slice %352 {offsets = [0, 128], sizes = [8, 32], strides = [1, 1]} : vector<8x384xf32> to vector<8x32xf32>
    %368 = vector.extract_strided_slice %358 {offsets = [0, 128], sizes = [8, 32], strides = [1, 1]} : vector<8x384xf32> to vector<8x32xf32>
    %369 = arith.addf %367, %368 : vector<8x32xf32>
    %370 = arith.negf %369 : vector<8x32xf32>
    %371 = math.exp %370 : vector<8x32xf32>
    %cst_124 = arith.constant 1.000000e+00 : f32
    %372 = vector.broadcast %cst_124 : f32 to vector<8x32xf32>
    %373 = arith.addf %372, %371 : vector<8x32xf32>
    %374 = arith.divf %372, %373 : vector<8x32xf32>
    %375 = vector.extract_strided_slice %352 {offsets = [0, 256], sizes = [8, 32], strides = [1, 1]} : vector<8x384xf32> to vector<8x32xf32>
    %376 = vector.extract_strided_slice %358 {offsets = [0, 256], sizes = [8, 32], strides = [1, 1]} : vector<8x384xf32> to vector<8x32xf32>
    %377 = arith.mulf %366, %376 : vector<8x32xf32>
    %378 = arith.addf %375, %377 : vector<8x32xf32>
    %379 = math.tanh %378 : vector<8x32xf32>
    %cst_125 = arith.constant 1.000000e+00 : f32
    %380 = vector.broadcast %cst_125 : f32 to vector<8x32xf32>
    %381 = arith.subf %380, %374 : vector<8x32xf32>
    %382 = arith.mulf %381, %379 : vector<8x32xf32>
    %383 = arith.mulf %374, %308 : vector<8x32xf32>
    %384 = arith.addf %382, %383 : vector<8x32xf32>
    %385 = arith.select %350, %384, %308 : vector<8x32xi1>, vector<8x32xf32>
    %c0_126 = arith.constant 0 : index
    %c0_127 = arith.constant 0 : index
    %c0_128 = arith.constant 0 : index
    %386 = vector.load %arg6[%c0_126, %c0_127, %c0_128] : memref<1x32x384xf32, #tpu.memory_space<vmem>>, vector<1x32x384xf32>
    %387 = vector.shape_cast %386 : vector<1x32x384xf32> to vector<32x384xf32>
    %cst_129 = arith.constant dense<0.000000e+00> : vector<8x384xf32>
    %388 = tpu.matmul %385, %387, %cst_129 {dimension_numbers = #tpu.dot_dimension_numbers<[1], [0], [0], [1], [0, 0, 1, 1], [], []>} : vector<8x32xf32>, vector<32x384xf32>, vector<8x384xf32> -> vector<8x384xf32>
    %c2_130 = arith.constant 2 : index
    %c0_131 = arith.constant 0 : index
    %389 = vector.load %arg4[%c2_130, %c0_131] : memref<5x384xf32, #tpu.memory_space<vmem>>, vector<1x384xf32>
    %390 = vector.broadcast %389 : vector<1x384xf32> to vector<8x384xf32>
    %391 = arith.addf %388, %390 : vector<8x384xf32>
    %c1_132 = arith.constant 1 : index
    %c0_133 = arith.constant 0 : index
    %c0_134 = arith.constant 0 : index
    %392 = vector.load %arg5[%c1_132, %c0_133, %c0_134] : memref<2x32x384xf32, #tpu.memory_space<vmem>>, vector<1x32x384xf32>
    %393 = vector.shape_cast %392 : vector<1x32x384xf32> to vector<32x384xf32>
    %cst_135 = arith.constant dense<0.000000e+00> : vector<8x384xf32>
    %394 = tpu.matmul %347, %393, %cst_135 {dimension_numbers = #tpu.dot_dimension_numbers<[1], [0], [0], [1], [0, 0, 1, 1], [], []>} : vector<8x32xf32>, vector<32x384xf32>, vector<8x384xf32> -> vector<8x384xf32>
    %c4_136 = arith.constant 4 : index
    %c0_137 = arith.constant 0 : index
    %395 = vector.load %arg4[%c4_136, %c0_137] : memref<5x384xf32, #tpu.memory_space<vmem>>, vector<1x384xf32>
    %396 = vector.broadcast %395 : vector<1x384xf32> to vector<8x384xf32>
    %397 = arith.addf %394, %396 : vector<8x384xf32>
    %398 = vector.extract_strided_slice %391 {offsets = [0, 0], sizes = [8, 32], strides = [1, 1]} : vector<8x384xf32> to vector<8x32xf32>
    %399 = vector.extract_strided_slice %397 {offsets = [0, 0], sizes = [8, 32], strides = [1, 1]} : vector<8x384xf32> to vector<8x32xf32>
    %400 = arith.addf %398, %399 : vector<8x32xf32>
    %401 = arith.negf %400 : vector<8x32xf32>
    %402 = math.exp %401 : vector<8x32xf32>
    %cst_138 = arith.constant 1.000000e+00 : f32
    %403 = vector.broadcast %cst_138 : f32 to vector<8x32xf32>
    %404 = arith.addf %403, %402 : vector<8x32xf32>
    %405 = arith.divf %403, %404 : vector<8x32xf32>
    %406 = vector.extract_strided_slice %391 {offsets = [0, 128], sizes = [8, 32], strides = [1, 1]} : vector<8x384xf32> to vector<8x32xf32>
    %407 = vector.extract_strided_slice %397 {offsets = [0, 128], sizes = [8, 32], strides = [1, 1]} : vector<8x384xf32> to vector<8x32xf32>
    %408 = arith.addf %406, %407 : vector<8x32xf32>
    %409 = arith.negf %408 : vector<8x32xf32>
    %410 = math.exp %409 : vector<8x32xf32>
    %cst_139 = arith.constant 1.000000e+00 : f32
    %411 = vector.broadcast %cst_139 : f32 to vector<8x32xf32>
    %412 = arith.addf %411, %410 : vector<8x32xf32>
    %413 = arith.divf %411, %412 : vector<8x32xf32>
    %414 = vector.extract_strided_slice %391 {offsets = [0, 256], sizes = [8, 32], strides = [1, 1]} : vector<8x384xf32> to vector<8x32xf32>
    %415 = vector.extract_strided_slice %397 {offsets = [0, 256], sizes = [8, 32], strides = [1, 1]} : vector<8x384xf32> to vector<8x32xf32>
    %416 = arith.mulf %405, %415 : vector<8x32xf32>
    %417 = arith.addf %414, %416 : vector<8x32xf32>
    %418 = math.tanh %417 : vector<8x32xf32>
    %cst_140 = arith.constant 1.000000e+00 : f32
    %419 = vector.broadcast %cst_140 : f32 to vector<8x32xf32>
    %420 = arith.subf %419, %413 : vector<8x32xf32>
    %421 = arith.mulf %420, %418 : vector<8x32xf32>
    %422 = arith.mulf %413, %347 : vector<8x32xf32>
    %423 = arith.addf %421, %422 : vector<8x32xf32>
    %424 = arith.select %350, %423, %347 : vector<8x32xi1>, vector<8x32xf32>
    %425 = vector.extract_strided_slice %4 {offsets = [0, 4], sizes = [8, 1], strides = [1, 1]} : vector<8x12xi1> to vector<8x1xi1>
    %426 = vector.shape_cast %425 : vector<8x1xi1> to vector<8x1xi1>
    %427 = vector.broadcast %426 : vector<8x1xi1> to vector<8x32xi1>
    %c4_141 = arith.constant 4 : index
    %c0_142 = arith.constant 0 : index
    %c0_143 = arith.constant 0 : index
    %428 = vector.load %arg13[%c4_141, %c0_142, %c0_143] : memref<12x8x384xf32, #tpu.memory_space<vmem>>, vector<1x8x384xf32>
    %429 = vector.shape_cast %428 : vector<1x8x384xf32> to vector<8x384xf32>
    %c0_144 = arith.constant 0 : index
    %c0_145 = arith.constant 0 : index
    %c0_146 = arith.constant 0 : index
    %430 = vector.load %arg5[%c0_144, %c0_145, %c0_146] : memref<2x32x384xf32, #tpu.memory_space<vmem>>, vector<1x32x384xf32>
    %431 = vector.shape_cast %430 : vector<1x32x384xf32> to vector<32x384xf32>
    %cst_147 = arith.constant dense<0.000000e+00> : vector<8x384xf32>
    %432 = tpu.matmul %385, %431, %cst_147 {dimension_numbers = #tpu.dot_dimension_numbers<[1], [0], [0], [1], [0, 0, 1, 1], [], []>} : vector<8x32xf32>, vector<32x384xf32>, vector<8x384xf32> -> vector<8x384xf32>
    %c3_148 = arith.constant 3 : index
    %c0_149 = arith.constant 0 : index
    %433 = vector.load %arg4[%c3_148, %c0_149] : memref<5x384xf32, #tpu.memory_space<vmem>>, vector<1x384xf32>
    %434 = vector.broadcast %433 : vector<1x384xf32> to vector<8x384xf32>
    %435 = arith.addf %432, %434 : vector<8x384xf32>
    %436 = vector.extract_strided_slice %429 {offsets = [0, 0], sizes = [8, 32], strides = [1, 1]} : vector<8x384xf32> to vector<8x32xf32>
    %437 = vector.extract_strided_slice %435 {offsets = [0, 0], sizes = [8, 32], strides = [1, 1]} : vector<8x384xf32> to vector<8x32xf32>
    %438 = arith.addf %436, %437 : vector<8x32xf32>
    %439 = arith.negf %438 : vector<8x32xf32>
    %440 = math.exp %439 : vector<8x32xf32>
    %cst_150 = arith.constant 1.000000e+00 : f32
    %441 = vector.broadcast %cst_150 : f32 to vector<8x32xf32>
    %442 = arith.addf %441, %440 : vector<8x32xf32>
    %443 = arith.divf %441, %442 : vector<8x32xf32>
    %444 = vector.extract_strided_slice %429 {offsets = [0, 128], sizes = [8, 32], strides = [1, 1]} : vector<8x384xf32> to vector<8x32xf32>
    %445 = vector.extract_strided_slice %435 {offsets = [0, 128], sizes = [8, 32], strides = [1, 1]} : vector<8x384xf32> to vector<8x32xf32>
    %446 = arith.addf %444, %445 : vector<8x32xf32>
    %447 = arith.negf %446 : vector<8x32xf32>
    %448 = math.exp %447 : vector<8x32xf32>
    %cst_151 = arith.constant 1.000000e+00 : f32
    %449 = vector.broadcast %cst_151 : f32 to vector<8x32xf32>
    %450 = arith.addf %449, %448 : vector<8x32xf32>
    %451 = arith.divf %449, %450 : vector<8x32xf32>
    %452 = vector.extract_strided_slice %429 {offsets = [0, 256], sizes = [8, 32], strides = [1, 1]} : vector<8x384xf32> to vector<8x32xf32>
    %453 = vector.extract_strided_slice %435 {offsets = [0, 256], sizes = [8, 32], strides = [1, 1]} : vector<8x384xf32> to vector<8x32xf32>
    %454 = arith.mulf %443, %453 : vector<8x32xf32>
    %455 = arith.addf %452, %454 : vector<8x32xf32>
    %456 = math.tanh %455 : vector<8x32xf32>
    %cst_152 = arith.constant 1.000000e+00 : f32
    %457 = vector.broadcast %cst_152 : f32 to vector<8x32xf32>
    %458 = arith.subf %457, %451 : vector<8x32xf32>
    %459 = arith.mulf %458, %456 : vector<8x32xf32>
    %460 = arith.mulf %451, %385 : vector<8x32xf32>
    %461 = arith.addf %459, %460 : vector<8x32xf32>
    %462 = arith.select %427, %461, %385 : vector<8x32xi1>, vector<8x32xf32>
    %c0_153 = arith.constant 0 : index
    %c0_154 = arith.constant 0 : index
    %c0_155 = arith.constant 0 : index
    %463 = vector.load %arg6[%c0_153, %c0_154, %c0_155] : memref<1x32x384xf32, #tpu.memory_space<vmem>>, vector<1x32x384xf32>
    %464 = vector.shape_cast %463 : vector<1x32x384xf32> to vector<32x384xf32>
    %cst_156 = arith.constant dense<0.000000e+00> : vector<8x384xf32>
    %465 = tpu.matmul %462, %464, %cst_156 {dimension_numbers = #tpu.dot_dimension_numbers<[1], [0], [0], [1], [0, 0, 1, 1], [], []>} : vector<8x32xf32>, vector<32x384xf32>, vector<8x384xf32> -> vector<8x384xf32>
    %c2_157 = arith.constant 2 : index
    %c0_158 = arith.constant 0 : index
    %466 = vector.load %arg4[%c2_157, %c0_158] : memref<5x384xf32, #tpu.memory_space<vmem>>, vector<1x384xf32>
    %467 = vector.broadcast %466 : vector<1x384xf32> to vector<8x384xf32>
    %468 = arith.addf %465, %467 : vector<8x384xf32>
    %c1_159 = arith.constant 1 : index
    %c0_160 = arith.constant 0 : index
    %c0_161 = arith.constant 0 : index
    %469 = vector.load %arg5[%c1_159, %c0_160, %c0_161] : memref<2x32x384xf32, #tpu.memory_space<vmem>>, vector<1x32x384xf32>
    %470 = vector.shape_cast %469 : vector<1x32x384xf32> to vector<32x384xf32>
    %cst_162 = arith.constant dense<0.000000e+00> : vector<8x384xf32>
    %471 = tpu.matmul %424, %470, %cst_162 {dimension_numbers = #tpu.dot_dimension_numbers<[1], [0], [0], [1], [0, 0, 1, 1], [], []>} : vector<8x32xf32>, vector<32x384xf32>, vector<8x384xf32> -> vector<8x384xf32>
    %c4_163 = arith.constant 4 : index
    %c0_164 = arith.constant 0 : index
    %472 = vector.load %arg4[%c4_163, %c0_164] : memref<5x384xf32, #tpu.memory_space<vmem>>, vector<1x384xf32>
    %473 = vector.broadcast %472 : vector<1x384xf32> to vector<8x384xf32>
    %474 = arith.addf %471, %473 : vector<8x384xf32>
    %475 = vector.extract_strided_slice %468 {offsets = [0, 0], sizes = [8, 32], strides = [1, 1]} : vector<8x384xf32> to vector<8x32xf32>
    %476 = vector.extract_strided_slice %474 {offsets = [0, 0], sizes = [8, 32], strides = [1, 1]} : vector<8x384xf32> to vector<8x32xf32>
    %477 = arith.addf %475, %476 : vector<8x32xf32>
    %478 = arith.negf %477 : vector<8x32xf32>
    %479 = math.exp %478 : vector<8x32xf32>
    %cst_165 = arith.constant 1.000000e+00 : f32
    %480 = vector.broadcast %cst_165 : f32 to vector<8x32xf32>
    %481 = arith.addf %480, %479 : vector<8x32xf32>
    %482 = arith.divf %480, %481 : vector<8x32xf32>
    %483 = vector.extract_strided_slice %468 {offsets = [0, 128], sizes = [8, 32], strides = [1, 1]} : vector<8x384xf32> to vector<8x32xf32>
    %484 = vector.extract_strided_slice %474 {offsets = [0, 128], sizes = [8, 32], strides = [1, 1]} : vector<8x384xf32> to vector<8x32xf32>
    %485 = arith.addf %483, %484 : vector<8x32xf32>
    %486 = arith.negf %485 : vector<8x32xf32>
    %487 = math.exp %486 : vector<8x32xf32>
    %cst_166 = arith.constant 1.000000e+00 : f32
    %488 = vector.broadcast %cst_166 : f32 to vector<8x32xf32>
    %489 = arith.addf %488, %487 : vector<8x32xf32>
    %490 = arith.divf %488, %489 : vector<8x32xf32>
    %491 = vector.extract_strided_slice %468 {offsets = [0, 256], sizes = [8, 32], strides = [1, 1]} : vector<8x384xf32> to vector<8x32xf32>
    %492 = vector.extract_strided_slice %474 {offsets = [0, 256], sizes = [8, 32], strides = [1, 1]} : vector<8x384xf32> to vector<8x32xf32>
    %493 = arith.mulf %482, %492 : vector<8x32xf32>
    %494 = arith.addf %491, %493 : vector<8x32xf32>
    %495 = math.tanh %494 : vector<8x32xf32>
    %cst_167 = arith.constant 1.000000e+00 : f32
    %496 = vector.broadcast %cst_167 : f32 to vector<8x32xf32>
    %497 = arith.subf %496, %490 : vector<8x32xf32>
    %498 = arith.mulf %497, %495 : vector<8x32xf32>
    %499 = arith.mulf %490, %424 : vector<8x32xf32>
    %500 = arith.addf %498, %499 : vector<8x32xf32>
    %501 = arith.select %427, %500, %424 : vector<8x32xi1>, vector<8x32xf32>
    %502 = vector.extract_strided_slice %4 {offsets = [0, 5], sizes = [8, 1], strides = [1, 1]} : vector<8x12xi1> to vector<8x1xi1>
    %503 = vector.shape_cast %502 : vector<8x1xi1> to vector<8x1xi1>
    %504 = vector.broadcast %503 : vector<8x1xi1> to vector<8x32xi1>
    %c5_168 = arith.constant 5 : index
    %c0_169 = arith.constant 0 : index
    %c0_170 = arith.constant 0 : index
    %505 = vector.load %arg13[%c5_168, %c0_169, %c0_170] : memref<12x8x384xf32, #tpu.memory_space<vmem>>, vector<1x8x384xf32>
    %506 = vector.shape_cast %505 : vector<1x8x384xf32> to vector<8x384xf32>
    %c0_171 = arith.constant 0 : index
    %c0_172 = arith.constant 0 : index
    %c0_173 = arith.constant 0 : index
    %507 = vector.load %arg5[%c0_171, %c0_172, %c0_173] : memref<2x32x384xf32, #tpu.memory_space<vmem>>, vector<1x32x384xf32>
    %508 = vector.shape_cast %507 : vector<1x32x384xf32> to vector<32x384xf32>
    %cst_174 = arith.constant dense<0.000000e+00> : vector<8x384xf32>
    %509 = tpu.matmul %462, %508, %cst_174 {dimension_numbers = #tpu.dot_dimension_numbers<[1], [0], [0], [1], [0, 0, 1, 1], [], []>} : vector<8x32xf32>, vector<32x384xf32>, vector<8x384xf32> -> vector<8x384xf32>
    %c3_175 = arith.constant 3 : index
    %c0_176 = arith.constant 0 : index
    %510 = vector.load %arg4[%c3_175, %c0_176] : memref<5x384xf32, #tpu.memory_space<vmem>>, vector<1x384xf32>
    %511 = vector.broadcast %510 : vector<1x384xf32> to vector<8x384xf32>
    %512 = arith.addf %509, %511 : vector<8x384xf32>
    %513 = vector.extract_strided_slice %506 {offsets = [0, 0], sizes = [8, 32], strides = [1, 1]} : vector<8x384xf32> to vector<8x32xf32>
    %514 = vector.extract_strided_slice %512 {offsets = [0, 0], sizes = [8, 32], strides = [1, 1]} : vector<8x384xf32> to vector<8x32xf32>
    %515 = arith.addf %513, %514 : vector<8x32xf32>
    %516 = arith.negf %515 : vector<8x32xf32>
    %517 = math.exp %516 : vector<8x32xf32>
    %cst_177 = arith.constant 1.000000e+00 : f32
    %518 = vector.broadcast %cst_177 : f32 to vector<8x32xf32>
    %519 = arith.addf %518, %517 : vector<8x32xf32>
    %520 = arith.divf %518, %519 : vector<8x32xf32>
    %521 = vector.extract_strided_slice %506 {offsets = [0, 128], sizes = [8, 32], strides = [1, 1]} : vector<8x384xf32> to vector<8x32xf32>
    %522 = vector.extract_strided_slice %512 {offsets = [0, 128], sizes = [8, 32], strides = [1, 1]} : vector<8x384xf32> to vector<8x32xf32>
    %523 = arith.addf %521, %522 : vector<8x32xf32>
    %524 = arith.negf %523 : vector<8x32xf32>
    %525 = math.exp %524 : vector<8x32xf32>
    %cst_178 = arith.constant 1.000000e+00 : f32
    %526 = vector.broadcast %cst_178 : f32 to vector<8x32xf32>
    %527 = arith.addf %526, %525 : vector<8x32xf32>
    %528 = arith.divf %526, %527 : vector<8x32xf32>
    %529 = vector.extract_strided_slice %506 {offsets = [0, 256], sizes = [8, 32], strides = [1, 1]} : vector<8x384xf32> to vector<8x32xf32>
    %530 = vector.extract_strided_slice %512 {offsets = [0, 256], sizes = [8, 32], strides = [1, 1]} : vector<8x384xf32> to vector<8x32xf32>
    %531 = arith.mulf %520, %530 : vector<8x32xf32>
    %532 = arith.addf %529, %531 : vector<8x32xf32>
    %533 = math.tanh %532 : vector<8x32xf32>
    %cst_179 = arith.constant 1.000000e+00 : f32
    %534 = vector.broadcast %cst_179 : f32 to vector<8x32xf32>
    %535 = arith.subf %534, %528 : vector<8x32xf32>
    %536 = arith.mulf %535, %533 : vector<8x32xf32>
    %537 = arith.mulf %528, %462 : vector<8x32xf32>
    %538 = arith.addf %536, %537 : vector<8x32xf32>
    %539 = arith.select %504, %538, %462 : vector<8x32xi1>, vector<8x32xf32>
    %c0_180 = arith.constant 0 : index
    %c0_181 = arith.constant 0 : index
    %c0_182 = arith.constant 0 : index
    %540 = vector.load %arg6[%c0_180, %c0_181, %c0_182] : memref<1x32x384xf32, #tpu.memory_space<vmem>>, vector<1x32x384xf32>
    %541 = vector.shape_cast %540 : vector<1x32x384xf32> to vector<32x384xf32>
    %cst_183 = arith.constant dense<0.000000e+00> : vector<8x384xf32>
    %542 = tpu.matmul %539, %541, %cst_183 {dimension_numbers = #tpu.dot_dimension_numbers<[1], [0], [0], [1], [0, 0, 1, 1], [], []>} : vector<8x32xf32>, vector<32x384xf32>, vector<8x384xf32> -> vector<8x384xf32>
    %c2_184 = arith.constant 2 : index
    %c0_185 = arith.constant 0 : index
    %543 = vector.load %arg4[%c2_184, %c0_185] : memref<5x384xf32, #tpu.memory_space<vmem>>, vector<1x384xf32>
    %544 = vector.broadcast %543 : vector<1x384xf32> to vector<8x384xf32>
    %545 = arith.addf %542, %544 : vector<8x384xf32>
    %c1_186 = arith.constant 1 : index
    %c0_187 = arith.constant 0 : index
    %c0_188 = arith.constant 0 : index
    %546 = vector.load %arg5[%c1_186, %c0_187, %c0_188] : memref<2x32x384xf32, #tpu.memory_space<vmem>>, vector<1x32x384xf32>
    %547 = vector.shape_cast %546 : vector<1x32x384xf32> to vector<32x384xf32>
    %cst_189 = arith.constant dense<0.000000e+00> : vector<8x384xf32>
    %548 = tpu.matmul %501, %547, %cst_189 {dimension_numbers = #tpu.dot_dimension_numbers<[1], [0], [0], [1], [0, 0, 1, 1], [], []>} : vector<8x32xf32>, vector<32x384xf32>, vector<8x384xf32> -> vector<8x384xf32>
    %c4_190 = arith.constant 4 : index
    %c0_191 = arith.constant 0 : index
    %549 = vector.load %arg4[%c4_190, %c0_191] : memref<5x384xf32, #tpu.memory_space<vmem>>, vector<1x384xf32>
    %550 = vector.broadcast %549 : vector<1x384xf32> to vector<8x384xf32>
    %551 = arith.addf %548, %550 : vector<8x384xf32>
    %552 = vector.extract_strided_slice %545 {offsets = [0, 0], sizes = [8, 32], strides = [1, 1]} : vector<8x384xf32> to vector<8x32xf32>
    %553 = vector.extract_strided_slice %551 {offsets = [0, 0], sizes = [8, 32], strides = [1, 1]} : vector<8x384xf32> to vector<8x32xf32>
    %554 = arith.addf %552, %553 : vector<8x32xf32>
    %555 = arith.negf %554 : vector<8x32xf32>
    %556 = math.exp %555 : vector<8x32xf32>
    %cst_192 = arith.constant 1.000000e+00 : f32
    %557 = vector.broadcast %cst_192 : f32 to vector<8x32xf32>
    %558 = arith.addf %557, %556 : vector<8x32xf32>
    %559 = arith.divf %557, %558 : vector<8x32xf32>
    %560 = vector.extract_strided_slice %545 {offsets = [0, 128], sizes = [8, 32], strides = [1, 1]} : vector<8x384xf32> to vector<8x32xf32>
    %561 = vector.extract_strided_slice %551 {offsets = [0, 128], sizes = [8, 32], strides = [1, 1]} : vector<8x384xf32> to vector<8x32xf32>
    %562 = arith.addf %560, %561 : vector<8x32xf32>
    %563 = arith.negf %562 : vector<8x32xf32>
    %564 = math.exp %563 : vector<8x32xf32>
    %cst_193 = arith.constant 1.000000e+00 : f32
    %565 = vector.broadcast %cst_193 : f32 to vector<8x32xf32>
    %566 = arith.addf %565, %564 : vector<8x32xf32>
    %567 = arith.divf %565, %566 : vector<8x32xf32>
    %568 = vector.extract_strided_slice %545 {offsets = [0, 256], sizes = [8, 32], strides = [1, 1]} : vector<8x384xf32> to vector<8x32xf32>
    %569 = vector.extract_strided_slice %551 {offsets = [0, 256], sizes = [8, 32], strides = [1, 1]} : vector<8x384xf32> to vector<8x32xf32>
    %570 = arith.mulf %559, %569 : vector<8x32xf32>
    %571 = arith.addf %568, %570 : vector<8x32xf32>
    %572 = math.tanh %571 : vector<8x32xf32>
    %cst_194 = arith.constant 1.000000e+00 : f32
    %573 = vector.broadcast %cst_194 : f32 to vector<8x32xf32>
    %574 = arith.subf %573, %567 : vector<8x32xf32>
    %575 = arith.mulf %574, %572 : vector<8x32xf32>
    %576 = arith.mulf %567, %501 : vector<8x32xf32>
    %577 = arith.addf %575, %576 : vector<8x32xf32>
    %578 = arith.select %504, %577, %501 : vector<8x32xi1>, vector<8x32xf32>
    %579 = vector.extract_strided_slice %4 {offsets = [0, 6], sizes = [8, 1], strides = [1, 1]} : vector<8x12xi1> to vector<8x1xi1>
    %580 = vector.shape_cast %579 : vector<8x1xi1> to vector<8x1xi1>
    %581 = vector.broadcast %580 : vector<8x1xi1> to vector<8x32xi1>
    %c6_195 = arith.constant 6 : index
    %c0_196 = arith.constant 0 : index
    %c0_197 = arith.constant 0 : index
    %582 = vector.load %arg13[%c6_195, %c0_196, %c0_197] : memref<12x8x384xf32, #tpu.memory_space<vmem>>, vector<1x8x384xf32>
    %583 = vector.shape_cast %582 : vector<1x8x384xf32> to vector<8x384xf32>
    %c0_198 = arith.constant 0 : index
    %c0_199 = arith.constant 0 : index
    %c0_200 = arith.constant 0 : index
    %584 = vector.load %arg5[%c0_198, %c0_199, %c0_200] : memref<2x32x384xf32, #tpu.memory_space<vmem>>, vector<1x32x384xf32>
    %585 = vector.shape_cast %584 : vector<1x32x384xf32> to vector<32x384xf32>
    %cst_201 = arith.constant dense<0.000000e+00> : vector<8x384xf32>
    %586 = tpu.matmul %539, %585, %cst_201 {dimension_numbers = #tpu.dot_dimension_numbers<[1], [0], [0], [1], [0, 0, 1, 1], [], []>} : vector<8x32xf32>, vector<32x384xf32>, vector<8x384xf32> -> vector<8x384xf32>
    %c3_202 = arith.constant 3 : index
    %c0_203 = arith.constant 0 : index
    %587 = vector.load %arg4[%c3_202, %c0_203] : memref<5x384xf32, #tpu.memory_space<vmem>>, vector<1x384xf32>
    %588 = vector.broadcast %587 : vector<1x384xf32> to vector<8x384xf32>
    %589 = arith.addf %586, %588 : vector<8x384xf32>
    %590 = vector.extract_strided_slice %583 {offsets = [0, 0], sizes = [8, 32], strides = [1, 1]} : vector<8x384xf32> to vector<8x32xf32>
    %591 = vector.extract_strided_slice %589 {offsets = [0, 0], sizes = [8, 32], strides = [1, 1]} : vector<8x384xf32> to vector<8x32xf32>
    %592 = arith.addf %590, %591 : vector<8x32xf32>
    %593 = arith.negf %592 : vector<8x32xf32>
    %594 = math.exp %593 : vector<8x32xf32>
    %cst_204 = arith.constant 1.000000e+00 : f32
    %595 = vector.broadcast %cst_204 : f32 to vector<8x32xf32>
    %596 = arith.addf %595, %594 : vector<8x32xf32>
    %597 = arith.divf %595, %596 : vector<8x32xf32>
    %598 = vector.extract_strided_slice %583 {offsets = [0, 128], sizes = [8, 32], strides = [1, 1]} : vector<8x384xf32> to vector<8x32xf32>
    %599 = vector.extract_strided_slice %589 {offsets = [0, 128], sizes = [8, 32], strides = [1, 1]} : vector<8x384xf32> to vector<8x32xf32>
    %600 = arith.addf %598, %599 : vector<8x32xf32>
    %601 = arith.negf %600 : vector<8x32xf32>
    %602 = math.exp %601 : vector<8x32xf32>
    %cst_205 = arith.constant 1.000000e+00 : f32
    %603 = vector.broadcast %cst_205 : f32 to vector<8x32xf32>
    %604 = arith.addf %603, %602 : vector<8x32xf32>
    %605 = arith.divf %603, %604 : vector<8x32xf32>
    %606 = vector.extract_strided_slice %583 {offsets = [0, 256], sizes = [8, 32], strides = [1, 1]} : vector<8x384xf32> to vector<8x32xf32>
    %607 = vector.extract_strided_slice %589 {offsets = [0, 256], sizes = [8, 32], strides = [1, 1]} : vector<8x384xf32> to vector<8x32xf32>
    %608 = arith.mulf %597, %607 : vector<8x32xf32>
    %609 = arith.addf %606, %608 : vector<8x32xf32>
    %610 = math.tanh %609 : vector<8x32xf32>
    %cst_206 = arith.constant 1.000000e+00 : f32
    %611 = vector.broadcast %cst_206 : f32 to vector<8x32xf32>
    %612 = arith.subf %611, %605 : vector<8x32xf32>
    %613 = arith.mulf %612, %610 : vector<8x32xf32>
    %614 = arith.mulf %605, %539 : vector<8x32xf32>
    %615 = arith.addf %613, %614 : vector<8x32xf32>
    %616 = arith.select %581, %615, %539 : vector<8x32xi1>, vector<8x32xf32>
    %c0_207 = arith.constant 0 : index
    %c0_208 = arith.constant 0 : index
    %c0_209 = arith.constant 0 : index
    %617 = vector.load %arg6[%c0_207, %c0_208, %c0_209] : memref<1x32x384xf32, #tpu.memory_space<vmem>>, vector<1x32x384xf32>
    %618 = vector.shape_cast %617 : vector<1x32x384xf32> to vector<32x384xf32>
    %cst_210 = arith.constant dense<0.000000e+00> : vector<8x384xf32>
    %619 = tpu.matmul %616, %618, %cst_210 {dimension_numbers = #tpu.dot_dimension_numbers<[1], [0], [0], [1], [0, 0, 1, 1], [], []>} : vector<8x32xf32>, vector<32x384xf32>, vector<8x384xf32> -> vector<8x384xf32>
    %c2_211 = arith.constant 2 : index
    %c0_212 = arith.constant 0 : index
    %620 = vector.load %arg4[%c2_211, %c0_212] : memref<5x384xf32, #tpu.memory_space<vmem>>, vector<1x384xf32>
    %621 = vector.broadcast %620 : vector<1x384xf32> to vector<8x384xf32>
    %622 = arith.addf %619, %621 : vector<8x384xf32>
    %c1_213 = arith.constant 1 : index
    %c0_214 = arith.constant 0 : index
    %c0_215 = arith.constant 0 : index
    %623 = vector.load %arg5[%c1_213, %c0_214, %c0_215] : memref<2x32x384xf32, #tpu.memory_space<vmem>>, vector<1x32x384xf32>
    %624 = vector.shape_cast %623 : vector<1x32x384xf32> to vector<32x384xf32>
    %cst_216 = arith.constant dense<0.000000e+00> : vector<8x384xf32>
    %625 = tpu.matmul %578, %624, %cst_216 {dimension_numbers = #tpu.dot_dimension_numbers<[1], [0], [0], [1], [0, 0, 1, 1], [], []>} : vector<8x32xf32>, vector<32x384xf32>, vector<8x384xf32> -> vector<8x384xf32>
    %c4_217 = arith.constant 4 : index
    %c0_218 = arith.constant 0 : index
    %626 = vector.load %arg4[%c4_217, %c0_218] : memref<5x384xf32, #tpu.memory_space<vmem>>, vector<1x384xf32>
    %627 = vector.broadcast %626 : vector<1x384xf32> to vector<8x384xf32>
    %628 = arith.addf %625, %627 : vector<8x384xf32>
    %629 = vector.extract_strided_slice %622 {offsets = [0, 0], sizes = [8, 32], strides = [1, 1]} : vector<8x384xf32> to vector<8x32xf32>
    %630 = vector.extract_strided_slice %628 {offsets = [0, 0], sizes = [8, 32], strides = [1, 1]} : vector<8x384xf32> to vector<8x32xf32>
    %631 = arith.addf %629, %630 : vector<8x32xf32>
    %632 = arith.negf %631 : vector<8x32xf32>
    %633 = math.exp %632 : vector<8x32xf32>
    %cst_219 = arith.constant 1.000000e+00 : f32
    %634 = vector.broadcast %cst_219 : f32 to vector<8x32xf32>
    %635 = arith.addf %634, %633 : vector<8x32xf32>
    %636 = arith.divf %634, %635 : vector<8x32xf32>
    %637 = vector.extract_strided_slice %622 {offsets = [0, 128], sizes = [8, 32], strides = [1, 1]} : vector<8x384xf32> to vector<8x32xf32>
    %638 = vector.extract_strided_slice %628 {offsets = [0, 128], sizes = [8, 32], strides = [1, 1]} : vector<8x384xf32> to vector<8x32xf32>
    %639 = arith.addf %637, %638 : vector<8x32xf32>
    %640 = arith.negf %639 : vector<8x32xf32>
    %641 = math.exp %640 : vector<8x32xf32>
    %cst_220 = arith.constant 1.000000e+00 : f32
    %642 = vector.broadcast %cst_220 : f32 to vector<8x32xf32>
    %643 = arith.addf %642, %641 : vector<8x32xf32>
    %644 = arith.divf %642, %643 : vector<8x32xf32>
    %645 = vector.extract_strided_slice %622 {offsets = [0, 256], sizes = [8, 32], strides = [1, 1]} : vector<8x384xf32> to vector<8x32xf32>
    %646 = vector.extract_strided_slice %628 {offsets = [0, 256], sizes = [8, 32], strides = [1, 1]} : vector<8x384xf32> to vector<8x32xf32>
    %647 = arith.mulf %636, %646 : vector<8x32xf32>
    %648 = arith.addf %645, %647 : vector<8x32xf32>
    %649 = math.tanh %648 : vector<8x32xf32>
    %cst_221 = arith.constant 1.000000e+00 : f32
    %650 = vector.broadcast %cst_221 : f32 to vector<8x32xf32>
    %651 = arith.subf %650, %644 : vector<8x32xf32>
    %652 = arith.mulf %651, %649 : vector<8x32xf32>
    %653 = arith.mulf %644, %578 : vector<8x32xf32>
    %654 = arith.addf %652, %653 : vector<8x32xf32>
    %655 = arith.select %581, %654, %578 : vector<8x32xi1>, vector<8x32xf32>
    %656 = vector.extract_strided_slice %4 {offsets = [0, 7], sizes = [8, 1], strides = [1, 1]} : vector<8x12xi1> to vector<8x1xi1>
    %657 = vector.shape_cast %656 : vector<8x1xi1> to vector<8x1xi1>
    %658 = vector.broadcast %657 : vector<8x1xi1> to vector<8x32xi1>
    %c7_222 = arith.constant 7 : index
    %c0_223 = arith.constant 0 : index
    %c0_224 = arith.constant 0 : index
    %659 = vector.load %arg13[%c7_222, %c0_223, %c0_224] : memref<12x8x384xf32, #tpu.memory_space<vmem>>, vector<1x8x384xf32>
    %660 = vector.shape_cast %659 : vector<1x8x384xf32> to vector<8x384xf32>
    %c0_225 = arith.constant 0 : index
    %c0_226 = arith.constant 0 : index
    %c0_227 = arith.constant 0 : index
    %661 = vector.load %arg5[%c0_225, %c0_226, %c0_227] : memref<2x32x384xf32, #tpu.memory_space<vmem>>, vector<1x32x384xf32>
    %662 = vector.shape_cast %661 : vector<1x32x384xf32> to vector<32x384xf32>
    %cst_228 = arith.constant dense<0.000000e+00> : vector<8x384xf32>
    %663 = tpu.matmul %616, %662, %cst_228 {dimension_numbers = #tpu.dot_dimension_numbers<[1], [0], [0], [1], [0, 0, 1, 1], [], []>} : vector<8x32xf32>, vector<32x384xf32>, vector<8x384xf32> -> vector<8x384xf32>
    %c3_229 = arith.constant 3 : index
    %c0_230 = arith.constant 0 : index
    %664 = vector.load %arg4[%c3_229, %c0_230] : memref<5x384xf32, #tpu.memory_space<vmem>>, vector<1x384xf32>
    %665 = vector.broadcast %664 : vector<1x384xf32> to vector<8x384xf32>
    %666 = arith.addf %663, %665 : vector<8x384xf32>
    %667 = vector.extract_strided_slice %660 {offsets = [0, 0], sizes = [8, 32], strides = [1, 1]} : vector<8x384xf32> to vector<8x32xf32>
    %668 = vector.extract_strided_slice %666 {offsets = [0, 0], sizes = [8, 32], strides = [1, 1]} : vector<8x384xf32> to vector<8x32xf32>
    %669 = arith.addf %667, %668 : vector<8x32xf32>
    %670 = arith.negf %669 : vector<8x32xf32>
    %671 = math.exp %670 : vector<8x32xf32>
    %cst_231 = arith.constant 1.000000e+00 : f32
    %672 = vector.broadcast %cst_231 : f32 to vector<8x32xf32>
    %673 = arith.addf %672, %671 : vector<8x32xf32>
    %674 = arith.divf %672, %673 : vector<8x32xf32>
    %675 = vector.extract_strided_slice %660 {offsets = [0, 128], sizes = [8, 32], strides = [1, 1]} : vector<8x384xf32> to vector<8x32xf32>
    %676 = vector.extract_strided_slice %666 {offsets = [0, 128], sizes = [8, 32], strides = [1, 1]} : vector<8x384xf32> to vector<8x32xf32>
    %677 = arith.addf %675, %676 : vector<8x32xf32>
    %678 = arith.negf %677 : vector<8x32xf32>
    %679 = math.exp %678 : vector<8x32xf32>
    %cst_232 = arith.constant 1.000000e+00 : f32
    %680 = vector.broadcast %cst_232 : f32 to vector<8x32xf32>
    %681 = arith.addf %680, %679 : vector<8x32xf32>
    %682 = arith.divf %680, %681 : vector<8x32xf32>
    %683 = vector.extract_strided_slice %660 {offsets = [0, 256], sizes = [8, 32], strides = [1, 1]} : vector<8x384xf32> to vector<8x32xf32>
    %684 = vector.extract_strided_slice %666 {offsets = [0, 256], sizes = [8, 32], strides = [1, 1]} : vector<8x384xf32> to vector<8x32xf32>
    %685 = arith.mulf %674, %684 : vector<8x32xf32>
    %686 = arith.addf %683, %685 : vector<8x32xf32>
    %687 = math.tanh %686 : vector<8x32xf32>
    %cst_233 = arith.constant 1.000000e+00 : f32
    %688 = vector.broadcast %cst_233 : f32 to vector<8x32xf32>
    %689 = arith.subf %688, %682 : vector<8x32xf32>
    %690 = arith.mulf %689, %687 : vector<8x32xf32>
    %691 = arith.mulf %682, %616 : vector<8x32xf32>
    %692 = arith.addf %690, %691 : vector<8x32xf32>
    %693 = arith.select %658, %692, %616 : vector<8x32xi1>, vector<8x32xf32>
    %c0_234 = arith.constant 0 : index
    %c0_235 = arith.constant 0 : index
    %c0_236 = arith.constant 0 : index
    %694 = vector.load %arg6[%c0_234, %c0_235, %c0_236] : memref<1x32x384xf32, #tpu.memory_space<vmem>>, vector<1x32x384xf32>
    %695 = vector.shape_cast %694 : vector<1x32x384xf32> to vector<32x384xf32>
    %cst_237 = arith.constant dense<0.000000e+00> : vector<8x384xf32>
    %696 = tpu.matmul %693, %695, %cst_237 {dimension_numbers = #tpu.dot_dimension_numbers<[1], [0], [0], [1], [0, 0, 1, 1], [], []>} : vector<8x32xf32>, vector<32x384xf32>, vector<8x384xf32> -> vector<8x384xf32>
    %c2_238 = arith.constant 2 : index
    %c0_239 = arith.constant 0 : index
    %697 = vector.load %arg4[%c2_238, %c0_239] : memref<5x384xf32, #tpu.memory_space<vmem>>, vector<1x384xf32>
    %698 = vector.broadcast %697 : vector<1x384xf32> to vector<8x384xf32>
    %699 = arith.addf %696, %698 : vector<8x384xf32>
    %c1_240 = arith.constant 1 : index
    %c0_241 = arith.constant 0 : index
    %c0_242 = arith.constant 0 : index
    %700 = vector.load %arg5[%c1_240, %c0_241, %c0_242] : memref<2x32x384xf32, #tpu.memory_space<vmem>>, vector<1x32x384xf32>
    %701 = vector.shape_cast %700 : vector<1x32x384xf32> to vector<32x384xf32>
    %cst_243 = arith.constant dense<0.000000e+00> : vector<8x384xf32>
    %702 = tpu.matmul %655, %701, %cst_243 {dimension_numbers = #tpu.dot_dimension_numbers<[1], [0], [0], [1], [0, 0, 1, 1], [], []>} : vector<8x32xf32>, vector<32x384xf32>, vector<8x384xf32> -> vector<8x384xf32>
    %c4_244 = arith.constant 4 : index
    %c0_245 = arith.constant 0 : index
    %703 = vector.load %arg4[%c4_244, %c0_245] : memref<5x384xf32, #tpu.memory_space<vmem>>, vector<1x384xf32>
    %704 = vector.broadcast %703 : vector<1x384xf32> to vector<8x384xf32>
    %705 = arith.addf %702, %704 : vector<8x384xf32>
    %706 = vector.extract_strided_slice %699 {offsets = [0, 0], sizes = [8, 32], strides = [1, 1]} : vector<8x384xf32> to vector<8x32xf32>
    %707 = vector.extract_strided_slice %705 {offsets = [0, 0], sizes = [8, 32], strides = [1, 1]} : vector<8x384xf32> to vector<8x32xf32>
    %708 = arith.addf %706, %707 : vector<8x32xf32>
    %709 = arith.negf %708 : vector<8x32xf32>
    %710 = math.exp %709 : vector<8x32xf32>
    %cst_246 = arith.constant 1.000000e+00 : f32
    %711 = vector.broadcast %cst_246 : f32 to vector<8x32xf32>
    %712 = arith.addf %711, %710 : vector<8x32xf32>
    %713 = arith.divf %711, %712 : vector<8x32xf32>
    %714 = vector.extract_strided_slice %699 {offsets = [0, 128], sizes = [8, 32], strides = [1, 1]} : vector<8x384xf32> to vector<8x32xf32>
    %715 = vector.extract_strided_slice %705 {offsets = [0, 128], sizes = [8, 32], strides = [1, 1]} : vector<8x384xf32> to vector<8x32xf32>
    %716 = arith.addf %714, %715 : vector<8x32xf32>
    %717 = arith.negf %716 : vector<8x32xf32>
    %718 = math.exp %717 : vector<8x32xf32>
    %cst_247 = arith.constant 1.000000e+00 : f32
    %719 = vector.broadcast %cst_247 : f32 to vector<8x32xf32>
    %720 = arith.addf %719, %718 : vector<8x32xf32>
    %721 = arith.divf %719, %720 : vector<8x32xf32>
    %722 = vector.extract_strided_slice %699 {offsets = [0, 256], sizes = [8, 32], strides = [1, 1]} : vector<8x384xf32> to vector<8x32xf32>
    %723 = vector.extract_strided_slice %705 {offsets = [0, 256], sizes = [8, 32], strides = [1, 1]} : vector<8x384xf32> to vector<8x32xf32>
    %724 = arith.mulf %713, %723 : vector<8x32xf32>
    %725 = arith.addf %722, %724 : vector<8x32xf32>
    %726 = math.tanh %725 : vector<8x32xf32>
    %cst_248 = arith.constant 1.000000e+00 : f32
    %727 = vector.broadcast %cst_248 : f32 to vector<8x32xf32>
    %728 = arith.subf %727, %721 : vector<8x32xf32>
    %729 = arith.mulf %728, %726 : vector<8x32xf32>
    %730 = arith.mulf %721, %655 : vector<8x32xf32>
    %731 = arith.addf %729, %730 : vector<8x32xf32>
    %732 = arith.select %658, %731, %655 : vector<8x32xi1>, vector<8x32xf32>
    %733 = vector.extract_strided_slice %4 {offsets = [0, 8], sizes = [8, 1], strides = [1, 1]} : vector<8x12xi1> to vector<8x1xi1>
    %734 = vector.shape_cast %733 : vector<8x1xi1> to vector<8x1xi1>
    %735 = vector.broadcast %734 : vector<8x1xi1> to vector<8x32xi1>
    %c8_249 = arith.constant 8 : index
    %c0_250 = arith.constant 0 : index
    %c0_251 = arith.constant 0 : index
    %736 = vector.load %arg13[%c8_249, %c0_250, %c0_251] : memref<12x8x384xf32, #tpu.memory_space<vmem>>, vector<1x8x384xf32>
    %737 = vector.shape_cast %736 : vector<1x8x384xf32> to vector<8x384xf32>
    %c0_252 = arith.constant 0 : index
    %c0_253 = arith.constant 0 : index
    %c0_254 = arith.constant 0 : index
    %738 = vector.load %arg5[%c0_252, %c0_253, %c0_254] : memref<2x32x384xf32, #tpu.memory_space<vmem>>, vector<1x32x384xf32>
    %739 = vector.shape_cast %738 : vector<1x32x384xf32> to vector<32x384xf32>
    %cst_255 = arith.constant dense<0.000000e+00> : vector<8x384xf32>
    %740 = tpu.matmul %693, %739, %cst_255 {dimension_numbers = #tpu.dot_dimension_numbers<[1], [0], [0], [1], [0, 0, 1, 1], [], []>} : vector<8x32xf32>, vector<32x384xf32>, vector<8x384xf32> -> vector<8x384xf32>
    %c3_256 = arith.constant 3 : index
    %c0_257 = arith.constant 0 : index
    %741 = vector.load %arg4[%c3_256, %c0_257] : memref<5x384xf32, #tpu.memory_space<vmem>>, vector<1x384xf32>
    %742 = vector.broadcast %741 : vector<1x384xf32> to vector<8x384xf32>
    %743 = arith.addf %740, %742 : vector<8x384xf32>
    %744 = vector.extract_strided_slice %737 {offsets = [0, 0], sizes = [8, 32], strides = [1, 1]} : vector<8x384xf32> to vector<8x32xf32>
    %745 = vector.extract_strided_slice %743 {offsets = [0, 0], sizes = [8, 32], strides = [1, 1]} : vector<8x384xf32> to vector<8x32xf32>
    %746 = arith.addf %744, %745 : vector<8x32xf32>
    %747 = arith.negf %746 : vector<8x32xf32>
    %748 = math.exp %747 : vector<8x32xf32>
    %cst_258 = arith.constant 1.000000e+00 : f32
    %749 = vector.broadcast %cst_258 : f32 to vector<8x32xf32>
    %750 = arith.addf %749, %748 : vector<8x32xf32>
    %751 = arith.divf %749, %750 : vector<8x32xf32>
    %752 = vector.extract_strided_slice %737 {offsets = [0, 128], sizes = [8, 32], strides = [1, 1]} : vector<8x384xf32> to vector<8x32xf32>
    %753 = vector.extract_strided_slice %743 {offsets = [0, 128], sizes = [8, 32], strides = [1, 1]} : vector<8x384xf32> to vector<8x32xf32>
    %754 = arith.addf %752, %753 : vector<8x32xf32>
    %755 = arith.negf %754 : vector<8x32xf32>
    %756 = math.exp %755 : vector<8x32xf32>
    %cst_259 = arith.constant 1.000000e+00 : f32
    %757 = vector.broadcast %cst_259 : f32 to vector<8x32xf32>
    %758 = arith.addf %757, %756 : vector<8x32xf32>
    %759 = arith.divf %757, %758 : vector<8x32xf32>
    %760 = vector.extract_strided_slice %737 {offsets = [0, 256], sizes = [8, 32], strides = [1, 1]} : vector<8x384xf32> to vector<8x32xf32>
    %761 = vector.extract_strided_slice %743 {offsets = [0, 256], sizes = [8, 32], strides = [1, 1]} : vector<8x384xf32> to vector<8x32xf32>
    %762 = arith.mulf %751, %761 : vector<8x32xf32>
    %763 = arith.addf %760, %762 : vector<8x32xf32>
    %764 = math.tanh %763 : vector<8x32xf32>
    %cst_260 = arith.constant 1.000000e+00 : f32
    %765 = vector.broadcast %cst_260 : f32 to vector<8x32xf32>
    %766 = arith.subf %765, %759 : vector<8x32xf32>
    %767 = arith.mulf %766, %764 : vector<8x32xf32>
    %768 = arith.mulf %759, %693 : vector<8x32xf32>
    %769 = arith.addf %767, %768 : vector<8x32xf32>
    %770 = arith.select %735, %769, %693 : vector<8x32xi1>, vector<8x32xf32>
    %c0_261 = arith.constant 0 : index
    %c0_262 = arith.constant 0 : index
    %c0_263 = arith.constant 0 : index
    %771 = vector.load %arg6[%c0_261, %c0_262, %c0_263] : memref<1x32x384xf32, #tpu.memory_space<vmem>>, vector<1x32x384xf32>
    %772 = vector.shape_cast %771 : vector<1x32x384xf32> to vector<32x384xf32>
    %cst_264 = arith.constant dense<0.000000e+00> : vector<8x384xf32>
    %773 = tpu.matmul %770, %772, %cst_264 {dimension_numbers = #tpu.dot_dimension_numbers<[1], [0], [0], [1], [0, 0, 1, 1], [], []>} : vector<8x32xf32>, vector<32x384xf32>, vector<8x384xf32> -> vector<8x384xf32>
    %c2_265 = arith.constant 2 : index
    %c0_266 = arith.constant 0 : index
    %774 = vector.load %arg4[%c2_265, %c0_266] : memref<5x384xf32, #tpu.memory_space<vmem>>, vector<1x384xf32>
    %775 = vector.broadcast %774 : vector<1x384xf32> to vector<8x384xf32>
    %776 = arith.addf %773, %775 : vector<8x384xf32>
    %c1_267 = arith.constant 1 : index
    %c0_268 = arith.constant 0 : index
    %c0_269 = arith.constant 0 : index
    %777 = vector.load %arg5[%c1_267, %c0_268, %c0_269] : memref<2x32x384xf32, #tpu.memory_space<vmem>>, vector<1x32x384xf32>
    %778 = vector.shape_cast %777 : vector<1x32x384xf32> to vector<32x384xf32>
    %cst_270 = arith.constant dense<0.000000e+00> : vector<8x384xf32>
    %779 = tpu.matmul %732, %778, %cst_270 {dimension_numbers = #tpu.dot_dimension_numbers<[1], [0], [0], [1], [0, 0, 1, 1], [], []>} : vector<8x32xf32>, vector<32x384xf32>, vector<8x384xf32> -> vector<8x384xf32>
    %c4_271 = arith.constant 4 : index
    %c0_272 = arith.constant 0 : index
    %780 = vector.load %arg4[%c4_271, %c0_272] : memref<5x384xf32, #tpu.memory_space<vmem>>, vector<1x384xf32>
    %781 = vector.broadcast %780 : vector<1x384xf32> to vector<8x384xf32>
    %782 = arith.addf %779, %781 : vector<8x384xf32>
    %783 = vector.extract_strided_slice %776 {offsets = [0, 0], sizes = [8, 32], strides = [1, 1]} : vector<8x384xf32> to vector<8x32xf32>
    %784 = vector.extract_strided_slice %782 {offsets = [0, 0], sizes = [8, 32], strides = [1, 1]} : vector<8x384xf32> to vector<8x32xf32>
    %785 = arith.addf %783, %784 : vector<8x32xf32>
    %786 = arith.negf %785 : vector<8x32xf32>
    %787 = math.exp %786 : vector<8x32xf32>
    %cst_273 = arith.constant 1.000000e+00 : f32
    %788 = vector.broadcast %cst_273 : f32 to vector<8x32xf32>
    %789 = arith.addf %788, %787 : vector<8x32xf32>
    %790 = arith.divf %788, %789 : vector<8x32xf32>
    %791 = vector.extract_strided_slice %776 {offsets = [0, 128], sizes = [8, 32], strides = [1, 1]} : vector<8x384xf32> to vector<8x32xf32>
    %792 = vector.extract_strided_slice %782 {offsets = [0, 128], sizes = [8, 32], strides = [1, 1]} : vector<8x384xf32> to vector<8x32xf32>
    %793 = arith.addf %791, %792 : vector<8x32xf32>
    %794 = arith.negf %793 : vector<8x32xf32>
    %795 = math.exp %794 : vector<8x32xf32>
    %cst_274 = arith.constant 1.000000e+00 : f32
    %796 = vector.broadcast %cst_274 : f32 to vector<8x32xf32>
    %797 = arith.addf %796, %795 : vector<8x32xf32>
    %798 = arith.divf %796, %797 : vector<8x32xf32>
    %799 = vector.extract_strided_slice %776 {offsets = [0, 256], sizes = [8, 32], strides = [1, 1]} : vector<8x384xf32> to vector<8x32xf32>
    %800 = vector.extract_strided_slice %782 {offsets = [0, 256], sizes = [8, 32], strides = [1, 1]} : vector<8x384xf32> to vector<8x32xf32>
    %801 = arith.mulf %790, %800 : vector<8x32xf32>
    %802 = arith.addf %799, %801 : vector<8x32xf32>
    %803 = math.tanh %802 : vector<8x32xf32>
    %cst_275 = arith.constant 1.000000e+00 : f32
    %804 = vector.broadcast %cst_275 : f32 to vector<8x32xf32>
    %805 = arith.subf %804, %798 : vector<8x32xf32>
    %806 = arith.mulf %805, %803 : vector<8x32xf32>
    %807 = arith.mulf %798, %732 : vector<8x32xf32>
    %808 = arith.addf %806, %807 : vector<8x32xf32>
    %809 = arith.select %735, %808, %732 : vector<8x32xi1>, vector<8x32xf32>
    %810 = vector.extract_strided_slice %4 {offsets = [0, 9], sizes = [8, 1], strides = [1, 1]} : vector<8x12xi1> to vector<8x1xi1>
    %811 = vector.shape_cast %810 : vector<8x1xi1> to vector<8x1xi1>
    %812 = vector.broadcast %811 : vector<8x1xi1> to vector<8x32xi1>
    %c9_276 = arith.constant 9 : index
    %c0_277 = arith.constant 0 : index
    %c0_278 = arith.constant 0 : index
    %813 = vector.load %arg13[%c9_276, %c0_277, %c0_278] : memref<12x8x384xf32, #tpu.memory_space<vmem>>, vector<1x8x384xf32>
    %814 = vector.shape_cast %813 : vector<1x8x384xf32> to vector<8x384xf32>
    %c0_279 = arith.constant 0 : index
    %c0_280 = arith.constant 0 : index
    %c0_281 = arith.constant 0 : index
    %815 = vector.load %arg5[%c0_279, %c0_280, %c0_281] : memref<2x32x384xf32, #tpu.memory_space<vmem>>, vector<1x32x384xf32>
    %816 = vector.shape_cast %815 : vector<1x32x384xf32> to vector<32x384xf32>
    %cst_282 = arith.constant dense<0.000000e+00> : vector<8x384xf32>
    %817 = tpu.matmul %770, %816, %cst_282 {dimension_numbers = #tpu.dot_dimension_numbers<[1], [0], [0], [1], [0, 0, 1, 1], [], []>} : vector<8x32xf32>, vector<32x384xf32>, vector<8x384xf32> -> vector<8x384xf32>
    %c3_283 = arith.constant 3 : index
    %c0_284 = arith.constant 0 : index
    %818 = vector.load %arg4[%c3_283, %c0_284] : memref<5x384xf32, #tpu.memory_space<vmem>>, vector<1x384xf32>
    %819 = vector.broadcast %818 : vector<1x384xf32> to vector<8x384xf32>
    %820 = arith.addf %817, %819 : vector<8x384xf32>
    %821 = vector.extract_strided_slice %814 {offsets = [0, 0], sizes = [8, 32], strides = [1, 1]} : vector<8x384xf32> to vector<8x32xf32>
    %822 = vector.extract_strided_slice %820 {offsets = [0, 0], sizes = [8, 32], strides = [1, 1]} : vector<8x384xf32> to vector<8x32xf32>
    %823 = arith.addf %821, %822 : vector<8x32xf32>
    %824 = arith.negf %823 : vector<8x32xf32>
    %825 = math.exp %824 : vector<8x32xf32>
    %cst_285 = arith.constant 1.000000e+00 : f32
    %826 = vector.broadcast %cst_285 : f32 to vector<8x32xf32>
    %827 = arith.addf %826, %825 : vector<8x32xf32>
    %828 = arith.divf %826, %827 : vector<8x32xf32>
    %829 = vector.extract_strided_slice %814 {offsets = [0, 128], sizes = [8, 32], strides = [1, 1]} : vector<8x384xf32> to vector<8x32xf32>
    %830 = vector.extract_strided_slice %820 {offsets = [0, 128], sizes = [8, 32], strides = [1, 1]} : vector<8x384xf32> to vector<8x32xf32>
    %831 = arith.addf %829, %830 : vector<8x32xf32>
    %832 = arith.negf %831 : vector<8x32xf32>
    %833 = math.exp %832 : vector<8x32xf32>
    %cst_286 = arith.constant 1.000000e+00 : f32
    %834 = vector.broadcast %cst_286 : f32 to vector<8x32xf32>
    %835 = arith.addf %834, %833 : vector<8x32xf32>
    %836 = arith.divf %834, %835 : vector<8x32xf32>
    %837 = vector.extract_strided_slice %814 {offsets = [0, 256], sizes = [8, 32], strides = [1, 1]} : vector<8x384xf32> to vector<8x32xf32>
    %838 = vector.extract_strided_slice %820 {offsets = [0, 256], sizes = [8, 32], strides = [1, 1]} : vector<8x384xf32> to vector<8x32xf32>
    %839 = arith.mulf %828, %838 : vector<8x32xf32>
    %840 = arith.addf %837, %839 : vector<8x32xf32>
    %841 = math.tanh %840 : vector<8x32xf32>
    %cst_287 = arith.constant 1.000000e+00 : f32
    %842 = vector.broadcast %cst_287 : f32 to vector<8x32xf32>
    %843 = arith.subf %842, %836 : vector<8x32xf32>
    %844 = arith.mulf %843, %841 : vector<8x32xf32>
    %845 = arith.mulf %836, %770 : vector<8x32xf32>
    %846 = arith.addf %844, %845 : vector<8x32xf32>
    %847 = arith.select %812, %846, %770 : vector<8x32xi1>, vector<8x32xf32>
    %c0_288 = arith.constant 0 : index
    %c0_289 = arith.constant 0 : index
    %c0_290 = arith.constant 0 : index
    %848 = vector.load %arg6[%c0_288, %c0_289, %c0_290] : memref<1x32x384xf32, #tpu.memory_space<vmem>>, vector<1x32x384xf32>
    %849 = vector.shape_cast %848 : vector<1x32x384xf32> to vector<32x384xf32>
    %cst_291 = arith.constant dense<0.000000e+00> : vector<8x384xf32>
    %850 = tpu.matmul %847, %849, %cst_291 {dimension_numbers = #tpu.dot_dimension_numbers<[1], [0], [0], [1], [0, 0, 1, 1], [], []>} : vector<8x32xf32>, vector<32x384xf32>, vector<8x384xf32> -> vector<8x384xf32>
    %c2_292 = arith.constant 2 : index
    %c0_293 = arith.constant 0 : index
    %851 = vector.load %arg4[%c2_292, %c0_293] : memref<5x384xf32, #tpu.memory_space<vmem>>, vector<1x384xf32>
    %852 = vector.broadcast %851 : vector<1x384xf32> to vector<8x384xf32>
    %853 = arith.addf %850, %852 : vector<8x384xf32>
    %c1_294 = arith.constant 1 : index
    %c0_295 = arith.constant 0 : index
    %c0_296 = arith.constant 0 : index
    %854 = vector.load %arg5[%c1_294, %c0_295, %c0_296] : memref<2x32x384xf32, #tpu.memory_space<vmem>>, vector<1x32x384xf32>
    %855 = vector.shape_cast %854 : vector<1x32x384xf32> to vector<32x384xf32>
    %cst_297 = arith.constant dense<0.000000e+00> : vector<8x384xf32>
    %856 = tpu.matmul %809, %855, %cst_297 {dimension_numbers = #tpu.dot_dimension_numbers<[1], [0], [0], [1], [0, 0, 1, 1], [], []>} : vector<8x32xf32>, vector<32x384xf32>, vector<8x384xf32> -> vector<8x384xf32>
    %c4_298 = arith.constant 4 : index
    %c0_299 = arith.constant 0 : index
    %857 = vector.load %arg4[%c4_298, %c0_299] : memref<5x384xf32, #tpu.memory_space<vmem>>, vector<1x384xf32>
    %858 = vector.broadcast %857 : vector<1x384xf32> to vector<8x384xf32>
    %859 = arith.addf %856, %858 : vector<8x384xf32>
    %860 = vector.extract_strided_slice %853 {offsets = [0, 0], sizes = [8, 32], strides = [1, 1]} : vector<8x384xf32> to vector<8x32xf32>
    %861 = vector.extract_strided_slice %859 {offsets = [0, 0], sizes = [8, 32], strides = [1, 1]} : vector<8x384xf32> to vector<8x32xf32>
    %862 = arith.addf %860, %861 : vector<8x32xf32>
    %863 = arith.negf %862 : vector<8x32xf32>
    %864 = math.exp %863 : vector<8x32xf32>
    %cst_300 = arith.constant 1.000000e+00 : f32
    %865 = vector.broadcast %cst_300 : f32 to vector<8x32xf32>
    %866 = arith.addf %865, %864 : vector<8x32xf32>
    %867 = arith.divf %865, %866 : vector<8x32xf32>
    %868 = vector.extract_strided_slice %853 {offsets = [0, 128], sizes = [8, 32], strides = [1, 1]} : vector<8x384xf32> to vector<8x32xf32>
    %869 = vector.extract_strided_slice %859 {offsets = [0, 128], sizes = [8, 32], strides = [1, 1]} : vector<8x384xf32> to vector<8x32xf32>
    %870 = arith.addf %868, %869 : vector<8x32xf32>
    %871 = arith.negf %870 : vector<8x32xf32>
    %872 = math.exp %871 : vector<8x32xf32>
    %cst_301 = arith.constant 1.000000e+00 : f32
    %873 = vector.broadcast %cst_301 : f32 to vector<8x32xf32>
    %874 = arith.addf %873, %872 : vector<8x32xf32>
    %875 = arith.divf %873, %874 : vector<8x32xf32>
    %876 = vector.extract_strided_slice %853 {offsets = [0, 256], sizes = [8, 32], strides = [1, 1]} : vector<8x384xf32> to vector<8x32xf32>
    %877 = vector.extract_strided_slice %859 {offsets = [0, 256], sizes = [8, 32], strides = [1, 1]} : vector<8x384xf32> to vector<8x32xf32>
    %878 = arith.mulf %867, %877 : vector<8x32xf32>
    %879 = arith.addf %876, %878 : vector<8x32xf32>
    %880 = math.tanh %879 : vector<8x32xf32>
    %cst_302 = arith.constant 1.000000e+00 : f32
    %881 = vector.broadcast %cst_302 : f32 to vector<8x32xf32>
    %882 = arith.subf %881, %875 : vector<8x32xf32>
    %883 = arith.mulf %882, %880 : vector<8x32xf32>
    %884 = arith.mulf %875, %809 : vector<8x32xf32>
    %885 = arith.addf %883, %884 : vector<8x32xf32>
    %886 = arith.select %812, %885, %809 : vector<8x32xi1>, vector<8x32xf32>
    %887 = vector.extract_strided_slice %4 {offsets = [0, 10], sizes = [8, 1], strides = [1, 1]} : vector<8x12xi1> to vector<8x1xi1>
    %888 = vector.shape_cast %887 : vector<8x1xi1> to vector<8x1xi1>
    %889 = vector.broadcast %888 : vector<8x1xi1> to vector<8x32xi1>
    %c10_303 = arith.constant 10 : index
    %c0_304 = arith.constant 0 : index
    %c0_305 = arith.constant 0 : index
    %890 = vector.load %arg13[%c10_303, %c0_304, %c0_305] : memref<12x8x384xf32, #tpu.memory_space<vmem>>, vector<1x8x384xf32>
    %891 = vector.shape_cast %890 : vector<1x8x384xf32> to vector<8x384xf32>
    %c0_306 = arith.constant 0 : index
    %c0_307 = arith.constant 0 : index
    %c0_308 = arith.constant 0 : index
    %892 = vector.load %arg5[%c0_306, %c0_307, %c0_308] : memref<2x32x384xf32, #tpu.memory_space<vmem>>, vector<1x32x384xf32>
    %893 = vector.shape_cast %892 : vector<1x32x384xf32> to vector<32x384xf32>
    %cst_309 = arith.constant dense<0.000000e+00> : vector<8x384xf32>
    %894 = tpu.matmul %847, %893, %cst_309 {dimension_numbers = #tpu.dot_dimension_numbers<[1], [0], [0], [1], [0, 0, 1, 1], [], []>} : vector<8x32xf32>, vector<32x384xf32>, vector<8x384xf32> -> vector<8x384xf32>
    %c3_310 = arith.constant 3 : index
    %c0_311 = arith.constant 0 : index
    %895 = vector.load %arg4[%c3_310, %c0_311] : memref<5x384xf32, #tpu.memory_space<vmem>>, vector<1x384xf32>
    %896 = vector.broadcast %895 : vector<1x384xf32> to vector<8x384xf32>
    %897 = arith.addf %894, %896 : vector<8x384xf32>
    %898 = vector.extract_strided_slice %891 {offsets = [0, 0], sizes = [8, 32], strides = [1, 1]} : vector<8x384xf32> to vector<8x32xf32>
    %899 = vector.extract_strided_slice %897 {offsets = [0, 0], sizes = [8, 32], strides = [1, 1]} : vector<8x384xf32> to vector<8x32xf32>
    %900 = arith.addf %898, %899 : vector<8x32xf32>
    %901 = arith.negf %900 : vector<8x32xf32>
    %902 = math.exp %901 : vector<8x32xf32>
    %cst_312 = arith.constant 1.000000e+00 : f32
    %903 = vector.broadcast %cst_312 : f32 to vector<8x32xf32>
    %904 = arith.addf %903, %902 : vector<8x32xf32>
    %905 = arith.divf %903, %904 : vector<8x32xf32>
    %906 = vector.extract_strided_slice %891 {offsets = [0, 128], sizes = [8, 32], strides = [1, 1]} : vector<8x384xf32> to vector<8x32xf32>
    %907 = vector.extract_strided_slice %897 {offsets = [0, 128], sizes = [8, 32], strides = [1, 1]} : vector<8x384xf32> to vector<8x32xf32>
    %908 = arith.addf %906, %907 : vector<8x32xf32>
    %909 = arith.negf %908 : vector<8x32xf32>
    %910 = math.exp %909 : vector<8x32xf32>
    %cst_313 = arith.constant 1.000000e+00 : f32
    %911 = vector.broadcast %cst_313 : f32 to vector<8x32xf32>
    %912 = arith.addf %911, %910 : vector<8x32xf32>
    %913 = arith.divf %911, %912 : vector<8x32xf32>
    %914 = vector.extract_strided_slice %891 {offsets = [0, 256], sizes = [8, 32], strides = [1, 1]} : vector<8x384xf32> to vector<8x32xf32>
    %915 = vector.extract_strided_slice %897 {offsets = [0, 256], sizes = [8, 32], strides = [1, 1]} : vector<8x384xf32> to vector<8x32xf32>
    %916 = arith.mulf %905, %915 : vector<8x32xf32>
    %917 = arith.addf %914, %916 : vector<8x32xf32>
    %918 = math.tanh %917 : vector<8x32xf32>
    %cst_314 = arith.constant 1.000000e+00 : f32
    %919 = vector.broadcast %cst_314 : f32 to vector<8x32xf32>
    %920 = arith.subf %919, %913 : vector<8x32xf32>
    %921 = arith.mulf %920, %918 : vector<8x32xf32>
    %922 = arith.mulf %913, %847 : vector<8x32xf32>
    %923 = arith.addf %921, %922 : vector<8x32xf32>
    %924 = arith.select %889, %923, %847 : vector<8x32xi1>, vector<8x32xf32>
    %c0_315 = arith.constant 0 : index
    %c0_316 = arith.constant 0 : index
    %c0_317 = arith.constant 0 : index
    %925 = vector.load %arg6[%c0_315, %c0_316, %c0_317] : memref<1x32x384xf32, #tpu.memory_space<vmem>>, vector<1x32x384xf32>
    %926 = vector.shape_cast %925 : vector<1x32x384xf32> to vector<32x384xf32>
    %cst_318 = arith.constant dense<0.000000e+00> : vector<8x384xf32>
    %927 = tpu.matmul %924, %926, %cst_318 {dimension_numbers = #tpu.dot_dimension_numbers<[1], [0], [0], [1], [0, 0, 1, 1], [], []>} : vector<8x32xf32>, vector<32x384xf32>, vector<8x384xf32> -> vector<8x384xf32>
    %c2_319 = arith.constant 2 : index
    %c0_320 = arith.constant 0 : index
    %928 = vector.load %arg4[%c2_319, %c0_320] : memref<5x384xf32, #tpu.memory_space<vmem>>, vector<1x384xf32>
    %929 = vector.broadcast %928 : vector<1x384xf32> to vector<8x384xf32>
    %930 = arith.addf %927, %929 : vector<8x384xf32>
    %c1_321 = arith.constant 1 : index
    %c0_322 = arith.constant 0 : index
    %c0_323 = arith.constant 0 : index
    %931 = vector.load %arg5[%c1_321, %c0_322, %c0_323] : memref<2x32x384xf32, #tpu.memory_space<vmem>>, vector<1x32x384xf32>
    %932 = vector.shape_cast %931 : vector<1x32x384xf32> to vector<32x384xf32>
    %cst_324 = arith.constant dense<0.000000e+00> : vector<8x384xf32>
    %933 = tpu.matmul %886, %932, %cst_324 {dimension_numbers = #tpu.dot_dimension_numbers<[1], [0], [0], [1], [0, 0, 1, 1], [], []>} : vector<8x32xf32>, vector<32x384xf32>, vector<8x384xf32> -> vector<8x384xf32>
    %c4_325 = arith.constant 4 : index
    %c0_326 = arith.constant 0 : index
    %934 = vector.load %arg4[%c4_325, %c0_326] : memref<5x384xf32, #tpu.memory_space<vmem>>, vector<1x384xf32>
    %935 = vector.broadcast %934 : vector<1x384xf32> to vector<8x384xf32>
    %936 = arith.addf %933, %935 : vector<8x384xf32>
    %937 = vector.extract_strided_slice %930 {offsets = [0, 0], sizes = [8, 32], strides = [1, 1]} : vector<8x384xf32> to vector<8x32xf32>
    %938 = vector.extract_strided_slice %936 {offsets = [0, 0], sizes = [8, 32], strides = [1, 1]} : vector<8x384xf32> to vector<8x32xf32>
    %939 = arith.addf %937, %938 : vector<8x32xf32>
    %940 = arith.negf %939 : vector<8x32xf32>
    %941 = math.exp %940 : vector<8x32xf32>
    %cst_327 = arith.constant 1.000000e+00 : f32
    %942 = vector.broadcast %cst_327 : f32 to vector<8x32xf32>
    %943 = arith.addf %942, %941 : vector<8x32xf32>
    %944 = arith.divf %942, %943 : vector<8x32xf32>
    %945 = vector.extract_strided_slice %930 {offsets = [0, 128], sizes = [8, 32], strides = [1, 1]} : vector<8x384xf32> to vector<8x32xf32>
    %946 = vector.extract_strided_slice %936 {offsets = [0, 128], sizes = [8, 32], strides = [1, 1]} : vector<8x384xf32> to vector<8x32xf32>
    %947 = arith.addf %945, %946 : vector<8x32xf32>
    %948 = arith.negf %947 : vector<8x32xf32>
    %949 = math.exp %948 : vector<8x32xf32>
    %cst_328 = arith.constant 1.000000e+00 : f32
    %950 = vector.broadcast %cst_328 : f32 to vector<8x32xf32>
    %951 = arith.addf %950, %949 : vector<8x32xf32>
    %952 = arith.divf %950, %951 : vector<8x32xf32>
    %953 = vector.extract_strided_slice %930 {offsets = [0, 256], sizes = [8, 32], strides = [1, 1]} : vector<8x384xf32> to vector<8x32xf32>
    %954 = vector.extract_strided_slice %936 {offsets = [0, 256], sizes = [8, 32], strides = [1, 1]} : vector<8x384xf32> to vector<8x32xf32>
    %955 = arith.mulf %944, %954 : vector<8x32xf32>
    %956 = arith.addf %953, %955 : vector<8x32xf32>
    %957 = math.tanh %956 : vector<8x32xf32>
    %cst_329 = arith.constant 1.000000e+00 : f32
    %958 = vector.broadcast %cst_329 : f32 to vector<8x32xf32>
    %959 = arith.subf %958, %952 : vector<8x32xf32>
    %960 = arith.mulf %959, %957 : vector<8x32xf32>
    %961 = arith.mulf %952, %886 : vector<8x32xf32>
    %962 = arith.addf %960, %961 : vector<8x32xf32>
    %963 = arith.select %889, %962, %886 : vector<8x32xi1>, vector<8x32xf32>
    %964 = vector.extract_strided_slice %4 {offsets = [0, 11], sizes = [8, 1], strides = [1, 1]} : vector<8x12xi1> to vector<8x1xi1>
    %965 = vector.shape_cast %964 : vector<8x1xi1> to vector<8x1xi1>
    %966 = vector.broadcast %965 : vector<8x1xi1> to vector<8x32xi1>
    %c11_330 = arith.constant 11 : index
    %c0_331 = arith.constant 0 : index
    %c0_332 = arith.constant 0 : index
    %967 = vector.load %arg13[%c11_330, %c0_331, %c0_332] : memref<12x8x384xf32, #tpu.memory_space<vmem>>, vector<1x8x384xf32>
    %968 = vector.shape_cast %967 : vector<1x8x384xf32> to vector<8x384xf32>
    %c0_333 = arith.constant 0 : index
    %c0_334 = arith.constant 0 : index
    %c0_335 = arith.constant 0 : index
    %969 = vector.load %arg5[%c0_333, %c0_334, %c0_335] : memref<2x32x384xf32, #tpu.memory_space<vmem>>, vector<1x32x384xf32>
    %970 = vector.shape_cast %969 : vector<1x32x384xf32> to vector<32x384xf32>
    %cst_336 = arith.constant dense<0.000000e+00> : vector<8x384xf32>
    %971 = tpu.matmul %924, %970, %cst_336 {dimension_numbers = #tpu.dot_dimension_numbers<[1], [0], [0], [1], [0, 0, 1, 1], [], []>} : vector<8x32xf32>, vector<32x384xf32>, vector<8x384xf32> -> vector<8x384xf32>
    %c3_337 = arith.constant 3 : index
    %c0_338 = arith.constant 0 : index
    %972 = vector.load %arg4[%c3_337, %c0_338] : memref<5x384xf32, #tpu.memory_space<vmem>>, vector<1x384xf32>
    %973 = vector.broadcast %972 : vector<1x384xf32> to vector<8x384xf32>
    %974 = arith.addf %971, %973 : vector<8x384xf32>
    %975 = vector.extract_strided_slice %968 {offsets = [0, 0], sizes = [8, 32], strides = [1, 1]} : vector<8x384xf32> to vector<8x32xf32>
    %976 = vector.extract_strided_slice %974 {offsets = [0, 0], sizes = [8, 32], strides = [1, 1]} : vector<8x384xf32> to vector<8x32xf32>
    %977 = arith.addf %975, %976 : vector<8x32xf32>
    %978 = arith.negf %977 : vector<8x32xf32>
    %979 = math.exp %978 : vector<8x32xf32>
    %cst_339 = arith.constant 1.000000e+00 : f32
    %980 = vector.broadcast %cst_339 : f32 to vector<8x32xf32>
    %981 = arith.addf %980, %979 : vector<8x32xf32>
    %982 = arith.divf %980, %981 : vector<8x32xf32>
    %983 = vector.extract_strided_slice %968 {offsets = [0, 128], sizes = [8, 32], strides = [1, 1]} : vector<8x384xf32> to vector<8x32xf32>
    %984 = vector.extract_strided_slice %974 {offsets = [0, 128], sizes = [8, 32], strides = [1, 1]} : vector<8x384xf32> to vector<8x32xf32>
    %985 = arith.addf %983, %984 : vector<8x32xf32>
    %986 = arith.negf %985 : vector<8x32xf32>
    %987 = math.exp %986 : vector<8x32xf32>
    %cst_340 = arith.constant 1.000000e+00 : f32
    %988 = vector.broadcast %cst_340 : f32 to vector<8x32xf32>
    %989 = arith.addf %988, %987 : vector<8x32xf32>
    %990 = arith.divf %988, %989 : vector<8x32xf32>
    %991 = vector.extract_strided_slice %968 {offsets = [0, 256], sizes = [8, 32], strides = [1, 1]} : vector<8x384xf32> to vector<8x32xf32>
    %992 = vector.extract_strided_slice %974 {offsets = [0, 256], sizes = [8, 32], strides = [1, 1]} : vector<8x384xf32> to vector<8x32xf32>
    %993 = arith.mulf %982, %992 : vector<8x32xf32>
    %994 = arith.addf %991, %993 : vector<8x32xf32>
    %995 = math.tanh %994 : vector<8x32xf32>
    %cst_341 = arith.constant 1.000000e+00 : f32
    %996 = vector.broadcast %cst_341 : f32 to vector<8x32xf32>
    %997 = arith.subf %996, %990 : vector<8x32xf32>
    %998 = arith.mulf %997, %995 : vector<8x32xf32>
    %999 = arith.mulf %990, %924 : vector<8x32xf32>
    %1000 = arith.addf %998, %999 : vector<8x32xf32>
    %1001 = arith.select %966, %1000, %924 : vector<8x32xi1>, vector<8x32xf32>
    %c0_342 = arith.constant 0 : index
    %c0_343 = arith.constant 0 : index
    %c0_344 = arith.constant 0 : index
    %1002 = vector.load %arg6[%c0_342, %c0_343, %c0_344] : memref<1x32x384xf32, #tpu.memory_space<vmem>>, vector<1x32x384xf32>
    %1003 = vector.shape_cast %1002 : vector<1x32x384xf32> to vector<32x384xf32>
    %cst_345 = arith.constant dense<0.000000e+00> : vector<8x384xf32>
    %1004 = tpu.matmul %1001, %1003, %cst_345 {dimension_numbers = #tpu.dot_dimension_numbers<[1], [0], [0], [1], [0, 0, 1, 1], [], []>} : vector<8x32xf32>, vector<32x384xf32>, vector<8x384xf32> -> vector<8x384xf32>
    %c2_346 = arith.constant 2 : index
    %c0_347 = arith.constant 0 : index
    %1005 = vector.load %arg4[%c2_346, %c0_347] : memref<5x384xf32, #tpu.memory_space<vmem>>, vector<1x384xf32>
    %1006 = vector.broadcast %1005 : vector<1x384xf32> to vector<8x384xf32>
    %1007 = arith.addf %1004, %1006 : vector<8x384xf32>
    %c1_348 = arith.constant 1 : index
    %c0_349 = arith.constant 0 : index
    %c0_350 = arith.constant 0 : index
    %1008 = vector.load %arg5[%c1_348, %c0_349, %c0_350] : memref<2x32x384xf32, #tpu.memory_space<vmem>>, vector<1x32x384xf32>
    %1009 = vector.shape_cast %1008 : vector<1x32x384xf32> to vector<32x384xf32>
    %cst_351 = arith.constant dense<0.000000e+00> : vector<8x384xf32>
    %1010 = tpu.matmul %963, %1009, %cst_351 {dimension_numbers = #tpu.dot_dimension_numbers<[1], [0], [0], [1], [0, 0, 1, 1], [], []>} : vector<8x32xf32>, vector<32x384xf32>, vector<8x384xf32> -> vector<8x384xf32>
    %c4_352 = arith.constant 4 : index
    %c0_353 = arith.constant 0 : index
    %1011 = vector.load %arg4[%c4_352, %c0_353] : memref<5x384xf32, #tpu.memory_space<vmem>>, vector<1x384xf32>
    %1012 = vector.broadcast %1011 : vector<1x384xf32> to vector<8x384xf32>
    %1013 = arith.addf %1010, %1012 : vector<8x384xf32>
    %1014 = vector.extract_strided_slice %1007 {offsets = [0, 0], sizes = [8, 32], strides = [1, 1]} : vector<8x384xf32> to vector<8x32xf32>
    %1015 = vector.extract_strided_slice %1013 {offsets = [0, 0], sizes = [8, 32], strides = [1, 1]} : vector<8x384xf32> to vector<8x32xf32>
    %1016 = arith.addf %1014, %1015 : vector<8x32xf32>
    %1017 = arith.negf %1016 : vector<8x32xf32>
    %1018 = math.exp %1017 : vector<8x32xf32>
    %cst_354 = arith.constant 1.000000e+00 : f32
    %1019 = vector.broadcast %cst_354 : f32 to vector<8x32xf32>
    %1020 = arith.addf %1019, %1018 : vector<8x32xf32>
    %1021 = arith.divf %1019, %1020 : vector<8x32xf32>
    %1022 = vector.extract_strided_slice %1007 {offsets = [0, 128], sizes = [8, 32], strides = [1, 1]} : vector<8x384xf32> to vector<8x32xf32>
    %1023 = vector.extract_strided_slice %1013 {offsets = [0, 128], sizes = [8, 32], strides = [1, 1]} : vector<8x384xf32> to vector<8x32xf32>
    %1024 = arith.addf %1022, %1023 : vector<8x32xf32>
    %1025 = arith.negf %1024 : vector<8x32xf32>
    %1026 = math.exp %1025 : vector<8x32xf32>
    %cst_355 = arith.constant 1.000000e+00 : f32
    %1027 = vector.broadcast %cst_355 : f32 to vector<8x32xf32>
    %1028 = arith.addf %1027, %1026 : vector<8x32xf32>
    %1029 = arith.divf %1027, %1028 : vector<8x32xf32>
    %1030 = vector.extract_strided_slice %1007 {offsets = [0, 256], sizes = [8, 32], strides = [1, 1]} : vector<8x384xf32> to vector<8x32xf32>
    %1031 = vector.extract_strided_slice %1013 {offsets = [0, 256], sizes = [8, 32], strides = [1, 1]} : vector<8x384xf32> to vector<8x32xf32>
    %1032 = arith.mulf %1021, %1031 : vector<8x32xf32>
    %1033 = arith.addf %1030, %1032 : vector<8x32xf32>
    %1034 = math.tanh %1033 : vector<8x32xf32>
    %cst_356 = arith.constant 1.000000e+00 : f32
    %1035 = vector.broadcast %cst_356 : f32 to vector<8x32xf32>
    %1036 = arith.subf %1035, %1029 : vector<8x32xf32>
    %1037 = arith.mulf %1036, %1034 : vector<8x32xf32>
    %1038 = arith.mulf %1029, %963 : vector<8x32xf32>
    %1039 = arith.addf %1037, %1038 : vector<8x32xf32>
    %1040 = arith.select %966, %1039, %963 : vector<8x32xi1>, vector<8x32xf32>
    %c0_357 = arith.constant 0 : index
    %c0_358 = arith.constant 0 : index
    %1041 = vector.load %arg10[%c0_357, %c0_358] : memref<33x1xf32, #tpu.memory_space<vmem>>, vector<32x1xf32>
    %cst_359 = arith.constant dense<0.000000e+00> : vector<8x1xf32>
    %1042 = tpu.matmul %1040, %1041, %cst_359 {dimension_numbers = #tpu.dot_dimension_numbers<[1], [0], [0], [1], [0, 0, 1, 1], [], []>} : vector<8x32xf32>, vector<32x1xf32>, vector<8x1xf32> -> vector<8x1xf32>
    %c32 = arith.constant 32 : index
    %c0_360 = arith.constant 0 : index
    %1043 = vector.load %arg10[%c32, %c0_360] : memref<33x1xf32, #tpu.memory_space<vmem>>, vector<1x1xf32>
    %1044 = vector.broadcast %1043 : vector<1x1xf32> to vector<8x1xf32>
    %1045 = arith.addf %1042, %1044 : vector<8x1xf32>
    %c0_361 = arith.constant 0 : index
    %c0_362 = arith.constant 0 : index
    %1046 = vector.load %arg7[%c0_361, %c0_362] : memref<36x384xf32, #tpu.memory_space<vmem>>, vector<32x384xf32>
    %cst_363 = arith.constant dense<0.000000e+00> : vector<8x384xf32>
    %1047 = tpu.matmul %1040, %1046, %cst_363 {dimension_numbers = #tpu.dot_dimension_numbers<[1], [0], [0], [1], [0, 0, 1, 1], [], []>} : vector<8x32xf32>, vector<32x384xf32>, vector<8x384xf32> -> vector<8x384xf32>
    %c0_364 = arith.constant 0 : index
    %c0_365 = arith.constant 0 : index
    %1048 = vector.load %arg3[%c0_364, %c0_365] : memref<8x4xf32, #tpu.memory_space<vmem>>, vector<8x4xf32>
    %c32_366 = arith.constant 32 : index
    %c0_367 = arith.constant 0 : index
    %1049 = vector.load %arg7[%c32_366, %c0_367] : memref<36x384xf32, #tpu.memory_space<vmem>>, vector<4x384xf32>
    %cst_368 = arith.constant dense<0.000000e+00> : vector<8x384xf32>
    %1050 = tpu.matmul %1048, %1049, %cst_368 {dimension_numbers = #tpu.dot_dimension_numbers<[1], [0], [0], [1], [0, 0, 1, 1], [], []>} : vector<8x4xf32>, vector<4x384xf32>, vector<8x384xf32> -> vector<8x384xf32>
    %1051 = arith.addf %1047, %1050 : vector<8x384xf32>
    %c0_369 = arith.constant 0 : index
    %c0_370 = arith.constant 0 : index
    %1052 = vector.load %arg9[%c0_369, %c0_370] : memref<2x384xf32, #tpu.memory_space<vmem>>, vector<1x384xf32>
    %1053 = vector.broadcast %1052 : vector<1x384xf32> to vector<8x384xf32>
    %1054 = arith.addf %1051, %1053 : vector<8x384xf32>
    %1055 = vector.extract_strided_slice %1054 {offsets = [0, 0], sizes = [8, 32], strides = [1, 1]} : vector<8x384xf32> to vector<8x32xf32>
    %1056 = arith.negf %1055 : vector<8x32xf32>
    %1057 = math.exp %1056 : vector<8x32xf32>
    %cst_371 = arith.constant 1.000000e+00 : f32
    %1058 = vector.broadcast %cst_371 : f32 to vector<8x32xf32>
    %1059 = arith.addf %1058, %1057 : vector<8x32xf32>
    %1060 = arith.divf %1058, %1059 : vector<8x32xf32>
    %1061 = vector.extract_strided_slice %1054 {offsets = [0, 128], sizes = [8, 32], strides = [1, 1]} : vector<8x384xf32> to vector<8x32xf32>
    %1062 = math.tanh %1061 : vector<8x32xf32>
    %1063 = vector.extract_strided_slice %1054 {offsets = [0, 256], sizes = [8, 32], strides = [1, 1]} : vector<8x384xf32> to vector<8x32xf32>
    %1064 = arith.negf %1063 : vector<8x32xf32>
    %1065 = math.exp %1064 : vector<8x32xf32>
    %cst_372 = arith.constant 1.000000e+00 : f32
    %1066 = vector.broadcast %cst_372 : f32 to vector<8x32xf32>
    %1067 = arith.addf %1066, %1065 : vector<8x32xf32>
    %1068 = arith.divf %1066, %1067 : vector<8x32xf32>
    %1069 = arith.mulf %1060, %1062 : vector<8x32xf32>
    %1070 = math.tanh %1069 : vector<8x32xf32>
    %1071 = arith.mulf %1068, %1070 : vector<8x32xf32>
    %c0_373 = arith.constant 0 : index
    %c0_374 = arith.constant 0 : index
    %c0_375 = arith.constant 0 : index
    %1072 = vector.load %arg8[%c0_373, %c0_374, %c0_375] : memref<1x32x384xf32, #tpu.memory_space<vmem>>, vector<1x32x384xf32>
    %1073 = vector.shape_cast %1072 : vector<1x32x384xf32> to vector<32x384xf32>
    %cst_376 = arith.constant dense<0.000000e+00> : vector<8x384xf32>
    %1074 = tpu.matmul %1071, %1073, %cst_376 {dimension_numbers = #tpu.dot_dimension_numbers<[1], [0], [0], [1], [0, 0, 1, 1], [], []>} : vector<8x32xf32>, vector<32x384xf32>, vector<8x384xf32> -> vector<8x384xf32>
    %c1_377 = arith.constant 1 : index
    %c0_378 = arith.constant 0 : index
    %1075 = vector.load %arg9[%c1_377, %c0_378] : memref<2x384xf32, #tpu.memory_space<vmem>>, vector<1x384xf32>
    %1076 = vector.broadcast %1075 : vector<1x384xf32> to vector<8x384xf32>
    %1077 = arith.addf %1074, %1076 : vector<8x384xf32>
    %1078 = vector.extract_strided_slice %1077 {offsets = [0, 0], sizes = [8, 32], strides = [1, 1]} : vector<8x384xf32> to vector<8x32xf32>
    %1079 = arith.negf %1078 : vector<8x32xf32>
    %1080 = math.exp %1079 : vector<8x32xf32>
    %cst_379 = arith.constant 1.000000e+00 : f32
    %1081 = vector.broadcast %cst_379 : f32 to vector<8x32xf32>
    %1082 = arith.addf %1081, %1080 : vector<8x32xf32>
    %1083 = arith.divf %1081, %1082 : vector<8x32xf32>
    %1084 = vector.extract_strided_slice %1077 {offsets = [0, 128], sizes = [8, 32], strides = [1, 1]} : vector<8x384xf32> to vector<8x32xf32>
    %1085 = math.tanh %1084 : vector<8x32xf32>
    %1086 = vector.extract_strided_slice %1077 {offsets = [0, 256], sizes = [8, 32], strides = [1, 1]} : vector<8x384xf32> to vector<8x32xf32>
    %1087 = arith.negf %1086 : vector<8x32xf32>
    %1088 = math.exp %1087 : vector<8x32xf32>
    %cst_380 = arith.constant 1.000000e+00 : f32
    %1089 = vector.broadcast %cst_380 : f32 to vector<8x32xf32>
    %1090 = arith.addf %1089, %1088 : vector<8x32xf32>
    %1091 = arith.divf %1089, %1090 : vector<8x32xf32>
    %1092 = arith.mulf %1083, %1085 : vector<8x32xf32>
    %1093 = math.tanh %1092 : vector<8x32xf32>
    %1094 = arith.mulf %1091, %1093 : vector<8x32xf32>
    %c0_381 = arith.constant 0 : index
    %c0_382 = arith.constant 0 : index
    %1095 = vector.load %arg11[%c0_381, %c0_382] : memref<33x1xf32, #tpu.memory_space<vmem>>, vector<32x1xf32>
    %cst_383 = arith.constant dense<0.000000e+00> : vector<8x1xf32>
    %1096 = tpu.matmul %1094, %1095, %cst_383 {dimension_numbers = #tpu.dot_dimension_numbers<[1], [0], [0], [1], [0, 0, 1, 1], [], []>} : vector<8x32xf32>, vector<32x1xf32>, vector<8x1xf32> -> vector<8x1xf32>
    %c32_384 = arith.constant 32 : index
    %c0_385 = arith.constant 0 : index
    %1097 = vector.load %arg11[%c32_384, %c0_385] : memref<33x1xf32, #tpu.memory_space<vmem>>, vector<1x1xf32>
    %1098 = vector.broadcast %1097 : vector<1x1xf32> to vector<8x1xf32>
    %1099 = arith.addf %1096, %1098 : vector<8x1xf32>
    %cst_386 = arith.constant 1.000000e-01 : f32
    %1100 = vector.broadcast %cst_386 : f32 to vector<8x1xf32>
    %1101 = arith.mulf %1100, %1099 : vector<8x1xf32>
    %1102 = arith.addf %1045, %1101 : vector<8x1xf32>
    %c0_387 = arith.constant 0 : index
    %c0_388 = arith.constant 0 : index
    %1103 = vector.load %arg12[%c0_387, %c0_388] : memref<8x1xf32, #tpu.memory_space<vmem>>, vector<8x1xf32>
    tpu.vector_store %arg12[%c0_387, %c0_388], %1102 {strides = array<i32>} : memref<8x1xf32, #tpu.memory_space<vmem>>, vector<8x1xf32>,
    return
  }
  func.func @transform_0(%arg0: i32) -> (i32, i32) {
    %c0_i32 = arith.constant 0 : i32
    %c0_i32_0 = arith.constant 0 : i32
    return %arg0, %c0_i32 : i32, i32
  }
  func.func @transform_1(%arg0: i32) -> (i32, i32) {
    %c0_i32 = arith.constant 0 : i32
    %c0_i32_0 = arith.constant 0 : i32
    return %arg0, %c0_i32 : i32, i32
  }
  func.func @transform_2(%arg0: i32) -> (i32, i32) {
    %c0_i32 = arith.constant 0 : i32
    %c0_i32_0 = arith.constant 0 : i32
    return %arg0, %c0_i32 : i32, i32
  }
  func.func @transform_3(%arg0: i32) -> (i32, i32) {
    %c0_i32 = arith.constant 0 : i32
    %c0_i32_0 = arith.constant 0 : i32
    %c0_i32_1 = arith.constant 0 : i32
    return %c0_i32, %c0_i32_0 : i32, i32
  }
  func.func @transform_4(%arg0: i32) -> (i32, i32, i32) {
    %c0_i32 = arith.constant 0 : i32
    %c0_i32_0 = arith.constant 0 : i32
    %c0_i32_1 = arith.constant 0 : i32
    %c0_i32_2 = arith.constant 0 : i32
    return %c0_i32, %c0_i32_0, %c0_i32_1 : i32, i32, i32
  }
  func.func @transform_5(%arg0: i32) -> (i32, i32, i32) {
    %c0_i32 = arith.constant 0 : i32
    %c0_i32_0 = arith.constant 0 : i32
    %c0_i32_1 = arith.constant 0 : i32
    %c0_i32_2 = arith.constant 0 : i32
    return %c0_i32, %c0_i32_0, %c0_i32_1 : i32, i32, i32
  }
  func.func @transform_6(%arg0: i32) -> (i32, i32) {
    %c0_i32 = arith.constant 0 : i32
    %c0_i32_0 = arith.constant 0 : i32
    %c0_i32_1 = arith.constant 0 : i32
    return %c0_i32, %c0_i32_0 : i32, i32
  }
  func.func @transform_7(%arg0: i32) -> (i32, i32, i32) {
    %c0_i32 = arith.constant 0 : i32
    %c0_i32_0 = arith.constant 0 : i32
    %c0_i32_1 = arith.constant 0 : i32
    %c0_i32_2 = arith.constant 0 : i32
    return %c0_i32, %c0_i32_0, %c0_i32_1 : i32, i32, i32
  }
  func.func @transform_8(%arg0: i32) -> (i32, i32) {
    %c0_i32 = arith.constant 0 : i32
    %c0_i32_0 = arith.constant 0 : i32
    %c0_i32_1 = arith.constant 0 : i32
    return %c0_i32, %c0_i32_0 : i32, i32
  }
  func.func @transform_9(%arg0: i32) -> (i32, i32) {
    %c0_i32 = arith.constant 0 : i32
    %c0_i32_0 = arith.constant 0 : i32
    %c0_i32_1 = arith.constant 0 : i32
    return %c0_i32, %c0_i32_0 : i32, i32
  }
  func.func @transform_10(%arg0: i32) -> (i32, i32) {
    %c0_i32 = arith.constant 0 : i32
    %c0_i32_0 = arith.constant 0 : i32
    %c0_i32_1 = arith.constant 0 : i32
    return %c0_i32, %c0_i32_0 : i32, i32
  }
  func.func @transform_11(%arg0: i32) -> (i32, i32) {
    %c0_i32 = arith.constant 0 : i32
    %c0_i32_0 = arith.constant 0 : i32
    return %arg0, %c0_i32 : i32, i32
  }
}

</mosaic_0001>

<bundles_post_ra>
// kernel: tpu_custom_call.1
= control target key start
LH: loop header
LB: loop body
LE: loop exit
PB: predicated region body
PF: predicated region fallthrough
CT: control target
= control target key end

     0   :  { %16 = vsyncpa [#allocation4], 0  ;;  %s9959_s0 = inlined_call_operand.hbm [shape: f32[8,12], index: 0, kind: input, shape index: {}]   ;;  %s9960_s1 = inlined_call_operand.vmem [shape: s32[8,1], index: 1, kind: input, shape index: {}]   ;;  %s9961_s2 = inlined_call_operand.vmem [shape: f32[8,4], index: 2, kind: input, shape index: {}]   ;;  %s9962_s3 = inlined_call_operand.hbm [shape: f32[5,384], index: 3, kind: input, shape index: {}]   ;;  %s9963_s4 = inlined_call_operand.hbm [shape: f32[2,32,384], index: 4, kind: input, shape index: {}]   ;;  %s9964_s5 = inlined_call_operand.hbm [shape: f32[1,32,384], index: 5, kind: input, shape index: {}]   ;;  %s9965_s6 = inlined_call_operand.vmem [shape: f32[36,384], index: 6, kind: input, shape index: {}]   ;;  %s9966_s7 = inlined_call_operand.hbm [shape: f32[1,32,384], index: 7, kind: input, shape index: {}]   ;;  %s9967_s8 = inlined_call_operand.vmem [shape: f32[2,384], index: 8, kind: input, shape index: {}]   ;;  %s9968_s9 = inlined_call_operand.vmem [shape: f32[33,1], index: 9, kind: input, shape index: {}]   ;;  %s9969_s10 = inlined_call_operand.vmem [shape: f32[33,1], index: 10, kind: input, shape index: {}]   ;;  %s9970_s11 = inlined_call_operand.vmem [shape: f32[8,1], index: 11, kind: output, shape index: {}]  }
   0x1   :  { %17 = vsyncpa [#allocation6], 0 }
   0x2   :  { %18 = vsyncpa [#allocation9], 0  ;;  %s8701_s17 = smov [#allocation5]   ;;  %s8585_s21 = scalar_lea.hbm %s9962_s3, 384 }
   0x3   :  { %s39_s18 = sshll.u32 %s8701_s17, 4  ;;  %p8586_p0 = scmp.ne.s32.totalorder %s9962_s3, %s8585_s21  ;;  %s40_s18 = int_to_ptr.vmem [resolvable:$true] %s39_s18 }
   0x4   :  { %p8589_p1 = scmp.lt.u32.totalorder %s8585_s21, %s9962_s3 }
   0x6   :  { %p8591_p2 = pnand %p8589_p1, %p8586_p0 }
   0x8   :  { %8594 = shalt.err (!%p8591_p2)
}
   0x9   :  { %s8595_s26 = scalar_lea.vmem %s40_s18, 384  ;;  %p8600_p4 = scmp.lt.s32.totalorder %s40_s18, %s40_s18 }
   0xa   :  { %p8596_p3 = scmp.ne.s32.totalorder %s40_s18, %s8595_s26  ;;  %p8601_p5 = scmp.lt.s32.totalorder %s8595_s26, %s8595_s26 }
   0xc   :  { %p8602_p6 = por %p8601_p5, %p8600_p4 }
   0xe   :  { %p8603_p7 = pnand %p8602_p6, %p8596_p3 }
  0x10   :  { %8606 = shalt.err (!%p8603_p7)
}
  0x11   :  { %42 = dma.hbm_to_vmem [thread:$0]  %s9962_s3, 384, %s40_s18, [#allocation6]  }
  0x12   :  { %s8702_s29 = smov [#allocation8]   ;;  %s8703_s12 = smov [#allocation3]  }
  0x13   :  { %s60_s30 = sshll.u32 %s8702_s29, 4  ;;  %s25_s13 = sshll.u32 %s8703_s12, 4  ;;  %s61_s30 = int_to_ptr.vmem [resolvable:$true] %s60_s30  ;;  %s26_s13 = int_to_ptr.vmem [resolvable:$true] %s25_s13 }
  0x14   :  { %s8607_s16 = scalar_lea.hbm %s9964_s5, 1536 }
  0x15   :  { %p8608_p8 = scmp.ne.s32.totalorder %s9964_s5, %s8607_s16  ;;  %p8611_p9 = scmp.lt.u32.totalorder %s8607_s16, %s9964_s5 }
  0x17   :  { %p8613_p10 = pnand %p8611_p9, %p8608_p8 }
  0x19   :  { %8616 = shalt.err (!%p8613_p10)
}
  0x1a   :  { %s8617_s3 = scalar_lea.vmem %s61_s30, 1536  ;;  %p8622_p12 = scmp.lt.s32.totalorder %s61_s30, %s61_s30 }
  0x1b   :  { %p8618_p11 = scmp.ne.s32.totalorder %s61_s30, %s8617_s3  ;;  %p8623_p13 = scmp.lt.s32.totalorder %s8617_s3, %s8617_s3 }
  0x1d   :  { %p8624_p0 = por %p8623_p13, %p8622_p12 }
  0x1f   :  { %p8625_p1 = pnand %p8624_p0, %p8618_p11 }
  0x21   :  { %8628 = shalt.err (!%p8625_p1)
}
  0x22   :  { %s8704_s18 = smov 384   ;;  %s8705_s22 = smov 24  }
  0x23   :  { %66 = dma.hbm_to_vmem [thread:$0]  %s9964_s5, 1536, %s61_s30, [#allocation9], %s8704_s18, %s8704_s18, %s8705_s22  }
  0x24   :  { %s8629_s27 = scalar_lea.hbm %s9959_s0, 128 }
  0x25   :  { %p8630_p2 = scmp.ne.s32.totalorder %s9959_s0, %s8629_s27  ;;  %p8633_p3 = scmp.lt.u32.totalorder %s8629_s27, %s9959_s0 }
  0x27   :  { %p8635_p4 = pnand %p8633_p3, %p8630_p2 }
  0x29   :  { %8638 = shalt.err (!%p8635_p4)
}
  0x2a   :  { %s8639_s15 = scalar_lea.vmem %s26_s13, 128  ;;  %p8644_p6 = scmp.lt.s32.totalorder %s26_s13, %s26_s13 }
  0x2b   :  { %p8640_p5 = scmp.ne.s32.totalorder %s26_s13, %s8639_s15  ;;  %p8645_p7 = scmp.lt.s32.totalorder %s8639_s15, %s8639_s15 }
  0x2d   :  { %p8646_p8 = por %p8645_p7, %p8644_p6 }
  0x2f   :  { %p8647_p9 = pnand %p8646_p8, %p8640_p5 }
  0x31   :  { %8650 = shalt.err (!%p8647_p9)
}
  0x32   :  { %28 = dma.hbm_to_vmem [thread:$0]  %s9959_s0, 128, %s26_s13, [#allocation4]  }
  0x33   :  { %s8706_s16 = smov [#allocation7]   ;;  %s8707_s19 = smov [#allocation10]  }
  0x34   :  { %s48_s17 = sshll.u32 %s8706_s16, 4  ;;  %s74_s20 = sshll.u32 %s8707_s19, 4  ;;  %s49_s17 = int_to_ptr.vmem [resolvable:$true] %s48_s17  ;;  %s75_s20 = int_to_ptr.vmem [resolvable:$true] %s74_s20 }
  0x35   :  { %s8651_s23 = scalar_lea.hbm %s9963_s4, 3072 }
  0x36   :  { %p8652_p10 = scmp.ne.s32.totalorder %s9963_s4, %s8651_s23  ;;  %p8655_p11 = scmp.lt.u32.totalorder %s8651_s23, %s9963_s4 }
  0x38   :  { %p8657_p12 = pnand %p8655_p11, %p8652_p10 }
  0x3a   :  { %8660 = shalt.err (!%p8657_p12)
}
  0x3b   :  { %s8661_s0 = scalar_lea.vmem %s49_s17, 3072  ;;  %p8666_p0 = scmp.lt.s32.totalorder %s49_s17, %s49_s17 }
  0x3c   :  { %p8662_p13 = scmp.ne.s32.totalorder %s49_s17, %s8661_s0  ;;  %p8667_p1 = scmp.lt.s32.totalorder %s8661_s0, %s8661_s0 }
  0x3e   :  { %p8668_p2 = por %p8667_p1, %p8666_p0 }
  0x40   :  { %p8669_p3 = pnand %p8668_p2, %p8662_p13 }
  0x42   :  { %8672 = shalt.err (!%p8669_p3)
}
  0x43   :  { %54 = dma.hbm_to_vmem [thread:$0]  %s9963_s4, 3072, %s49_s17, [#allocation6], %s8704_s18, %s8704_s18, %s8705_s22  }
  0x44   :  { %s8673_s14 = scalar_lea.hbm %s9966_s7, 1536 }
  0x45   :  { %p8674_p4 = scmp.ne.s32.totalorder %s9966_s7, %s8673_s14  ;;  %p8677_p5 = scmp.lt.u32.totalorder %s8673_s14, %s9966_s7 }
  0x47   :  { %p8679_p6 = pnand %p8677_p5, %p8674_p4 }
  0x49   :  { %8682 = shalt.err (!%p8679_p6)
}
  0x4a   :  { %s8683_s19 = scalar_lea.vmem %s75_s20, 1536  ;;  %p8688_p8 = scmp.lt.s32.totalorder %s75_s20, %s75_s20 }
  0x4b   :  { %p8684_p7 = scmp.ne.s32.totalorder %s75_s20, %s8683_s19  ;;  %p8689_p9 = scmp.lt.s32.totalorder %s8683_s19, %s8683_s19 }
  0x4d   :  { %p8690_p10 = por %p8689_p9, %p8688_p8 }
  0x4f   :  { %p8691_p11 = pnand %p8690_p10, %p8684_p7 }
  0x51   :  { %8694 = shalt.err (!%p8691_p11)
}
  0x52   :  { %80 = dma.hbm_to_vmem [thread:$0]  %s9966_s7, 1536, %s75_s20, [#allocation9], %s8704_s18, %s8704_s18, %s8705_s22  }
  0x53   :  { %8695 = dma.done.wait [#allocation4], 128  }
  0x54   :  { %8696 = vsyncadd [#allocation4], 4294967168 }
  0x55   :  { %8697 = dma.done.wait [#allocation6], 3456  }
  0x56   :  { %8698 = vsyncadd [#allocation6], 4294963840 }
  0x57   :  { %8699 = dma.done.wait [#allocation9], 3072  }
  0x58   :  { %8700 = vsyncadd [#allocation9], 4294964224  ;;  %v8708_v0 = vmov 0   ;;  %v8709_v1 = vmov 0.0   ;;  %v8710_v2 = vmov 0.0|0.0   ;;  %vm8711_vm0 = vmmov 0  }
  0x59   :  { %8300 = vset.pattern.permute.xlu0 %v8708_v0  ;;  %419 = vmatprep.mubr.f32.mxu0 %v8709_v1  ;;  %v103_v3 = vld [vmem:[%s9960_s1] sm:$0xff]  ;;  %v322_v4 = vld [vmem:[#allocation7 + $0x8] sm:$0xff]  ;;  %v324_v8 = vld [vmem:[#allocation7 + $0x18] sm:$0xff]  ;;  %v8712_v23 = vmov 1   ;;  %v104_v24 = vlaneseq  ;;  %v8713_v34 = vmov 3   ;;  %v8714_v46 = vmov 2  }
  0x5a   :  { %7668 = vmatprep.subr.bf16.mxu1 %v8710_v2  ;;  %7223 = vmatprep.mubr.msk.f32.mxu1 %vm8711_vm0, %v8709_v1  ;;  %v325_v5 = vld [vmem:[#allocation7 + $0x20] sm:$0xff]  ;;  %v328_v9 = vld [vmem:[#allocation7 + $0x38] sm:$0xff]  ;;  %v331_v11 = vld [vmem:[#allocation7 + $0x50] sm:$0xff]  ;;  %v8715_v47 = vmov 4   ;;  %v8716_v52 = vmov 6   ;;  %v8717_v53 = vmov 7  }
  0x5b   :  { %8301 = vset.pattern.permute.xlu1 %v8708_v0  ;;  %107 = vperm.xlu0 %8300, %v103_v3   ;;  %v8859_v6 = vpack.c.bf16 %v325_v5, %v322_v4  ;;  %v321_v7 = vld [vmem:[#allocation7] sm:$0xff]  ;;  %v327_v12 = vld [vmem:[#allocation7 + $0x30] sm:$0xff]  ;;  %v330_v13 = vld [vmem:[#allocation7 + $0x48] sm:$0xff]  ;;  %v8864_v14 = vpack.c.bf16 %v331_v11, %v328_v9  ;;  %v105_v25 = vand.u32 127, %v104_v24  ;;  %v8718_v54 = vmov 9  }
  0x5c   :  { %v8861_v10 = vpack.c.bf16 %v324_v8, %v321_v7  ;;  %v8866_v15 = vld [vmem:[#allocation3] sm:$0xff]  ;;  %v323_v16 = vld [vmem:[#allocation7 + $0x10] sm:$0xff]  ;;  %v326_v17 = vld [vmem:[#allocation7 + $0x28] sm:$0xff]  ;;  %v8869_v18 = vpack.c.bf16 %v330_v13, %v327_v12  ;;  %v8719_v55 = vmov 5   ;;  %v8720_v56 = vmov 10  }
  0x5d   :  { %7661 = vmatprep.subr.bf16.mxu0 %v8859_v6  ;;  %v8871_v19 = vpack.c.bf16 %v326_v17, %v323_v16  ;;  %v329_v20 = vld [vmem:[#allocation7 + $0x40] sm:$0xff]  ;;  %v332_v21 = vld [vmem:[#allocation7 + $0x58] sm:$0xff]  ;;  %v519_v28 = vld [vmem:[#allocation8 + $0x8] sm:$0xff]  ;;  %v8721_v57 = vmov 11   ;;  %v8722_v58 = vmov 8   ;;  %v120_v59 = vshrl.u32 %v104_v24, 7 }
  0x5e   :  { %7663 = vmatpush1.bf16.msra.mxu0 %v8861_v10  ;;  %v8876_v22 = vpack.c.bf16 %v332_v21, %v329_v20  ;;  %v522_v29 = vld [vmem:[#allocation8 + $0x20] sm:$0xff]  ;;  %v521_v32 = vld [vmem:[#allocation8 + $0x18] sm:$0xff]  ;;  %v520_v33 = vld [vmem:[#allocation8 + $0x10] sm:$0xff]  ;;  %vm351_vm3 = vcmask 261120   ;;  %vm6268_vm15 = vcmask 1043456  }
  0x5f   :  { %7665 = vmatprep.subr.bf16.mxu0 %v8864_v14  ;;  %115 = vperm.xlu0 %8300, %v8866_v15   ;;  %v8892_v30 = vpack.c.bf16 %v522_v29, %v519_v28  ;;  %v518_v31 = vld [vmem:[#allocation8] sm:$0xff]  ;;  %v523_v35 = vld [vmem:[#allocation8 + $0x28] sm:$0xff]  ;;  %v525_v38 = vld [vmem:[#allocation8 + $0x38] sm:$0xff]  ;;  %v8937_v60 = vsub.s32 0, %v120_v59  ;;  %v8939_v62 = vsub.s32 1, %v120_v59 }
  0x60   :  { %7670 = vmatpush3.bf16.msra.mxu1 %v8871_v19  ;;  %v8896_v36 = vpack.c.bf16 %v521_v32, %v518_v31  ;;  %v8898_v37 = vpack.c.bf16 %v523_v35, %v520_v33  ;;  %v528_v39 = vld [vmem:[#allocation8 + $0x50] sm:$0xff]  ;;  %v527_v42 = vld [vmem:[#allocation8 + $0x48] sm:$0xff]  ;;  %v526_v43 = vld [vmem:[#allocation8 + $0x40] sm:$0xff]  ;;  %v8965_v33 = vsub.s32 2, %v120_v59 }
  0x61   :  { %7671 = vmatprep.subr.bf16.mxu1 %v8710_v2  ;;  %v8903_v40 = vpack.c.bf16 %v528_v39, %v525_v38  ;;  %v524_v41 = vld [vmem:[#allocation8 + $0x30] sm:$0xff]  ;;  %v529_v45 = vld [vmem:[#allocation8 + $0x58] sm:$0xff]  ;;  %v694_v49 = vld [vmem:[#allocation7 + $0x68] sm:$0xff] }
  0x62   :  { %7667 = vmatpush1.bf16.msra.mxu0 %v8869_v18  ;;  %v8906_v44 = vpack.c.bf16 %v527_v42, %v524_v41  ;;  %v8908_v48 = vpack.c.bf16 %v529_v45, %v526_v43  ;;  %v697_v50 = vld [vmem:[#allocation7 + $0x80] sm:$0xff]  ;;  %v110_v61 = vld [vmem:[#allocation5] ss:$8 sm:$0x7] }
  0x63   :  { %8303 = vset.pattern.permute.xlu0 %v8712_v23  ;;  %7675 = vmatprep.subr.bf16.mxu0 %v8892_v30  ;;  %v8914_v51 = vpack.c.bf16 %v697_v50, %v694_v49  ;;  %v8942_v63 = vrot.slane %v110_v61, %v8937_v60  ;;  %v334_v3 = vld [vmem:[#allocation5 + $0x3] ss:$8 sm:$0x7]  ;;  %v8945_v5 = vrot.slane %v110_v61, %v8939_v62 }
  0x64   :  { %7673 = vmatpush3.bf16.msra.mxu1 %v8876_v22  ;;  %v8951_v8 = vrot.slane %v334_v3, %v8937_v60  ;;  %v8955_v11 = vrot.slane %v334_v3, %v8939_v62  ;;  %v8971_v35 = vrot.slane %v334_v3, %v8965_v33  ;;  %v703_v3 = vld [vmem:[#allocation7 + $0xb0] sm:$0xff] }
  0x65   :  { %420 = vmatmul.mubr.f32.vlgmr.msra.gmra.mrb[0].mxu0 %v8709_v1  ;;  %7682 = vmatprep.subr.bf16.mxu1 %v8710_v2 }
  0x66   :  { %615 = vmatprep.mubr.f32.mxu0 %v8709_v1  ;;  %7677 = vmatpush1.bf16.msra.mxu0 %v8896_v36 }
  0x67   :  { %7224 = vmatmul.mubr.f32.vlgmr.msra.gmra.mrb[0].mxu1 %v8709_v1  ;;  %7679 = vmatprep.subr.bf16.mxu0 %v8903_v40 }
  0x68   :  { %7234 = vmatprep.mubr.msk.f32.mxu1 %vm8711_vm0, %v8709_v1  ;;  %7684 = vmatpush3.bf16.msra.mxu1 %v8898_v37 }
  0x69   :  { %7685 = vmatprep.subr.bf16.mxu1 %v8710_v2 }
  0x6a   :  { %7681 = vmatpush1.bf16.msra.mxu0 %v8906_v44 }
  0x6b   :  { %7689 = vmatprep.subr.bf16.mxu0 %v8914_v51 }
  0x6c   :  { %7687 = vmatpush3.bf16.msra.mxu1 %v8908_v48 }
  0x6d   :  { %7696 = vmatprep.subr.bf16.mxu1 %v8710_v2 }
  0xda   :  { %v108_v26 = vpop.permute.xlu0 %107 }
  0xdb   :  { %vm109_vm1 = vcmp.lt.s32.totalorder %v105_v25, %v108_v26 }
  0xdc   :  { %v8888_v27 = vsel %vm109_vm1, 1, %v8708_v0  ;;  %v112_v0 = vld [vmem:[#allocation5 + $0x1] ss:$8 sm:$0x7]  ;;  %vm6264_vm1 = vcmask 31744  }
  0xdd   :  { %315 = vperm.xlu1 %8301, %v8888_v27   ;;  %887 = vperm.xlu0 %8303, %v8888_v27   ;;  %v8948_v7 = vrot.slane %v112_v0, %v8937_v60  ;;  %v8958_v12 = vrot.slane %v112_v0, %v8939_v62  ;;  %v8974_v39 = vrot.slane %v112_v0, %v8965_v33  ;;  %v700_v0 = vld [vmem:[#allocation7 + $0x98] sm:$0xff] }
  0xde   :  { %v116_v4 = vpop.permute.xlu0 %115 }
  0xdf   :  { %v134_v9 = vmul.f32 %v8942_v63, %v116_v4  ;;  %v135_v13 = vmul.f32 %v8945_v5, %v116_v4 }
  0xe1   :  { %8302 = vset.pattern.permute.xlu1 %v8712_v23  ;;  %8305 = vset.pattern.permute.xlu0 %v8713_v34  ;;  %v153_v16 = vadd.f32 %v8948_v7, %v134_v9  ;;  %v154_v26 = vadd.f32 %v8958_v12, %v135_v13 }
  0xe2   :  { %160 = vperm.xlu1 %8302, %v8866_v15   ;;  %188 = vperm.xlu0 %8305, %v8866_v15  }
  0xe6   :  { %8304 = vset.pattern.permute.xlu1 %v8714_v46  ;;  %8308 = vset.pattern.permute.xlu0 %v8715_v47 }
  0xe7   :  { %174 = vperm.xlu1 %8304, %v8866_v15   ;;  %2327 = vperm.xlu0 %8308, %v8888_v27  }
  0xeb   :  { %1367 = vperm.xlu1 %8304, %v8888_v27   ;;  %8310 = vset.pattern.permute.xlu0 %v8716_v52 }
  0xec   :  { %230 = vperm.xlu0 %8310, %v8866_v15  }
  0xef   :  { %8306 = vset.pattern.permute.xlu1 %v8713_v34  ;;  %v8968_v34 = vrot.slane %v110_v61, %v8965_v33 }
  0xf0   :  { %1847 = vperm.xlu1 %8306, %v8888_v27   ;;  %8313 = vset.pattern.permute.xlu0 %v8717_v53 }
  0xf1   :  { %3767 = vperm.xlu0 %8313, %v8888_v27   ;;  %v136_v41 = vmul.f32 %v8968_v34, %v116_v4 }
  0xf3   :  { %v155_v46 = vadd.f32 %v8974_v39, %v136_v41 }
  0xf4   :  { %8307 = vset.pattern.permute.xlu1 %v8715_v47 }
  0xf5   :  { %202 = vperm.xlu1 %8307, %v8866_v15   ;;  %8315 = vset.pattern.permute.xlu0 %v8718_v54 }
  0xf6   :  { %272 = vperm.xlu0 %8315, %v8866_v15  }
  0xf9   :  { %8309 = vset.pattern.permute.xlu1 %v8719_v55  ;;  %v696_v55 = vld [vmem:[#allocation7 + $0x78] sm:$0xff] }
  0xfa   :  { %216 = vperm.xlu1 %8309, %v8866_v15   ;;  %8318 = vset.pattern.permute.xlu0 %v8720_v56 }
  0xfb   :  { %5207 = vperm.xlu0 %8318, %v8888_v27  }
  0xfe   :  { %2807 = vperm.xlu1 %8309, %v8888_v27  }
  0xff   :  { %8320 = vset.pattern.permute.xlu0 %v8721_v57 }
 0x102   :  { %8311 = vset.pattern.permute.xlu1 %v8716_v52 }
 0x103   :  { %3287 = vperm.xlu1 %8311, %v8888_v27  }
 0x107   :  { %8312 = vset.pattern.permute.xlu1 %v8717_v53  ;;  %v693_v53 = vld [vmem:[#allocation7 + $0x60] sm:$0xff] }
 0x108   :  { %244 = vperm.xlu1 %8312, %v8866_v15   ;;  %v8982_v9 = vpack.c.bf16 %v696_v55, %v693_v53 }
 0x10c   :  { %8314 = vset.pattern.permute.xlu1 %v8722_v58 }
 0x10d   :  { %258 = vperm.xlu1 %8314, %v8866_v15  }
 0x111   :  { %4247 = vperm.xlu1 %8314, %v8888_v27  }
 0x115   :  { %8316 = vset.pattern.permute.xlu1 %v8718_v54 }
 0x116   :  { %4727 = vperm.xlu1 %8316, %v8888_v27  }
 0x11a   :  { %8317 = vset.pattern.permute.xlu1 %v8720_v56  ;;  %v695_v56 = vld [vmem:[#allocation7 + $0x70] sm:$0xff] }
 0x11b   :  { %286 = vperm.xlu1 %8317, %v8866_v15  }
 0x11f   :  { %8319 = vset.pattern.permute.xlu1 %v8721_v57  ;;  %v698_v57 = vld [vmem:[#allocation7 + $0x88] sm:$0xff] }
 0x120   :  { %300 = vperm.xlu1 %8319, %v8866_v15   ;;  %v8984_v13 = vpack.c.bf16 %v698_v57, %v695_v56 }
 0x124   :  { %5687 = vperm.xlu1 %8319, %v8888_v27  }
 0x138   :  { %v421_v15 = vpop.f32.mrb[0].mxu0 }
 0x139   :  { %v422_v17 = vadd.f32 %v421_v15, %v8951_v8  ;;  %v423_v20 = vpop.f32.mrb[1].mxu0  ;;  %v699_v15 = vld [vmem:[#allocation7 + $0x90] sm:$0xff] }
 0x13a   :  { %v424_v21 = vadd.f32 %v423_v20, %v8955_v11  ;;  %v492_v23 = vpop.f32.mrb[0].mxu1  ;;  %v701_v20 = vld [vmem:[#allocation7 + $0xa0] sm:$0xff] }
 0x13b   :  { %v496_v24 = vadd.f32 %v422_v17, %v153_v16  ;;  %v7225_v25 = vpop.f32.mrb[1].mxu1  ;;  %v493_v43 = vadd.f32 %v492_v23, %v8971_v35  ;;  %v8986_v16 = vpack.c.bf16 %v703_v3, %v700_v0  ;;  %v702_v17 = vld [vmem:[#allocation7 + $0xa8] sm:$0xff] }
 0x13c   :  { %v503_v28 = vadd.f32 %v424_v21, %v154_v26  ;;  %v704_v21 = vld [vmem:[#allocation7 + $0xb8] sm:$0xff] }
 0x13d   :  { %v6879_v27 = vmul.f32 -1.442695, %v496_v24  ;;  %v8998_v24 = vpack.c.bf16 %v702_v17, %v699_v15  ;;  %v9000_v25 = vpack.c.bf16 %v704_v21, %v701_v20  ;;  %v706_v26 = vld [vmem:[#allocation5 + $0x4] ss:$8 sm:$0x7] }
 0x13e   :  { %v6880_v29 = vmul.f32 -1.442695, %v503_v28  ;;  %v715_v41 = vrot.slane %v706_v26, %v8939_v62 }
 0x13f   :  { %8321 = vpow2.f32 %v6879_v27  ;;  %v531_v27 = vld [vmem:[#allocation5 + $0x2] ss:$8 sm:$0x7] }
 0x140   :  { %8323 = vpow2.f32 %v6880_v29  ;;  %v536_v29 = vrot.slane %v531_v27, %v8937_v60 }
 0x149   :  { %v8322_v31 = vpop.eup %8321 }
 0x14a   :  { %v500_v32 = vadd.f32 1.0, %v8322_v31  ;;  %v8324_v38 = vpop.eup %8323  ;;  %v711_v31 = vrot.slane %v706_v26, %v8937_v60 }
 0x14b   :  { %v507_v42 = vadd.f32 1.0, %v8324_v38  ;;  %v540_v38 = vrot.slane %v531_v27, %v8939_v62 }
 0x14c   :  { %8325 = vrcp.f32 %v500_v32 }
 0x14d   :  { %8327 = vrcp.f32 %v507_v42  ;;  %v9043_v42 = vadd.f32 %v711_v31, %v536_v29 }
 0x156   :  { %v8326_v45 = vpop.eup %8325 }
 0x157   :  { %v510_v47 = vmul.f32 %v8326_v45, %v493_v43  ;;  %v8328_v50 = vpop.eup %8327  ;;  %v9045_v43 = vadd.f32 %v715_v41, %v540_v38 }
 0x158   :  { %v513_v52 = vsub.f32 1.0, %v8328_v50  ;;  %v515_v61 = vmul.f32 0.0, %v8328_v50 }
 0x159   :  { %v511_v49 = vadd.f32 %v510_v47, %v155_v46 }
 0x15b   :  { %8329 = vtanh.f32 %v511_v49 }
 0x15c   :  { %v8979_v58 = vpop.permute.xlu1 %315 }
 0x15d   :  { %vm317_vm2 = vcmp.eq.s32.totalorder %v8979_v58, 1 }
 0x165   :  { %v8330_v54 = vpop.eup %8329 }
 0x166   :  { %v514_v59 = vmul.f32 %v8330_v54, %v513_v52  ;;  %v161_v52 = vpop.permute.xlu1 %160 }
 0x167   :  { %v163_v53 = vmul.f32 %v161_v52, %v8942_v63  ;;  %v164_v56 = vmul.f32 %v161_v52, %v8945_v5 }
 0x168   :  { %v516_v4 = vadd.f32 %v515_v61, %v514_v59 }
 0x169   :  { %v166_v57 = vadd.f32 %v163_v53, %v8948_v7  ;;  %v167_v17 = vadd.f32 %v164_v56, %v8958_v12 }
 0x16a   :  { %v8990_v23 = vsel %vm317_vm2, %v516_v4, 0.0 }
 0x16b   :  { %6881 = vmatmul.mubr.msk.f32.vlgmr.msra.gmra.mrb[2].mxu0 %vm351_vm3, %v8990_v23  ;;  %7235 = vmatmul.mubr.msk.f32.vlgmr.msra.gmra.mrb[2].mxu1 %vm351_vm3, %v8990_v23 }
 0x16c   :  { %7691 = vmatpush1.bf16.msra.mxu0 %v8982_v9  ;;  %7698 = vmatpush3.bf16.msra.mxu1 %v8984_v13 }
 0x16d   :  { %7693 = vmatprep.subr.bf16.mxu0 %v8986_v16  ;;  %7699 = vmatprep.subr.bf16.mxu1 %v8710_v2 }
 0x16e   :  { %787 = vmatprep.mubr.f32.mxu0 %v8709_v1  ;;  %7245 = vmatprep.mubr.msk.f32.mxu1 %vm8711_vm0, %v8709_v1 }
 0x170   :  { %7695 = vmatpush1.bf16.msra.mxu0 %v8998_v24  ;;  %7701 = vmatpush3.bf16.msra.mxu1 %v9000_v25 }
 0x171   :  { %7703 = vmatprep.subr.bf16.mxu0 %v8859_v6  ;;  %7710 = vmatprep.subr.bf16.mxu1 %v8710_v2 }
 0x173   :  { %788 = vmatmul.mubr.f32.vlgmr.msra.gmra.mrb[2].mxu0 %v8709_v1  ;;  %7246 = vmatmul.mubr.f32.vlgmr.msra.gmra.mrb[4].mxu1 %v8709_v1 }
 0x174   :  { %7705 = vmatpush1.bf16.msra.mxu0 %v8861_v10  ;;  %7712 = vmatpush3.bf16.msra.mxu1 %v8871_v19 }
 0x175   :  { %7707 = vmatprep.subr.bf16.mxu0 %v8864_v14  ;;  %7713 = vmatprep.subr.bf16.mxu1 %v8710_v2 }
 0x176   :  { %957 = vmatprep.mubr.f32.mxu0 %v8709_v1  ;;  %7256 = vmatprep.mubr.msk.f32.mxu1 %vm8711_vm0, %v8709_v1 }
 0x178   :  { %7709 = vmatpush1.bf16.msra.mxu0 %v8869_v18  ;;  %7715 = vmatpush3.bf16.msra.mxu1 %v8876_v22 }
 0x179   :  { %7717 = vmatprep.subr.bf16.mxu0 %v8892_v30  ;;  %7724 = vmatprep.subr.bf16.mxu1 %v8710_v2 }
 0x17b   :  { %6885 = vmatmul.mubr.msk.f32.vlgmr.msra.gmra.mrb[4].mxu0 %vm351_vm3, %v8990_v23  ;;  %7257 = vmatmul.mubr.msk.f32.vlgmr.msra.gmra.mrb[6].mxu1 %vm351_vm3, %v8990_v23 }
 0x17c   :  { %7719 = vmatpush1.bf16.msra.mxu0 %v8896_v36  ;;  %7726 = vmatpush3.bf16.msra.mxu1 %v8898_v37 }
 0x17d   :  { %7721 = vmatprep.subr.bf16.mxu0 %v8903_v40  ;;  %7727 = vmatprep.subr.bf16.mxu1 %v8710_v2 }
 0x17e   :  { %1123 = vmatprep.mubr.f32.mxu0 %v8709_v1  ;;  %7267 = vmatprep.mubr.msk.f32.mxu1 %vm8711_vm0, %v8709_v1 }
 0x180   :  { %7723 = vmatpush1.bf16.msra.mxu0 %v8906_v44  ;;  %7729 = vmatpush3.bf16.msra.mxu1 %v8908_v48 }
 0x181   :  { %7731 = vmatprep.subr.bf16.mxu0 %v8914_v51  ;;  %7738 = vmatprep.subr.bf16.mxu1 %v8710_v2 }
 0x23e   :  { %v688_v28 = vpop.f32.mrb[2].mxu1 }
 0x23f   :  { %v7236_v32 = vpop.f32.mrb[3].mxu1 }
 0x246   :  { %v789_v45 = vpop.f32.mrb[2].mxu0  ;;  %v860_v46 = vpop.f32.mrb[4].mxu1 }
 0x247   :  { %v8205_v47 = vadd.f32 %v9043_v42, %v789_v45  ;;  %v791_v49 = vpop.f32.mrb[3].mxu0  ;;  %v7247_v50 = vpop.f32.mrb[5].mxu1  ;;  %v9056_v45 = vrot.slane %v706_v26, %v8965_v33  ;;  %v165_v26 = vmul.f32 %v161_v52, %v8968_v34 }
 0x248   :  { %v8207_v55 = vadd.f32 %v9045_v43, %v791_v49  ;;  %v9059_v50 = vrot.slane %v531_v27, %v8965_v33 }
 0x249   :  { %v6883_v54 = vmul.f32 -1.442695, %v8205_v47 }
 0x24a   :  { %v6884_v59 = vmul.f32 -1.442695, %v8207_v55 }
 0x24b   :  { %8331 = vpow2.f32 %v6883_v54  ;;  %v861_v54 = vadd.f32 %v860_v46, %v9056_v45 }
 0x24c   :  { %8333 = vpow2.f32 %v6884_v59 }
 0x24e   :  { %v959_v61 = vpop.f32.mrb[4].mxu0  ;;  %v1030_v0 = vpop.f32.mrb[6].mxu1 }
 0x24f   :  { %v960_v3 = vadd.f32 %v959_v61, %v8951_v8  ;;  %v961_v4 = vpop.f32.mrb[5].mxu0  ;;  %v7258_v15 = vpop.f32.mrb[7].mxu1 }
 0x250   :  { %v962_v20 = vadd.f32 %v961_v4, %v8955_v11  ;;  %v1031_v15 = vadd.f32 %v1030_v0, %v8971_v35  ;;  %v9067_v0 = vpop.permute.xlu0 %887 }
 0x251   :  { %v1034_v21 = vadd.f32 %v960_v3, %v166_v57  ;;  %v689_v57 = vadd.f32 %v688_v28, %v9059_v50  ;;  %vm889_vm4 = vcmp.eq.s32.totalorder %v9067_v0, 1 }
 0x252   :  { %v1041_v31 = vadd.f32 %v962_v20, %v167_v17  ;;  %v168_v20 = vadd.f32 %v165_v26, %v8974_v39 }
 0x253   :  { %v6887_v29 = vmul.f32 -1.442695, %v1034_v21 }
 0x254   :  { %v6888_v41 = vmul.f32 -1.442695, %v1041_v31 }
 0x255   :  { %v8332_v32 = vpop.eup %8331  ;;  %8335 = vpow2.f32 %v6887_v29 }
 0x256   :  { %v868_v38 = vadd.f32 1.0, %v8332_v32  ;;  %v8334_v47 = vpop.eup %8333 }
 0x257   :  { %v875_v53 = vadd.f32 1.0, %v8334_v47 }
 0x258   :  { %8337 = vrcp.f32 %v868_v38 }
 0x259   :  { %8339 = vpow2.f32 %v6888_v41 }
 0x25f   :  { %v8336_v49 = vpop.eup %8335 }
 0x260   :  { %v1038_v55 = vadd.f32 1.0, %v8336_v49 }
 0x262   :  { %v8338_v56 = vpop.eup %8337  ;;  %8341 = vrcp.f32 %v1038_v55 }
 0x263   :  { %8343 = vrcp.f32 %v875_v53  ;;  %v878_v59 = vmul.f32 %v8338_v56, %v861_v54  ;;  %v8340_v3 = vpop.eup %8339 }
 0x264   :  { %v1045_v4 = vadd.f32 1.0, %v8340_v3 }
 0x265   :  { %v879_v61 = vadd.f32 %v878_v59, %v689_v57 }
 0x267   :  { %8345 = vtanh.f32 %v879_v61 }
 0x268   :  { %8347 = vrcp.f32 %v1045_v4  ;;  %v175_v4 = vpop.permute.xlu1 %174 }
 0x26c   :  { %v8342_v27 = vpop.eup %8341 }
 0x26d   :  { %v8344_v17 = vpop.eup %8343  ;;  %v1048_v46 = vmul.f32 %v8342_v27, %v1031_v15  ;;  %v177_v15 = vmul.f32 %v175_v4, %v8942_v63 }
 0x26e   :  { %v881_v29 = vsub.f32 1.0, %v8344_v17  ;;  %v883_v32 = vmul.f32 0.0, %v8344_v17 }
 0x26f   :  { %v1049_v21 = vadd.f32 %v1048_v46, %v168_v20  ;;  %v178_v20 = vmul.f32 %v175_v4, %v8945_v5  ;;  %v180_v46 = vadd.f32 %v177_v15, %v8948_v7 }
 0x271   :  { %v8346_v31 = vpop.eup %8345  ;;  %8349 = vtanh.f32 %v1049_v21 }
 0x272   :  { %v882_v28 = vmul.f32 %v8346_v31, %v881_v29  ;;  %v8348_v41 = vpop.eup %8347 }
 0x273   :  { %v1051_v47 = vsub.f32 1.0, %v8348_v41  ;;  %v1053_v53 = vmul.f32 %v8348_v41, %v8990_v23  ;;  %v181_v41 = vadd.f32 %v178_v20, %v8958_v12 }
 0x274   :  { %v884_v38 = vadd.f32 %v883_v32, %v882_v28 }
 0x27b   :  { %v8350_v49 = vpop.eup %8349 }
 0x27c   :  { %v1052_v52 = vmul.f32 %v8350_v49, %v1051_v47 }
 0x27e   :  { %v1054_v54 = vadd.f32 %v1053_v53, %v1052_v52 }
 0x280   :  { %v9073_v55 = vsel %vm889_vm4, %v1054_v54, %v8990_v23  ;;  %v9092_v23 = vsel %vm317_vm2, %v884_v38, 0.0 }
 0x281   :  { %6889 = vmatmul.mubr.msk.f32.vlgmr.msra.gmra.mrb[6].mxu0 %vm351_vm3, %v9073_v55  ;;  %7268 = vmatmul.mubr.msk.f32.vlgmr.msra.gmra.mrb[8].mxu1 %vm351_vm3, %v9073_v55 }
 0x282   :  { %7733 = vmatpush1.bf16.msra.mxu0 %v8982_v9  ;;  %7740 = vmatpush3.bf16.msra.mxu1 %v8984_v13 }
 0x283   :  { %7735 = vmatprep.subr.bf16.mxu0 %v8986_v16  ;;  %7741 = vmatprep.subr.bf16.mxu1 %v8710_v2 }
 0x284   :  { %7278 = vmatprep.mubr.msk.f32.mxu1 %vm8711_vm0, %v8709_v1  ;;  %1267 = vmatprep.mubr.f32.mxu0 %v8709_v1 }
 0x286   :  { %7737 = vmatpush1.bf16.msra.mxu0 %v8998_v24  ;;  %7743 = vmatpush3.bf16.msra.mxu1 %v9000_v25 }
 0x287   :  { %7745 = vmatprep.subr.bf16.mxu0 %v8859_v6  ;;  %7752 = vmatprep.subr.bf16.mxu1 %v8710_v2 }
 0x289   :  { %7279 = vmatmul.mubr.msk.f32.vlgmr.msra.gmra.mrb[10].mxu1 %vm351_vm3, %v9092_v23  ;;  %6891 = vmatmul.mubr.msk.f32.vlgmr.msra.gmra.mrb[6].mxu0 %vm351_vm3, %v9092_v23 }
 0x28a   :  { %7747 = vmatpush1.bf16.msra.mxu0 %v8861_v10  ;;  %7754 = vmatpush3.bf16.msra.mxu1 %v8871_v19 }
 0x28b   :  { %7749 = vmatprep.subr.bf16.mxu0 %v8864_v14  ;;  %7755 = vmatprep.subr.bf16.mxu1 %v8710_v2 }
 0x28c   :  { %1437 = vmatprep.mubr.f32.mxu0 %v8709_v1  ;;  %7289 = vmatprep.mubr.msk.f32.mxu1 %vm8711_vm0, %v8709_v1 }
 0x28e   :  { %7751 = vmatpush1.bf16.msra.mxu0 %v8869_v18  ;;  %7757 = vmatpush3.bf16.msra.mxu1 %v8876_v22 }
 0x28f   :  { %7759 = vmatprep.subr.bf16.mxu0 %v8892_v30  ;;  %7766 = vmatprep.subr.bf16.mxu1 %v8710_v2 }
 0x291   :  { %6895 = vmatmul.mubr.msk.f32.vlgmr.msra.gmra.mrb[8].mxu0 %vm351_vm3, %v9073_v55  ;;  %7290 = vmatmul.mubr.msk.f32.vlgmr.msra.gmra.mrb[12].mxu1 %vm351_vm3, %v9073_v55 }
 0x292   :  { %7761 = vmatpush1.bf16.msra.mxu0 %v8896_v36  ;;  %7768 = vmatpush3.bf16.msra.mxu1 %v8898_v37 }
 0x293   :  { %7763 = vmatprep.subr.bf16.mxu0 %v8903_v40  ;;  %7769 = vmatprep.subr.bf16.mxu1 %v8710_v2 }
 0x294   :  { %1603 = vmatprep.mubr.f32.mxu0 %v8709_v1  ;;  %7300 = vmatprep.mubr.msk.f32.mxu1 %vm8711_vm0, %v8709_v1 }
 0x296   :  { %7765 = vmatpush1.bf16.msra.mxu0 %v8906_v44  ;;  %7771 = vmatpush3.bf16.msra.mxu1 %v8908_v48 }
 0x297   :  { %7773 = vmatprep.subr.bf16.mxu0 %v8914_v51  ;;  %7780 = vmatprep.subr.bf16.mxu1 %v8710_v2 }
 0x354   :  { %v1196_v58 = vpop.f32.mrb[8].mxu1 }
 0x355   :  { %v7269_v56 = vpop.f32.mrb[9].mxu1  ;;  %v1197_v20 = vadd.f32 %v1196_v58, %v9059_v50 }
 0x35c   :  { %v1340_v57 = vpop.f32.mrb[10].mxu1  ;;  %v1269_v59 = vpop.f32.mrb[6].mxu0 }
 0x35d   :  { %v8209_v61 = vadd.f32 %v9043_v42, %v1269_v59  ;;  %v7280_v3 = vpop.f32.mrb[11].mxu1  ;;  %v1271_v26 = vpop.f32.mrb[7].mxu0 }
 0x35e   :  { %v8211_v17 = vadd.f32 %v9045_v43, %v1271_v26 }
 0x35f   :  { %v6893_v27 = vmul.f32 -1.442695, %v8209_v61 }
 0x360   :  { %v6894_v21 = vmul.f32 -1.442695, %v8211_v17 }
 0x361   :  { %8351 = vpow2.f32 %v6893_v27  ;;  %v1341_v27 = vadd.f32 %v1340_v57, %v9056_v45 }
 0x362   :  { %8353 = vpow2.f32 %v6894_v21 }
 0x364   :  { %v1439_v29 = vpop.f32.mrb[8].mxu0  ;;  %v1510_v31 = vpop.f32.mrb[12].mxu1 }
 0x365   :  { %v1440_v28 = vadd.f32 %v1439_v29, %v8951_v8  ;;  %v1441_v32 = vpop.f32.mrb[9].mxu0  ;;  %v7291_v38 = vpop.f32.mrb[13].mxu1 }
 0x366   :  { %v1442_v47 = vadd.f32 %v1441_v32, %v8955_v11  ;;  %v1511_v38 = vadd.f32 %v1510_v31, %v8971_v35 }
 0x367   :  { %v1514_v49 = vadd.f32 %v1440_v28, %v180_v46  ;;  %v179_v28 = vmul.f32 %v175_v4, %v8968_v34 }
 0x368   :  { %v1521_v53 = vadd.f32 %v1442_v47, %v181_v41 }
 0x369   :  { %v6897_v52 = vmul.f32 -1.442695, %v1514_v49  ;;  %v182_v49 = vadd.f32 %v179_v28, %v8974_v39 }
 0x36a   :  { %v6898_v59 = vmul.f32 -1.442695, %v1521_v53 }
 0x36b   :  { %v8352_v54 = vpop.eup %8351  ;;  %8355 = vpow2.f32 %v6897_v52 }
 0x36c   :  { %v1348_v56 = vadd.f32 1.0, %v8352_v54  ;;  %v8354_v61 = vpop.eup %8353 }
 0x36d   :  { %v1355_v26 = vadd.f32 1.0, %v8354_v61 }
 0x36e   :  { %8357 = vrcp.f32 %v1348_v56 }
 0x36f   :  { %8359 = vpow2.f32 %v6898_v59 }
 0x375   :  { %v8356_v3 = vpop.eup %8355 }
 0x376   :  { %v1518_v15 = vadd.f32 1.0, %v8356_v3 }
 0x378   :  { %v8358_v17 = vpop.eup %8357  ;;  %8361 = vrcp.f32 %v1518_v15 }
 0x379   :  { %v1358_v46 = vmul.f32 %v8358_v17, %v1341_v27  ;;  %8363 = vrcp.f32 %v1355_v26  ;;  %v8360_v29 = vpop.eup %8359  ;;  %v9138_v26 = vpop.permute.xlu1 %1367 }
 0x37a   :  { %v1525_v32 = vadd.f32 1.0, %v8360_v29  ;;  %vm1369_vm5 = vcmp.eq.s32.totalorder %v9138_v26, 1 }
 0x37b   :  { %v1359_v21 = vadd.f32 %v1358_v46, %v1197_v20 }
 0x37d   :  { %8365 = vtanh.f32 %v1359_v21 }
 0x37e   :  { %8367 = vrcp.f32 %v1525_v32  ;;  %v189_v32 = vpop.permute.xlu0 %188 }
 0x382   :  { %v8362_v41 = vpop.eup %8361 }
 0x383   :  { %v8364_v47 = vpop.eup %8363  ;;  %v1528_v52 = vmul.f32 %v8362_v41, %v1511_v38  ;;  %v191_v38 = vmul.f32 %v189_v32, %v8942_v63 }
 0x384   :  { %v1361_v53 = vsub.f32 1.0, %v8364_v47  ;;  %v1363_v56 = vmul.f32 %v8364_v47, %v9092_v23 }
 0x385   :  { %v1529_v57 = vadd.f32 %v1528_v52, %v182_v49  ;;  %v192_v49 = vmul.f32 %v189_v32, %v8945_v5  ;;  %v194_v52 = vadd.f32 %v191_v38, %v8948_v7 }
 0x387   :  { %v8366_v54 = vpop.eup %8365  ;;  %8369 = vtanh.f32 %v1529_v57 }
 0x388   :  { %v1362_v58 = vmul.f32 %v8366_v54, %v1361_v53  ;;  %v8368_v61 = vpop.eup %8367 }
 0x389   :  { %v1531_v3 = vsub.f32 1.0, %v8368_v61  ;;  %v1533_v15 = vmul.f32 %v8368_v61, %v9073_v55  ;;  %v195_v61 = vadd.f32 %v192_v49, %v8958_v12 }
 0x38a   :  { %v1364_v59 = vadd.f32 %v1363_v56, %v1362_v58 }
 0x391   :  { %v8370_v4 = vpop.eup %8369 }
 0x392   :  { %v1532_v31 = vmul.f32 %v8370_v4, %v1531_v3 }
 0x394   :  { %v1534_v27 = vadd.f32 %v1533_v15, %v1532_v31 }
 0x396   :  { %v9145_v17 = vsel %vm1369_vm5, %v1534_v27, %v9073_v55  ;;  %v9165_v55 = vsel %vm889_vm4, %v1364_v59, %v9092_v23 }
 0x397   :  { %6899 = vmatmul.mubr.msk.f32.vlgmr.msra.gmra.mrb[10].mxu0 %vm351_vm3, %v9145_v17  ;;  %7301 = vmatmul.mubr.msk.f32.vlgmr.msra.gmra.mrb[14].mxu1 %vm351_vm3, %v9145_v17 }
 0x398   :  { %7775 = vmatpush1.bf16.msra.mxu0 %v8982_v9  ;;  %7782 = vmatpush3.bf16.msra.mxu1 %v8984_v13 }
 0x399   :  { %7777 = vmatprep.subr.bf16.mxu0 %v8986_v16  ;;  %7783 = vmatprep.subr.bf16.mxu1 %v8710_v2 }
 0x39a   :  { %7311 = vmatprep.mubr.msk.f32.mxu1 %vm8711_vm0, %v8709_v1  ;;  %1747 = vmatprep.mubr.f32.mxu0 %v8709_v1 }
 0x39c   :  { %7779 = vmatpush1.bf16.msra.mxu0 %v8998_v24  ;;  %7785 = vmatpush3.bf16.msra.mxu1 %v9000_v25 }
 0x39d   :  { %7787 = vmatprep.subr.bf16.mxu0 %v8859_v6  ;;  %7794 = vmatprep.subr.bf16.mxu1 %v8710_v2 }
 0x39f   :  { %7312 = vmatmul.mubr.msk.f32.vlgmr.msra.gmra.mrb[16].mxu1 %vm351_vm3, %v9165_v55  ;;  %6901 = vmatmul.mubr.msk.f32.vlgmr.msra.gmra.mrb[10].mxu0 %vm351_vm3, %v9165_v55 }
 0x3a0   :  { %7789 = vmatpush1.bf16.msra.mxu0 %v8861_v10  ;;  %7796 = vmatpush3.bf16.msra.mxu1 %v8871_v19 }
 0x3a1   :  { %7791 = vmatprep.subr.bf16.mxu0 %v8864_v14  ;;  %7797 = vmatprep.subr.bf16.mxu1 %v8710_v2 }
 0x3a2   :  { %1917 = vmatprep.mubr.f32.mxu0 %v8709_v1  ;;  %7322 = vmatprep.mubr.msk.f32.mxu1 %vm8711_vm0, %v8709_v1 }
 0x3a4   :  { %7793 = vmatpush1.bf16.msra.mxu0 %v8869_v18  ;;  %7799 = vmatpush3.bf16.msra.mxu1 %v8876_v22 }
 0x3a5   :  { %7801 = vmatprep.subr.bf16.mxu0 %v8892_v30  ;;  %7808 = vmatprep.subr.bf16.mxu1 %v8710_v2 }
 0x3a7   :  { %6905 = vmatmul.mubr.msk.f32.vlgmr.msra.gmra.mrb[12].mxu0 %vm351_vm3, %v9145_v17  ;;  %7323 = vmatmul.mubr.msk.f32.vlgmr.msra.gmra.mrb[18].mxu1 %vm351_vm3, %v9145_v17 }
 0x3a8   :  { %7803 = vmatpush1.bf16.msra.mxu0 %v8896_v36  ;;  %7810 = vmatpush3.bf16.msra.mxu1 %v8898_v37 }
 0x3a9   :  { %7805 = vmatprep.subr.bf16.mxu0 %v8903_v40  ;;  %7811 = vmatprep.subr.bf16.mxu1 %v8710_v2 }
 0x3aa   :  { %2083 = vmatprep.mubr.f32.mxu0 %v8709_v1  ;;  %7333 = vmatprep.mubr.msk.f32.mxu1 %vm8711_vm0, %v8709_v1 }
 0x3ac   :  { %7807 = vmatpush1.bf16.msra.mxu0 %v8906_v44  ;;  %7813 = vmatpush3.bf16.msra.mxu1 %v8908_v48 }
 0x3ad   :  { %7815 = vmatprep.subr.bf16.mxu0 %v8914_v51  ;;  %7822 = vmatprep.subr.bf16.mxu1 %v8710_v2 }
 0x46a   :  { %v1676_v0 = vpop.f32.mrb[14].mxu1 }
 0x46b   :  { %v7302_v23 = vpop.f32.mrb[15].mxu1  ;;  %v1677_v49 = vadd.f32 %v1676_v0, %v9059_v50 }
 0x472   :  { %v1820_v20 = vpop.f32.mrb[16].mxu1  ;;  %v1749_v46 = vpop.f32.mrb[10].mxu0 }
 0x473   :  { %v8213_v21 = vadd.f32 %v9043_v42, %v1749_v46  ;;  %v7313_v29 = vpop.f32.mrb[17].mxu1  ;;  %v1751_v28 = vpop.f32.mrb[11].mxu0 }
 0x474   :  { %v8215_v47 = vadd.f32 %v9045_v43, %v1751_v28 }
 0x475   :  { %v6903_v41 = vmul.f32 -1.442695, %v8213_v21 }
 0x476   :  { %v6904_v57 = vmul.f32 -1.442695, %v8215_v47 }
 0x477   :  { %8371 = vpow2.f32 %v6903_v41  ;;  %v1821_v41 = vadd.f32 %v1820_v20, %v9056_v45 }
 0x478   :  { %8373 = vpow2.f32 %v6904_v57 }
 0x47a   :  { %v1919_v53 = vpop.f32.mrb[12].mxu0  ;;  %v1990_v54 = vpop.f32.mrb[18].mxu1 }
 0x47b   :  { %v1920_v58 = vadd.f32 %v1919_v53, %v8951_v8  ;;  %v1921_v56 = vpop.f32.mrb[13].mxu0  ;;  %v7324_v59 = vpop.f32.mrb[19].mxu1 }
 0x47c   :  { %v1922_v3 = vadd.f32 %v1921_v56, %v8955_v11  ;;  %v1991_v59 = vadd.f32 %v1990_v54, %v8971_v35 }
 0x47d   :  { %v1994_v4 = vadd.f32 %v1920_v58, %v194_v52  ;;  %v193_v58 = vmul.f32 %v189_v32, %v8968_v34 }
 0x47e   :  { %v2001_v15 = vadd.f32 %v1922_v3, %v195_v61 }
 0x47f   :  { %v6907_v31 = vmul.f32 -1.442695, %v1994_v4  ;;  %v196_v4 = vadd.f32 %v193_v58, %v8974_v39 }
 0x480   :  { %v6908_v46 = vmul.f32 -1.442695, %v2001_v15 }
 0x481   :  { %v8372_v27 = vpop.eup %8371  ;;  %8375 = vpow2.f32 %v6907_v31 }
 0x482   :  { %v1828_v23 = vadd.f32 1.0, %v8372_v27  ;;  %v8374_v21 = vpop.eup %8373 }
 0x483   :  { %v1835_v28 = vadd.f32 1.0, %v8374_v21 }
 0x484   :  { %8377 = vrcp.f32 %v1828_v23 }
 0x485   :  { %8379 = vpow2.f32 %v6908_v46 }
 0x48b   :  { %v8376_v29 = vpop.eup %8375 }
 0x48c   :  { %v1998_v38 = vadd.f32 1.0, %v8376_v29 }
 0x48e   :  { %v8378_v47 = vpop.eup %8377  ;;  %8381 = vrcp.f32 %v1998_v38 }
 0x48f   :  { %v1838_v52 = vmul.f32 %v8378_v47, %v1821_v41  ;;  %8383 = vrcp.f32 %v1835_v28  ;;  %v8380_v53 = vpop.eup %8379  ;;  %v9211_v28 = vpop.permute.xlu1 %1847 }
 0x490   :  { %v2005_v56 = vadd.f32 1.0, %v8380_v53  ;;  %vm1849_vm6 = vcmp.eq.s32.totalorder %v9211_v28, 1 }
 0x491   :  { %v1839_v57 = vadd.f32 %v1838_v52, %v1677_v49 }
 0x493   :  { %8385 = vtanh.f32 %v1839_v57 }
 0x494   :  { %8387 = vrcp.f32 %v2005_v56  ;;  %v203_v56 = vpop.permute.xlu1 %202 }
 0x498   :  { %v8382_v61 = vpop.eup %8381 }
 0x499   :  { %v8384_v3 = vpop.eup %8383  ;;  %v2008_v31 = vmul.f32 %v8382_v61, %v1991_v59  ;;  %v205_v59 = vmul.f32 %v203_v56, %v8942_v63 }
 0x49a   :  { %v1841_v15 = vsub.f32 1.0, %v8384_v3  ;;  %v1843_v23 = vmul.f32 %v8384_v3, %v9165_v55 }
 0x49b   :  { %v2009_v20 = vadd.f32 %v2008_v31, %v196_v4  ;;  %v206_v4 = vmul.f32 %v203_v56, %v8945_v5  ;;  %v208_v31 = vadd.f32 %v205_v59, %v8948_v7 }
 0x49d   :  { %v8386_v27 = vpop.eup %8385  ;;  %8389 = vtanh.f32 %v2009_v20 }
 0x49e   :  { %v1842_v0 = vmul.f32 %v8386_v27, %v1841_v15  ;;  %v8388_v21 = vpop.eup %8387 }
 0x49f   :  { %v2011_v29 = vsub.f32 1.0, %v8388_v21  ;;  %v2013_v38 = vmul.f32 %v8388_v21, %v9145_v17  ;;  %v209_v21 = vadd.f32 %v206_v4, %v8958_v12 }
 0x4a0   :  { %v1844_v46 = vadd.f32 %v1843_v23, %v1842_v0 }
 0x4a7   :  { %v8390_v32 = vpop.eup %8389 }
 0x4a8   :  { %v2012_v54 = vmul.f32 %v8390_v32, %v2011_v29 }
 0x4aa   :  { %v2014_v41 = vadd.f32 %v2013_v38, %v2012_v54 }
 0x4ac   :  { %v9218_v47 = vsel %vm1849_vm6, %v2014_v41, %v9145_v17  ;;  %v9238_v17 = vsel %vm1369_vm5, %v1844_v46, %v9165_v55 }
 0x4ad   :  { %6909 = vmatmul.mubr.msk.f32.vlgmr.msra.gmra.mrb[14].mxu0 %vm351_vm3, %v9218_v47  ;;  %7334 = vmatmul.mubr.msk.f32.vlgmr.msra.gmra.mrb[20].mxu1 %vm351_vm3, %v9218_v47 }
 0x4ae   :  { %7817 = vmatpush1.bf16.msra.mxu0 %v8982_v9  ;;  %7824 = vmatpush3.bf16.msra.mxu1 %v8984_v13 }
 0x4af   :  { %7819 = vmatprep.subr.bf16.mxu0 %v8986_v16  ;;  %7825 = vmatprep.subr.bf16.mxu1 %v8710_v2 }
 0x4b0   :  { %7344 = vmatprep.mubr.msk.f32.mxu1 %vm8711_vm0, %v8709_v1  ;;  %2227 = vmatprep.mubr.f32.mxu0 %v8709_v1 }
 0x4b2   :  { %7821 = vmatpush1.bf16.msra.mxu0 %v8998_v24  ;;  %7827 = vmatpush3.bf16.msra.mxu1 %v9000_v25 }
 0x4b3   :  { %7829 = vmatprep.subr.bf16.mxu0 %v8859_v6  ;;  %7836 = vmatprep.subr.bf16.mxu1 %v8710_v2 }
 0x4b5   :  { %7345 = vmatmul.mubr.msk.f32.vlgmr.msra.gmra.mrb[22].mxu1 %vm351_vm3, %v9238_v17  ;;  %6911 = vmatmul.mubr.msk.f32.vlgmr.msra.gmra.mrb[14].mxu0 %vm351_vm3, %v9238_v17 }
 0x4b6   :  { %7831 = vmatpush1.bf16.msra.mxu0 %v8861_v10  ;;  %7838 = vmatpush3.bf16.msra.mxu1 %v8871_v19 }
 0x4b7   :  { %7833 = vmatprep.subr.bf16.mxu0 %v8864_v14  ;;  %7839 = vmatprep.subr.bf16.mxu1 %v8710_v2 }
 0x4b8   :  { %2397 = vmatprep.mubr.f32.mxu0 %v8709_v1  ;;  %7355 = vmatprep.mubr.msk.f32.mxu1 %vm8711_vm0, %v8709_v1 }
 0x4ba   :  { %7835 = vmatpush1.bf16.msra.mxu0 %v8869_v18  ;;  %7841 = vmatpush3.bf16.msra.mxu1 %v8876_v22 }
 0x4bb   :  { %7843 = vmatprep.subr.bf16.mxu0 %v8892_v30  ;;  %7850 = vmatprep.subr.bf16.mxu1 %v8710_v2 }
 0x4bd   :  { %6915 = vmatmul.mubr.msk.f32.vlgmr.msra.gmra.mrb[16].mxu0 %vm351_vm3, %v9218_v47  ;;  %7356 = vmatmul.mubr.msk.f32.vlgmr.msra.gmra.mrb[24].mxu1 %vm351_vm3, %v9218_v47 }
 0x4be   :  { %7845 = vmatpush1.bf16.msra.mxu0 %v8896_v36  ;;  %7852 = vmatpush3.bf16.msra.mxu1 %v8898_v37 }
 0x4bf   :  { %7847 = vmatprep.subr.bf16.mxu0 %v8903_v40  ;;  %7853 = vmatprep.subr.bf16.mxu1 %v8710_v2 }
 0x4c0   :  { %2563 = vmatprep.mubr.f32.mxu0 %v8709_v1  ;;  %7366 = vmatprep.mubr.msk.f32.mxu1 %vm8711_vm0, %v8709_v1 }
 0x4c2   :  { %7849 = vmatpush1.bf16.msra.mxu0 %v8906_v44  ;;  %7855 = vmatpush3.bf16.msra.mxu1 %v8908_v48 }
 0x4c3   :  { %7857 = vmatprep.subr.bf16.mxu0 %v8914_v51  ;;  %7864 = vmatprep.subr.bf16.mxu1 %v8710_v2 }
 0x580   :  { %v2156_v26 = vpop.f32.mrb[20].mxu1 }
 0x581   :  { %v7335_v55 = vpop.f32.mrb[21].mxu1  ;;  %v2157_v4 = vadd.f32 %v2156_v26, %v9059_v50 }
 0x588   :  { %v2300_v49 = vpop.f32.mrb[22].mxu1  ;;  %v2229_v52 = vpop.f32.mrb[14].mxu0 }
 0x589   :  { %v8217_v57 = vadd.f32 %v9043_v42, %v2229_v52  ;;  %v7346_v53 = vpop.f32.mrb[23].mxu1  ;;  %v2231_v58 = vpop.f32.mrb[15].mxu0 }
 0x58a   :  { %v8219_v3 = vadd.f32 %v9045_v43, %v2231_v58 }
 0x58b   :  { %v6913_v61 = vmul.f32 -1.442695, %v8217_v57 }
 0x58c   :  { %v6914_v20 = vmul.f32 -1.442695, %v8219_v3 }
 0x58d   :  { %8391 = vpow2.f32 %v6913_v61  ;;  %v2301_v61 = vadd.f32 %v2300_v49, %v9056_v45 }
 0x58e   :  { %8393 = vpow2.f32 %v6914_v20 }
 0x590   :  { %v2399_v15 = vpop.f32.mrb[16].mxu0  ;;  %v2470_v27 = vpop.f32.mrb[24].mxu1 }
 0x591   :  { %v2400_v0 = vadd.f32 %v2399_v15, %v8951_v8  ;;  %v2401_v23 = vpop.f32.mrb[17].mxu0  ;;  %v7357_v46 = vpop.f32.mrb[25].mxu1 }
 0x592   :  { %v2402_v29 = vadd.f32 %v2401_v23, %v8955_v11  ;;  %v2471_v46 = vadd.f32 %v2470_v27, %v8971_v35 }
 0x593   :  { %v2474_v32 = vadd.f32 %v2400_v0, %v208_v31  ;;  %v207_v0 = vmul.f32 %v203_v56, %v8968_v34 }
 0x594   :  { %v2481_v38 = vadd.f32 %v2402_v29, %v209_v21 }
 0x595   :  { %v6917_v54 = vmul.f32 -1.442695, %v2474_v32  ;;  %v210_v32 = vadd.f32 %v207_v0, %v8974_v39 }
 0x596   :  { %v6918_v52 = vmul.f32 -1.442695, %v2481_v38 }
 0x597   :  { %v8392_v41 = vpop.eup %8391  ;;  %8395 = vpow2.f32 %v6917_v54 }
 0x598   :  { %v2308_v55 = vadd.f32 1.0, %v8392_v41  ;;  %v8394_v57 = vpop.eup %8393 }
 0x599   :  { %v2315_v58 = vadd.f32 1.0, %v8394_v57 }
 0x59a   :  { %8397 = vrcp.f32 %v2308_v55 }
 0x59b   :  { %8399 = vpow2.f32 %v6918_v52 }
 0x5a1   :  { %v8396_v53 = vpop.eup %8395 }
 0x5a2   :  { %v2478_v59 = vadd.f32 1.0, %v8396_v53 }
 0x5a4   :  { %v8398_v3 = vpop.eup %8397  ;;  %8401 = vrcp.f32 %v2478_v59 }
 0x5a5   :  { %v2318_v31 = vmul.f32 %v8398_v3, %v2301_v61  ;;  %8403 = vrcp.f32 %v2315_v58  ;;  %v8400_v15 = vpop.eup %8399  ;;  %v9284_v58 = vpop.permute.xlu0 %2327 }
 0x5a6   :  { %v2485_v23 = vadd.f32 1.0, %v8400_v15  ;;  %vm2329_vm7 = vcmp.eq.s32.totalorder %v9284_v58, 1 }
 0x5a7   :  { %v2319_v20 = vadd.f32 %v2318_v31, %v2157_v4 }
 0x5a9   :  { %8405 = vtanh.f32 %v2319_v20 }
 0x5aa   :  { %8407 = vrcp.f32 %v2485_v23  ;;  %v217_v23 = vpop.permute.xlu1 %216 }
 0x5ae   :  { %v8402_v21 = vpop.eup %8401 }
 0x5af   :  { %v8404_v29 = vpop.eup %8403  ;;  %v2488_v54 = vmul.f32 %v8402_v21, %v2471_v46  ;;  %v219_v46 = vmul.f32 %v217_v23, %v8942_v63 }
 0x5b0   :  { %v2321_v38 = vsub.f32 1.0, %v8404_v29  ;;  %v2323_v55 = vmul.f32 %v8404_v29, %v9238_v17 }
 0x5b1   :  { %v2489_v49 = vadd.f32 %v2488_v54, %v210_v32  ;;  %v220_v32 = vmul.f32 %v217_v23, %v8945_v5  ;;  %v222_v54 = vadd.f32 %v219_v46, %v8948_v7 }
 0x5b3   :  { %v8406_v41 = vpop.eup %8405  ;;  %8409 = vtanh.f32 %v2489_v49 }
 0x5b4   :  { %v2322_v26 = vmul.f32 %v8406_v41, %v2321_v38  ;;  %v8408_v57 = vpop.eup %8407 }
 0x5b5   :  { %v2491_v53 = vsub.f32 1.0, %v8408_v57  ;;  %v2493_v59 = vmul.f32 %v8408_v57, %v9218_v47  ;;  %v223_v57 = vadd.f32 %v220_v32, %v8958_v12 }
 0x5b6   :  { %v2324_v52 = vadd.f32 %v2323_v55, %v2322_v26 }
 0x5bd   :  { %v8410_v56 = vpop.eup %8409 }
 0x5be   :  { %v2492_v27 = vmul.f32 %v8410_v56, %v2491_v53 }
 0x5c0   :  { %v2494_v61 = vadd.f32 %v2493_v59, %v2492_v27 }
 0x5c2   :  { %v9291_v3 = vsel %vm2329_vm7, %v2494_v61, %v9218_v47  ;;  %v9311_v47 = vsel %vm1849_vm6, %v2324_v52, %v9238_v17 }
 0x5c3   :  { %6919 = vmatmul.mubr.msk.f32.vlgmr.msra.gmra.mrb[18].mxu0 %vm351_vm3, %v9291_v3  ;;  %7367 = vmatmul.mubr.msk.f32.vlgmr.msra.gmra.mrb[26].mxu1 %vm351_vm3, %v9291_v3 }
 0x5c4   :  { %7859 = vmatpush1.bf16.msra.mxu0 %v8982_v9  ;;  %7866 = vmatpush3.bf16.msra.mxu1 %v8984_v13 }
 0x5c5   :  { %7861 = vmatprep.subr.bf16.mxu0 %v8986_v16  ;;  %7867 = vmatprep.subr.bf16.mxu1 %v8710_v2 }
 0x5c6   :  { %7377 = vmatprep.mubr.msk.f32.mxu1 %vm8711_vm0, %v8709_v1  ;;  %2707 = vmatprep.mubr.f32.mxu0 %v8709_v1 }
 0x5c8   :  { %7863 = vmatpush1.bf16.msra.mxu0 %v8998_v24  ;;  %7869 = vmatpush3.bf16.msra.mxu1 %v9000_v25 }
 0x5c9   :  { %7871 = vmatprep.subr.bf16.mxu0 %v8859_v6  ;;  %7878 = vmatprep.subr.bf16.mxu1 %v8710_v2 }
 0x5cb   :  { %7378 = vmatmul.mubr.msk.f32.vlgmr.msra.gmra.mrb[28].mxu1 %vm351_vm3, %v9311_v47  ;;  %6921 = vmatmul.mubr.msk.f32.vlgmr.msra.gmra.mrb[18].mxu0 %vm351_vm3, %v9311_v47 }
 0x5cc   :  { %7873 = vmatpush1.bf16.msra.mxu0 %v8861_v10  ;;  %7880 = vmatpush3.bf16.msra.mxu1 %v8871_v19 }
 0x5cd   :  { %7875 = vmatprep.subr.bf16.mxu0 %v8864_v14  ;;  %7881 = vmatprep.subr.bf16.mxu1 %v8710_v2 }
 0x5ce   :  { %2877 = vmatprep.mubr.f32.mxu0 %v8709_v1  ;;  %7388 = vmatprep.mubr.msk.f32.mxu1 %vm8711_vm0, %v8709_v1 }
 0x5d0   :  { %7877 = vmatpush1.bf16.msra.mxu0 %v8869_v18  ;;  %7883 = vmatpush3.bf16.msra.mxu1 %v8876_v22 }
 0x5d1   :  { %7885 = vmatprep.subr.bf16.mxu0 %v8892_v30  ;;  %7892 = vmatprep.subr.bf16.mxu1 %v8710_v2 }
 0x5d3   :  { %6925 = vmatmul.mubr.msk.f32.vlgmr.msra.gmra.mrb[20].mxu0 %vm351_vm3, %v9291_v3  ;;  %7389 = vmatmul.mubr.msk.f32.vlgmr.msra.gmra.mrb[30].mxu1 %vm351_vm3, %v9291_v3 }
 0x5d4   :  { %7887 = vmatpush1.bf16.msra.mxu0 %v8896_v36  ;;  %7894 = vmatpush3.bf16.msra.mxu1 %v8898_v37 }
 0x5d5   :  { %7889 = vmatprep.subr.bf16.mxu0 %v8903_v40  ;;  %7895 = vmatprep.subr.bf16.mxu1 %v8710_v2 }
 0x5d6   :  { %3043 = vmatprep.mubr.f32.mxu0 %v8709_v1  ;;  %7399 = vmatprep.mubr.msk.f32.mxu1 %vm8711_vm0, %v8709_v1 }
 0x5d8   :  { %7891 = vmatpush1.bf16.msra.mxu0 %v8906_v44  ;;  %7897 = vmatpush3.bf16.msra.mxu1 %v8908_v48 }
 0x5d9   :  { %7899 = vmatprep.subr.bf16.mxu0 %v8914_v51  ;;  %7906 = vmatprep.subr.bf16.mxu1 %v8710_v2 }
 0x696   :  { %v2636_v28 = vpop.f32.mrb[26].mxu1 }
 0x697   :  { %v7368_v17 = vpop.f32.mrb[27].mxu1  ;;  %v2637_v32 = vadd.f32 %v2636_v28, %v9059_v50 }
 0x69e   :  { %v2780_v4 = vpop.f32.mrb[28].mxu1  ;;  %v2709_v31 = vpop.f32.mrb[18].mxu0 }
 0x69f   :  { %v8221_v20 = vadd.f32 %v9043_v42, %v2709_v31  ;;  %v7379_v15 = vpop.f32.mrb[29].mxu1  ;;  %v2711_v0 = vpop.f32.mrb[19].mxu0 }
 0x6a0   :  { %v8223_v29 = vadd.f32 %v9045_v43, %v2711_v0 }
 0x6a1   :  { %v6923_v21 = vmul.f32 -1.442695, %v8221_v20 }
 0x6a2   :  { %v6924_v49 = vmul.f32 -1.442695, %v8223_v29 }
 0x6a3   :  { %8411 = vpow2.f32 %v6923_v21  ;;  %v2781_v21 = vadd.f32 %v2780_v4, %v9056_v45 }
 0x6a4   :  { %8413 = vpow2.f32 %v6924_v49 }
 0x6a6   :  { %v2879_v38 = vpop.f32.mrb[20].mxu0  ;;  %v2950_v41 = vpop.f32.mrb[30].mxu1 }
 0x6a7   :  { %v2880_v26 = vadd.f32 %v2879_v38, %v8951_v8  ;;  %v2881_v55 = vpop.f32.mrb[21].mxu0  ;;  %v7390_v52 = vpop.f32.mrb[31].mxu1 }
 0x6a8   :  { %v2882_v53 = vadd.f32 %v2881_v55, %v8955_v11  ;;  %v2951_v52 = vadd.f32 %v2950_v41, %v8971_v35 }
 0x6a9   :  { %v2954_v56 = vadd.f32 %v2880_v26, %v222_v54  ;;  %v221_v26 = vmul.f32 %v217_v23, %v8968_v34 }
 0x6aa   :  { %v2961_v59 = vadd.f32 %v2882_v53, %v223_v57 }
 0x6ab   :  { %v6927_v27 = vmul.f32 -1.442695, %v2954_v56  ;;  %v224_v56 = vadd.f32 %v221_v26, %v8974_v39 }
 0x6ac   :  { %v6928_v31 = vmul.f32 -1.442695, %v2961_v59 }
 0x6ad   :  { %v8412_v61 = vpop.eup %8411  ;;  %8415 = vpow2.f32 %v6927_v27 }
 0x6ae   :  { %v2788_v17 = vadd.f32 1.0, %v8412_v61  ;;  %v8414_v20 = vpop.eup %8413 }
 0x6af   :  { %v2795_v0 = vadd.f32 1.0, %v8414_v20 }
 0x6b0   :  { %8417 = vrcp.f32 %v2788_v17 }
 0x6b1   :  { %8419 = vpow2.f32 %v6928_v31 }
 0x6b7   :  { %v8416_v15 = vpop.eup %8415 }
 0x6b8   :  { %v2958_v46 = vadd.f32 1.0, %v8416_v15 }
 0x6ba   :  { %v8418_v29 = vpop.eup %8417  ;;  %8421 = vrcp.f32 %v2958_v46 }
 0x6bb   :  { %v2798_v54 = vmul.f32 %v8418_v29, %v2781_v21  ;;  %8423 = vrcp.f32 %v2795_v0  ;;  %v8420_v38 = vpop.eup %8419  ;;  %v9357_v0 = vpop.permute.xlu1 %2807 }
 0x6bc   :  { %v2965_v55 = vadd.f32 1.0, %v8420_v38  ;;  %vm2809_vm8 = vcmp.eq.s32.totalorder %v9357_v0, 1 }
 0x6bd   :  { %v2799_v49 = vadd.f32 %v2798_v54, %v2637_v32 }
 0x6bf   :  { %8425 = vtanh.f32 %v2799_v49 }
 0x6c0   :  { %8427 = vrcp.f32 %v2965_v55  ;;  %v231_v55 = vpop.permute.xlu0 %230 }
 0x6c4   :  { %v8422_v57 = vpop.eup %8421 }
 0x6c5   :  { %v8424_v53 = vpop.eup %8423  ;;  %v2968_v27 = vmul.f32 %v8422_v57, %v2951_v52  ;;  %v233_v52 = vmul.f32 %v231_v55, %v8942_v63 }
 0x6c6   :  { %v2801_v59 = vsub.f32 1.0, %v8424_v53  ;;  %v2803_v17 = vmul.f32 %v8424_v53, %v9311_v47 }
 0x6c7   :  { %v2969_v4 = vadd.f32 %v2968_v27, %v224_v56  ;;  %v234_v56 = vmul.f32 %v231_v55, %v8945_v5  ;;  %v236_v27 = vadd.f32 %v233_v52, %v8948_v7 }
 0x6c9   :  { %v8426_v61 = vpop.eup %8425  ;;  %8429 = vtanh.f32 %v2969_v4 }
 0x6ca   :  { %v2802_v28 = vmul.f32 %v8426_v61, %v2801_v59  ;;  %v8428_v20 = vpop.eup %8427 }
 0x6cb   :  { %v2971_v15 = vsub.f32 1.0, %v8428_v20  ;;  %v2973_v46 = vmul.f32 %v8428_v20, %v9291_v3  ;;  %v237_v20 = vadd.f32 %v234_v56, %v8958_v12 }
 0x6cc   :  { %v2804_v31 = vadd.f32 %v2803_v17, %v2802_v28 }
 0x6d3   :  { %v8430_v23 = vpop.eup %8429 }
 0x6d4   :  { %v2972_v41 = vmul.f32 %v8430_v23, %v2971_v15 }
 0x6d6   :  { %v2974_v21 = vadd.f32 %v2973_v46, %v2972_v41 }
 0x6d8   :  { %v9364_v29 = vsel %vm2809_vm8, %v2974_v21, %v9291_v3  ;;  %v9384_v3 = vsel %vm2329_vm7, %v2804_v31, %v9311_v47 }
 0x6d9   :  { %6929 = vmatmul.mubr.msk.f32.vlgmr.msra.gmra.mrb[22].mxu0 %vm351_vm3, %v9364_v29  ;;  %7400 = vmatmul.mubr.msk.f32.vlgmr.msra.gmra.mrb[32].mxu1 %vm351_vm3, %v9364_v29 }
 0x6da   :  { %7901 = vmatpush1.bf16.msra.mxu0 %v8982_v9  ;;  %7908 = vmatpush3.bf16.msra.mxu1 %v8984_v13 }
 0x6db   :  { %7903 = vmatprep.subr.bf16.mxu0 %v8986_v16  ;;  %7909 = vmatprep.subr.bf16.mxu1 %v8710_v2 }
 0x6dc   :  { %7410 = vmatprep.mubr.msk.f32.mxu1 %vm8711_vm0, %v8709_v1  ;;  %3187 = vmatprep.mubr.f32.mxu0 %v8709_v1 }
 0x6de   :  { %7905 = vmatpush1.bf16.msra.mxu0 %v8998_v24  ;;  %7911 = vmatpush3.bf16.msra.mxu1 %v9000_v25 }
 0x6df   :  { %7913 = vmatprep.subr.bf16.mxu0 %v8859_v6  ;;  %7920 = vmatprep.subr.bf16.mxu1 %v8710_v2 }
 0x6e1   :  { %7411 = vmatmul.mubr.msk.f32.vlgmr.msra.gmra.mrb[34].mxu1 %vm351_vm3, %v9384_v3  ;;  %6931 = vmatmul.mubr.msk.f32.vlgmr.msra.gmra.mrb[22].mxu0 %vm351_vm3, %v9384_v3 }
 0x6e2   :  { %7915 = vmatpush1.bf16.msra.mxu0 %v8861_v10  ;;  %7922 = vmatpush3.bf16.msra.mxu1 %v8871_v19 }
 0x6e3   :  { %7917 = vmatprep.subr.bf16.mxu0 %v8864_v14  ;;  %7923 = vmatprep.subr.bf16.mxu1 %v8710_v2 }
 0x6e4   :  { %3357 = vmatprep.mubr.f32.mxu0 %v8709_v1  ;;  %7421 = vmatprep.mubr.msk.f32.mxu1 %vm8711_vm0, %v8709_v1 }
 0x6e6   :  { %7919 = vmatpush1.bf16.msra.mxu0 %v8869_v18  ;;  %7925 = vmatpush3.bf16.msra.mxu1 %v8876_v22 }
 0x6e7   :  { %7927 = vmatprep.subr.bf16.mxu0 %v8892_v30  ;;  %7934 = vmatprep.subr.bf16.mxu1 %v8710_v2 }
 0x6e9   :  { %6935 = vmatmul.mubr.msk.f32.vlgmr.msra.gmra.mrb[24].mxu0 %vm351_vm3, %v9364_v29  ;;  %7422 = vmatmul.mubr.msk.f32.vlgmr.msra.gmra.mrb[36].mxu1 %vm351_vm3, %v9364_v29 }
 0x6ea   :  { %7929 = vmatpush1.bf16.msra.mxu0 %v8896_v36  ;;  %7936 = vmatpush3.bf16.msra.mxu1 %v8898_v37 }
 0x6eb   :  { %7931 = vmatprep.subr.bf16.mxu0 %v8903_v40  ;;  %7937 = vmatprep.subr.bf16.mxu1 %v8710_v2 }
 0x6ec   :  { %3523 = vmatprep.mubr.f32.mxu0 %v8709_v1  ;;  %7432 = vmatprep.mubr.msk.f32.mxu1 %vm8711_vm0, %v8709_v1 }
 0x6ee   :  { %7933 = vmatpush1.bf16.msra.mxu0 %v8906_v44  ;;  %7939 = vmatpush3.bf16.msra.mxu1 %v8908_v48 }
 0x6ef   :  { %7941 = vmatprep.subr.bf16.mxu0 %v8914_v51  ;;  %7948 = vmatprep.subr.bf16.mxu1 %v8710_v2 }
 0x7ac   :  { %v3116_v58 = vpop.f32.mrb[32].mxu1 }
 0x7ad   :  { %v7401_v47 = vpop.f32.mrb[33].mxu1  ;;  %v3117_v56 = vadd.f32 %v3116_v58, %v9059_v50 }
 0x7b4   :  { %v3260_v32 = vpop.f32.mrb[34].mxu1  ;;  %v3189_v54 = vpop.f32.mrb[22].mxu0 }
 0x7b5   :  { %v8225_v49 = vadd.f32 %v9043_v42, %v3189_v54  ;;  %v7412_v38 = vpop.f32.mrb[35].mxu1  ;;  %v3191_v26 = vpop.f32.mrb[23].mxu0 }
 0x7b6   :  { %v8227_v53 = vadd.f32 %v9045_v43, %v3191_v26 }
 0x7b7   :  { %v6933_v57 = vmul.f32 -1.442695, %v8225_v49 }
 0x7b8   :  { %v6934_v4 = vmul.f32 -1.442695, %v8227_v53 }
 0x7b9   :  { %8431 = vpow2.f32 %v6933_v57  ;;  %v3261_v57 = vadd.f32 %v3260_v32, %v9056_v45 }
 0x7ba   :  { %8433 = vpow2.f32 %v6934_v4 }
 0x7bc   :  { %v3359_v59 = vpop.f32.mrb[24].mxu0  ;;  %v3430_v61 = vpop.f32.mrb[36].mxu1 }
 0x7bd   :  { %v3360_v28 = vadd.f32 %v3359_v59, %v8951_v8  ;;  %v3361_v17 = vpop.f32.mrb[25].mxu0  ;;  %v7423_v31 = vpop.f32.mrb[37].mxu1 }
 0x7be   :  { %v3362_v15 = vadd.f32 %v3361_v17, %v8955_v11  ;;  %v3431_v31 = vadd.f32 %v3430_v61, %v8971_v35 }
 0x7bf   :  { %v3434_v23 = vadd.f32 %v3360_v28, %v236_v27  ;;  %v235_v28 = vmul.f32 %v231_v55, %v8968_v34 }
 0x7c0   :  { %v3441_v46 = vadd.f32 %v3362_v15, %v237_v20 }
 0x7c1   :  { %v6937_v41 = vmul.f32 -1.442695, %v3434_v23  ;;  %v238_v23 = vadd.f32 %v235_v28, %v8974_v39 }
 0x7c2   :  { %v6938_v54 = vmul.f32 -1.442695, %v3441_v46 }
 0x7c3   :  { %v8432_v21 = vpop.eup %8431  ;;  %8435 = vpow2.f32 %v6937_v41 }
 0x7c4   :  { %v3268_v47 = vadd.f32 1.0, %v8432_v21  ;;  %v8434_v49 = vpop.eup %8433 }
 0x7c5   :  { %v3275_v26 = vadd.f32 1.0, %v8434_v49 }
 0x7c6   :  { %8437 = vrcp.f32 %v3268_v47 }
 0x7c7   :  { %8439 = vpow2.f32 %v6938_v54 }
 0x7cd   :  { %v8436_v38 = vpop.eup %8435 }
 0x7ce   :  { %v3438_v52 = vadd.f32 1.0, %v8436_v38 }
 0x7d0   :  { %v8438_v53 = vpop.eup %8437  ;;  %8441 = vrcp.f32 %v3438_v52 }
 0x7d1   :  { %v3278_v27 = vmul.f32 %v8438_v53, %v3261_v57  ;;  %8443 = vrcp.f32 %v3275_v26  ;;  %v8440_v59 = vpop.eup %8439  ;;  %v9430_v26 = vpop.permute.xlu1 %3287 }
 0x7d2   :  { %v3445_v17 = vadd.f32 1.0, %v8440_v59  ;;  %vm3289_vm9 = vcmp.eq.s32.totalorder %v9430_v26, 1 }
 0x7d3   :  { %v3279_v4 = vadd.f32 %v3278_v27, %v3117_v56 }
 0x7d5   :  { %8445 = vtanh.f32 %v3279_v4 }
 0x7d6   :  { %8447 = vrcp.f32 %v3445_v17  ;;  %v245_v17 = vpop.permute.xlu1 %244 }
 0x7da   :  { %v8442_v20 = vpop.eup %8441 }
 0x7db   :  { %v8444_v15 = vpop.eup %8443  ;;  %v3448_v41 = vmul.f32 %v8442_v20, %v3431_v31  ;;  %v247_v31 = vmul.f32 %v245_v17, %v8942_v63 }
 0x7dc   :  { %v3281_v46 = vsub.f32 1.0, %v8444_v15  ;;  %v3283_v47 = vmul.f32 %v8444_v15, %v9384_v3 }
 0x7dd   :  { %v3449_v32 = vadd.f32 %v3448_v41, %v238_v23  ;;  %v248_v23 = vmul.f32 %v245_v17, %v8945_v5  ;;  %v250_v41 = vadd.f32 %v247_v31, %v8948_v7 }
 0x7df   :  { %v8446_v21 = vpop.eup %8445  ;;  %8449 = vtanh.f32 %v3449_v32 }
 0x7e0   :  { %v3282_v58 = vmul.f32 %v8446_v21, %v3281_v46  ;;  %v8448_v49 = vpop.eup %8447 }
 0x7e1   :  { %v3451_v38 = vsub.f32 1.0, %v8448_v49  ;;  %v3453_v52 = vmul.f32 %v8448_v49, %v9364_v29  ;;  %v251_v49 = vadd.f32 %v248_v23, %v8958_v12 }
 0x7e2   :  { %v3284_v54 = vadd.f32 %v3283_v47, %v3282_v58 }
 0x7e9   :  { %v8450_v55 = vpop.eup %8449 }
 0x7ea   :  { %v3452_v61 = vmul.f32 %v8450_v55, %v3451_v38 }
 0x7ec   :  { %v3454_v57 = vadd.f32 %v3453_v52, %v3452_v61 }
 0x7ee   :  { %v9437_v53 = vsel %vm3289_vm9, %v3454_v57, %v9364_v29  ;;  %v9457_v29 = vsel %vm2809_vm8, %v3284_v54, %v9384_v3 }
 0x7ef   :  { %6939 = vmatmul.mubr.msk.f32.vlgmr.msra.gmra.mrb[26].mxu0 %vm351_vm3, %v9437_v53  ;;  %7433 = vmatmul.mubr.msk.f32.vlgmr.msra.gmra.mrb[38].mxu1 %vm351_vm3, %v9437_v53 }
 0x7f0   :  { %7943 = vmatpush1.bf16.msra.mxu0 %v8982_v9  ;;  %7950 = vmatpush3.bf16.msra.mxu1 %v8984_v13 }
 0x7f1   :  { %7945 = vmatprep.subr.bf16.mxu0 %v8986_v16  ;;  %7951 = vmatprep.subr.bf16.mxu1 %v8710_v2 }
 0x7f2   :  { %7443 = vmatprep.mubr.msk.f32.mxu1 %vm8711_vm0, %v8709_v1  ;;  %3667 = vmatprep.mubr.f32.mxu0 %v8709_v1 }
 0x7f4   :  { %7947 = vmatpush1.bf16.msra.mxu0 %v8998_v24  ;;  %7953 = vmatpush3.bf16.msra.mxu1 %v9000_v25 }
 0x7f5   :  { %7955 = vmatprep.subr.bf16.mxu0 %v8859_v6  ;;  %7962 = vmatprep.subr.bf16.mxu1 %v8710_v2 }
 0x7f7   :  { %7444 = vmatmul.mubr.msk.f32.vlgmr.msra.gmra.mrb[40].mxu1 %vm351_vm3, %v9457_v29  ;;  %6941 = vmatmul.mubr.msk.f32.vlgmr.msra.gmra.mrb[26].mxu0 %vm351_vm3, %v9457_v29 }
 0x7f8   :  { %7957 = vmatpush1.bf16.msra.mxu0 %v8861_v10  ;;  %7964 = vmatpush3.bf16.msra.mxu1 %v8871_v19 }
 0x7f9   :  { %7959 = vmatprep.subr.bf16.mxu0 %v8864_v14  ;;  %7965 = vmatprep.subr.bf16.mxu1 %v8710_v2 }
 0x7fa   :  { %3837 = vmatprep.mubr.f32.mxu0 %v8709_v1  ;;  %7454 = vmatprep.mubr.msk.f32.mxu1 %vm8711_vm0, %v8709_v1 }
 0x7fc   :  { %7961 = vmatpush1.bf16.msra.mxu0 %v8869_v18  ;;  %7967 = vmatpush3.bf16.msra.mxu1 %v8876_v22 }
 0x7fd   :  { %7969 = vmatprep.subr.bf16.mxu0 %v8892_v30  ;;  %7976 = vmatprep.subr.bf16.mxu1 %v8710_v2 }
 0x7ff   :  { %6945 = vmatmul.mubr.msk.f32.vlgmr.msra.gmra.mrb[28].mxu0 %vm351_vm3, %v9437_v53  ;;  %7455 = vmatmul.mubr.msk.f32.vlgmr.msra.gmra.mrb[42].mxu1 %vm351_vm3, %v9437_v53 }
 0x800   :  { %7971 = vmatpush1.bf16.msra.mxu0 %v8896_v36  ;;  %7978 = vmatpush3.bf16.msra.mxu1 %v8898_v37 }
 0x801   :  { %7973 = vmatprep.subr.bf16.mxu0 %v8903_v40  ;;  %7979 = vmatprep.subr.bf16.mxu1 %v8710_v2 }
 0x802   :  { %4003 = vmatprep.mubr.f32.mxu0 %v8709_v1  ;;  %7465 = vmatprep.mubr.msk.f32.mxu1 %vm8711_vm0, %v8709_v1 }
 0x804   :  { %7975 = vmatpush1.bf16.msra.mxu0 %v8906_v44  ;;  %7981 = vmatpush3.bf16.msra.mxu1 %v8908_v48 }
 0x805   :  { %7983 = vmatprep.subr.bf16.mxu0 %v8914_v51  ;;  %7990 = vmatprep.subr.bf16.mxu1 %v8710_v2 }
 0x8c2   :  { %v3596_v0 = vpop.f32.mrb[38].mxu1 }
 0x8c3   :  { %v7434_v3 = vpop.f32.mrb[39].mxu1  ;;  %v3597_v23 = vadd.f32 %v3596_v0, %v9059_v50 }
 0x8ca   :  { %v3740_v56 = vpop.f32.mrb[40].mxu1  ;;  %v3669_v27 = vpop.f32.mrb[26].mxu0 }
 0x8cb   :  { %v8229_v4 = vadd.f32 %v9043_v42, %v3669_v27  ;;  %v7445_v59 = vpop.f32.mrb[41].mxu1  ;;  %v3671_v28 = vpop.f32.mrb[27].mxu0 }
 0x8cc   :  { %v8231_v15 = vadd.f32 %v9045_v43, %v3671_v28 }
 0x8cd   :  { %v6943_v20 = vmul.f32 -1.442695, %v8229_v4 }
 0x8ce   :  { %v6944_v32 = vmul.f32 -1.442695, %v8231_v15 }
 0x8cf   :  { %8451 = vpow2.f32 %v6943_v20  ;;  %v3741_v20 = vadd.f32 %v3740_v56, %v9056_v45 }
 0x8d0   :  { %8453 = vpow2.f32 %v6944_v32 }
 0x8d2   :  { %v3839_v46 = vpop.f32.mrb[28].mxu0  ;;  %v3910_v21 = vpop.f32.mrb[42].mxu1 }
 0x8d3   :  { %v3840_v58 = vadd.f32 %v3839_v46, %v8951_v8  ;;  %v3841_v47 = vpop.f32.mrb[29].mxu0  ;;  %v7456_v54 = vpop.f32.mrb[43].mxu1 }
 0x8d4   :  { %v3842_v38 = vadd.f32 %v3841_v47, %v8955_v11  ;;  %v3911_v54 = vadd.f32 %v3910_v21, %v8971_v35 }
 0x8d5   :  { %v3914_v55 = vadd.f32 %v3840_v58, %v250_v41  ;;  %v249_v58 = vmul.f32 %v245_v17, %v8968_v34 }
 0x8d6   :  { %v3921_v52 = vadd.f32 %v3842_v38, %v251_v49 }
 0x8d7   :  { %v6947_v61 = vmul.f32 -1.442695, %v3914_v55  ;;  %v252_v55 = vadd.f32 %v249_v58, %v8974_v39 }
 0x8d8   :  { %v6948_v27 = vmul.f32 -1.442695, %v3921_v52 }
 0x8d9   :  { %v8452_v57 = vpop.eup %8451  ;;  %8455 = vpow2.f32 %v6947_v61 }
 0x8da   :  { %v3748_v3 = vadd.f32 1.0, %v8452_v57  ;;  %v8454_v4 = vpop.eup %8453 }
 0x8db   :  { %v3755_v28 = vadd.f32 1.0, %v8454_v4 }
 0x8dc   :  { %8457 = vrcp.f32 %v3748_v3 }
 0x8dd   :  { %8459 = vpow2.f32 %v6948_v27 }
 0x8e3   :  { %v8456_v59 = vpop.eup %8455 }
 0x8e4   :  { %v3918_v31 = vadd.f32 1.0, %v8456_v59 }
 0x8e6   :  { %v8458_v15 = vpop.eup %8457  ;;  %8461 = vrcp.f32 %v3918_v31 }
 0x8e7   :  { %v3758_v41 = vmul.f32 %v8458_v15, %v3741_v20  ;;  %8463 = vrcp.f32 %v3755_v28  ;;  %v8460_v46 = vpop.eup %8459  ;;  %v9503_v28 = vpop.permute.xlu0 %3767 }
 0x8e8   :  { %v3925_v47 = vadd.f32 1.0, %v8460_v46  ;;  %vm3769_vm10 = vcmp.eq.s32.totalorder %v9503_v28, 1 }
 0x8e9   :  { %v3759_v32 = vadd.f32 %v3758_v41, %v3597_v23 }
 0x8eb   :  { %8465 = vtanh.f32 %v3759_v32 }
 0x8ec   :  { %8467 = vrcp.f32 %v3925_v47  ;;  %v259_v47 = vpop.permute.xlu1 %258 }
 0x8f0   :  { %v8462_v49 = vpop.eup %8461 }
 0x8f1   :  { %v8464_v38 = vpop.eup %8463  ;;  %v3928_v61 = vmul.f32 %v8462_v49, %v3911_v54  ;;  %v261_v54 = vmul.f32 %v259_v47, %v8942_v63 }
 0x8f2   :  { %v3761_v52 = vsub.f32 1.0, %v8464_v38  ;;  %v3763_v3 = vmul.f32 %v8464_v38, %v9457_v29 }
 0x8f3   :  { %v3929_v56 = vadd.f32 %v3928_v61, %v252_v55  ;;  %v262_v55 = vmul.f32 %v259_v47, %v8945_v5  ;;  %v264_v61 = vadd.f32 %v261_v54, %v8948_v7 }
 0x8f5   :  { %v8466_v57 = vpop.eup %8465  ;;  %8469 = vtanh.f32 %v3929_v56 }
 0x8f6   :  { %v3762_v0 = vmul.f32 %v8466_v57, %v3761_v52  ;;  %v8468_v4 = vpop.eup %8467 }
 0x8f7   :  { %v3931_v59 = vsub.f32 1.0, %v8468_v4  ;;  %v3933_v31 = vmul.f32 %v8468_v4, %v9437_v53  ;;  %v265_v4 = vadd.f32 %v262_v55, %v8958_v12 }
 0x8f8   :  { %v3764_v27 = vadd.f32 %v3763_v3, %v3762_v0 }
 0x8ff   :  { %v8470_v17 = vpop.eup %8469 }
 0x900   :  { %v3932_v21 = vmul.f32 %v8470_v17, %v3931_v59 }
 0x902   :  { %v3934_v20 = vadd.f32 %v3933_v31, %v3932_v21 }
 0x904   :  { %v9510_v15 = vsel %vm3769_vm10, %v3934_v20, %v9437_v53  ;;  %v9530_v53 = vsel %vm3289_vm9, %v3764_v27, %v9457_v29 }
 0x905   :  { %6949 = vmatmul.mubr.msk.f32.vlgmr.msra.gmra.mrb[30].mxu0 %vm351_vm3, %v9510_v15  ;;  %7466 = vmatmul.mubr.msk.f32.vlgmr.msra.gmra.mrb[44].mxu1 %vm351_vm3, %v9510_v15 }
 0x906   :  { %7985 = vmatpush1.bf16.msra.mxu0 %v8982_v9  ;;  %7992 = vmatpush3.bf16.msra.mxu1 %v8984_v13 }
 0x907   :  { %7987 = vmatprep.subr.bf16.mxu0 %v8986_v16  ;;  %7993 = vmatprep.subr.bf16.mxu1 %v8710_v2 }
 0x908   :  { %7476 = vmatprep.mubr.msk.f32.mxu1 %vm8711_vm0, %v8709_v1  ;;  %4147 = vmatprep.mubr.f32.mxu0 %v8709_v1 }
 0x90a   :  { %7989 = vmatpush1.bf16.msra.mxu0 %v8998_v24  ;;  %7995 = vmatpush3.bf16.msra.mxu1 %v9000_v25 }
 0x90b   :  { %7997 = vmatprep.subr.bf16.mxu0 %v8859_v6  ;;  %8004 = vmatprep.subr.bf16.mxu1 %v8710_v2 }
 0x90d   :  { %7477 = vmatmul.mubr.msk.f32.vlgmr.msra.gmra.mrb[46].mxu1 %vm351_vm3, %v9530_v53  ;;  %6951 = vmatmul.mubr.msk.f32.vlgmr.msra.gmra.mrb[30].mxu0 %vm351_vm3, %v9530_v53 }
 0x90e   :  { %7999 = vmatpush1.bf16.msra.mxu0 %v8861_v10  ;;  %8006 = vmatpush3.bf16.msra.mxu1 %v8871_v19 }
 0x90f   :  { %8001 = vmatprep.subr.bf16.mxu0 %v8864_v14  ;;  %8007 = vmatprep.subr.bf16.mxu1 %v8710_v2 }
 0x910   :  { %4317 = vmatprep.mubr.f32.mxu0 %v8709_v1  ;;  %7487 = vmatprep.mubr.msk.f32.mxu1 %vm8711_vm0, %v8709_v1 }
 0x912   :  { %8003 = vmatpush1.bf16.msra.mxu0 %v8869_v18  ;;  %8009 = vmatpush3.bf16.msra.mxu1 %v8876_v22 }
 0x913   :  { %8011 = vmatprep.subr.bf16.mxu0 %v8892_v30  ;;  %8018 = vmatprep.subr.bf16.mxu1 %v8710_v2 }
 0x915   :  { %6955 = vmatmul.mubr.msk.f32.vlgmr.msra.gmra.mrb[32].mxu0 %vm351_vm3, %v9510_v15  ;;  %7488 = vmatmul.mubr.msk.f32.vlgmr.msra.gmra.mrb[48].mxu1 %vm351_vm3, %v9510_v15 }
 0x916   :  { %8013 = vmatpush1.bf16.msra.mxu0 %v8896_v36  ;;  %8020 = vmatpush3.bf16.msra.mxu1 %v8898_v37 }
 0x917   :  { %8015 = vmatprep.subr.bf16.mxu0 %v8903_v40  ;;  %8021 = vmatprep.subr.bf16.mxu1 %v8710_v2 }
 0x918   :  { %4483 = vmatprep.mubr.f32.mxu0 %v8709_v1  ;;  %7498 = vmatprep.mubr.msk.f32.mxu1 %vm8711_vm0, %v8709_v1 }
 0x91a   :  { %8017 = vmatpush1.bf16.msra.mxu0 %v8906_v44  ;;  %8023 = vmatpush3.bf16.msra.mxu1 %v8908_v48 }
 0x91b   :  { %8025 = vmatprep.subr.bf16.mxu0 %v8914_v51  ;;  %8032 = vmatprep.subr.bf16.mxu1 %v8710_v2 }
 0x9d8   :  { %v4076_v26 = vpop.f32.mrb[44].mxu1 }
 0x9d9   :  { %v7467_v29 = vpop.f32.mrb[45].mxu1  ;;  %v4077_v55 = vadd.f32 %v4076_v26, %v9059_v50 }
 0x9e0   :  { %v4220_v23 = vpop.f32.mrb[46].mxu1  ;;  %v4149_v41 = vpop.f32.mrb[30].mxu0 }
 0x9e1   :  { %v8233_v32 = vadd.f32 %v9043_v42, %v4149_v41  ;;  %v7478_v46 = vpop.f32.mrb[47].mxu1  ;;  %v4151_v58 = vpop.f32.mrb[31].mxu0 }
 0x9e2   :  { %v8235_v38 = vadd.f32 %v9045_v43, %v4151_v58 }
 0x9e3   :  { %v6953_v49 = vmul.f32 -1.442695, %v8233_v32 }
 0x9e4   :  { %v6954_v56 = vmul.f32 -1.442695, %v8235_v38 }
 0x9e5   :  { %8471 = vpow2.f32 %v6953_v49  ;;  %v4221_v49 = vadd.f32 %v4220_v23, %v9056_v45 }
 0x9e6   :  { %8473 = vpow2.f32 %v6954_v56 }
 0x9e8   :  { %v4319_v52 = vpop.f32.mrb[32].mxu0  ;;  %v4390_v57 = vpop.f32.mrb[48].mxu1 }
 0x9e9   :  { %v4320_v0 = vadd.f32 %v4319_v52, %v8951_v8  ;;  %v4321_v3 = vpop.f32.mrb[33].mxu0  ;;  %v7489_v27 = vpop.f32.mrb[49].mxu1 }
 0x9ea   :  { %v4322_v59 = vadd.f32 %v4321_v3, %v8955_v11  ;;  %v4391_v27 = vadd.f32 %v4390_v57, %v8971_v35 }
 0x9eb   :  { %v4394_v17 = vadd.f32 %v4320_v0, %v264_v61  ;;  %v263_v0 = vmul.f32 %v259_v47, %v8968_v34 }
 0x9ec   :  { %v4401_v31 = vadd.f32 %v4322_v59, %v265_v4 }
 0x9ed   :  { %v6957_v21 = vmul.f32 -1.442695, %v4394_v17  ;;  %v266_v17 = vadd.f32 %v263_v0, %v8974_v39 }
 0x9ee   :  { %v6958_v41 = vmul.f32 -1.442695, %v4401_v31 }
 0x9ef   :  { %v8472_v20 = vpop.eup %8471  ;;  %8475 = vpow2.f32 %v6957_v21 }
 0x9f0   :  { %v4228_v29 = vadd.f32 1.0, %v8472_v20  ;;  %v8474_v32 = vpop.eup %8473 }
 0x9f1   :  { %v4235_v58 = vadd.f32 1.0, %v8474_v32 }
 0x9f2   :  { %8477 = vrcp.f32 %v4228_v29 }
 0x9f3   :  { %8479 = vpow2.f32 %v6958_v41 }
 0x9f9   :  { %v8476_v46 = vpop.eup %8475 }
 0x9fa   :  { %v4398_v54 = vadd.f32 1.0, %v8476_v46 }
 0x9fc   :  { %v8478_v38 = vpop.eup %8477  ;;  %8481 = vrcp.f32 %v4398_v54 }
 0x9fd   :  { %v4238_v61 = vmul.f32 %v8478_v38, %v4221_v49  ;;  %8483 = vrcp.f32 %v4235_v58  ;;  %v8480_v52 = vpop.eup %8479  ;;  %v9576_v58 = vpop.permute.xlu1 %4247 }
 0x9fe   :  { %v4405_v3 = vadd.f32 1.0, %v8480_v52  ;;  %vm4249_vm11 = vcmp.eq.s32.totalorder %v9576_v58, 1 }
 0x9ff   :  { %v4239_v56 = vadd.f32 %v4238_v61, %v4077_v55 }
 0xa01   :  { %8485 = vtanh.f32 %v4239_v56 }
 0xa02   :  { %8487 = vrcp.f32 %v4405_v3  ;;  %v273_v3 = vpop.permute.xlu0 %272 }
 0xa06   :  { %v8482_v4 = vpop.eup %8481 }
 0xa07   :  { %v8484_v59 = vpop.eup %8483  ;;  %v4408_v21 = vmul.f32 %v8482_v4, %v4391_v27  ;;  %v275_v27 = vmul.f32 %v273_v3, %v8942_v63 }
 0xa08   :  { %v4241_v31 = vsub.f32 1.0, %v8484_v59  ;;  %v4243_v29 = vmul.f32 %v8484_v59, %v9530_v53 }
 0xa09   :  { %v4409_v23 = vadd.f32 %v4408_v21, %v266_v17  ;;  %v276_v17 = vmul.f32 %v273_v3, %v8945_v5  ;;  %v278_v21 = vadd.f32 %v275_v27, %v8948_v7 }
 0xa0b   :  { %v8486_v20 = vpop.eup %8485  ;;  %8489 = vtanh.f32 %v4409_v23 }
 0xa0c   :  { %v4242_v26 = vmul.f32 %v8486_v20, %v4241_v31  ;;  %v8488_v32 = vpop.eup %8487 }
 0xa0d   :  { %v4411_v46 = vsub.f32 1.0, %v8488_v32  ;;  %v4413_v54 = vmul.f32 %v8488_v32, %v9510_v15  ;;  %v279_v32 = vadd.f32 %v276_v17, %v8958_v12 }
 0xa0e   :  { %v4244_v41 = vadd.f32 %v4243_v29, %v4242_v26 }
 0xa15   :  { %v8490_v47 = vpop.eup %8489 }
 0xa16   :  { %v4412_v57 = vmul.f32 %v8490_v47, %v4411_v46 }
 0xa18   :  { %v4414_v49 = vadd.f32 %v4413_v54, %v4412_v57 }
 0xa1a   :  { %v9583_v38 = vsel %vm4249_vm11, %v4414_v49, %v9510_v15  ;;  %v9603_v15 = vsel %vm3769_vm10, %v4244_v41, %v9530_v53 }
 0xa1b   :  { %6959 = vmatmul.mubr.msk.f32.vlgmr.msra.gmra.mrb[34].mxu0 %vm351_vm3, %v9583_v38  ;;  %7499 = vmatmul.mubr.msk.f32.vlgmr.msra.gmra.mrb[50].mxu1 %vm351_vm3, %v9583_v38 }
 0xa1c   :  { %8027 = vmatpush1.bf16.msra.mxu0 %v8982_v9  ;;  %8034 = vmatpush3.bf16.msra.mxu1 %v8984_v13 }
 0xa1d   :  { %8029 = vmatprep.subr.bf16.mxu0 %v8986_v16  ;;  %8035 = vmatprep.subr.bf16.mxu1 %v8710_v2 }
 0xa1e   :  { %7509 = vmatprep.mubr.msk.f32.mxu1 %vm8711_vm0, %v8709_v1  ;;  %4627 = vmatprep.mubr.f32.mxu0 %v8709_v1 }
 0xa20   :  { %8031 = vmatpush1.bf16.msra.mxu0 %v8998_v24  ;;  %8037 = vmatpush3.bf16.msra.mxu1 %v9000_v25 }
 0xa21   :  { %8039 = vmatprep.subr.bf16.mxu0 %v8859_v6  ;;  %8046 = vmatprep.subr.bf16.mxu1 %v8710_v2 }
 0xa23   :  { %7510 = vmatmul.mubr.msk.f32.vlgmr.msra.gmra.mrb[52].mxu1 %vm351_vm3, %v9603_v15  ;;  %6961 = vmatmul.mubr.msk.f32.vlgmr.msra.gmra.mrb[34].mxu0 %vm351_vm3, %v9603_v15 }
 0xa24   :  { %8041 = vmatpush1.bf16.msra.mxu0 %v8861_v10  ;;  %8048 = vmatpush3.bf16.msra.mxu1 %v8871_v19 }
 0xa25   :  { %8043 = vmatprep.subr.bf16.mxu0 %v8864_v14  ;;  %8049 = vmatprep.subr.bf16.mxu1 %v8710_v2 }
 0xa26   :  { %4797 = vmatprep.mubr.f32.mxu0 %v8709_v1  ;;  %7520 = vmatprep.mubr.msk.f32.mxu1 %vm8711_vm0, %v8709_v1 }
 0xa28   :  { %8045 = vmatpush1.bf16.msra.mxu0 %v8869_v18  ;;  %8051 = vmatpush3.bf16.msra.mxu1 %v8876_v22 }
 0xa29   :  { %8053 = vmatprep.subr.bf16.mxu0 %v8892_v30  ;;  %8060 = vmatprep.subr.bf16.mxu1 %v8710_v2 }
 0xa2b   :  { %6965 = vmatmul.mubr.msk.f32.vlgmr.msra.gmra.mrb[36].mxu0 %vm351_vm3, %v9583_v38  ;;  %7521 = vmatmul.mubr.msk.f32.vlgmr.msra.gmra.mrb[54].mxu1 %vm351_vm3, %v9583_v38 }
 0xa2c   :  { %8055 = vmatpush1.bf16.msra.mxu0 %v8896_v36  ;;  %8062 = vmatpush3.bf16.msra.mxu1 %v8898_v37 }
 0xa2d   :  { %8057 = vmatprep.subr.bf16.mxu0 %v8903_v40  ;;  %8063 = vmatprep.subr.bf16.mxu1 %v8710_v2 }
 0xa2e   :  { %4963 = vmatprep.mubr.f32.mxu0 %v8709_v1  ;;  %7531 = vmatprep.mubr.msk.f32.mxu1 %vm8711_vm0, %v8709_v1 }
 0xa30   :  { %8059 = vmatpush1.bf16.msra.mxu0 %v8906_v44  ;;  %8065 = vmatpush3.bf16.msra.mxu1 %v8908_v48 }
 0xa31   :  { %8067 = vmatprep.subr.bf16.mxu0 %v8914_v51  ;;  %8074 = vmatprep.subr.bf16.mxu1 %v8710_v2 }
 0xaee   :  { %v4556_v28 = vpop.f32.mrb[50].mxu1 }
 0xaef   :  { %v7500_v53 = vpop.f32.mrb[51].mxu1  ;;  %v4557_v17 = vadd.f32 %v4556_v28, %v9059_v50 }
 0xaf6   :  { %v4700_v55 = vpop.f32.mrb[52].mxu1  ;;  %v4629_v61 = vpop.f32.mrb[34].mxu0 }
 0xaf7   :  { %v8237_v56 = vadd.f32 %v9043_v42, %v4629_v61  ;;  %v7511_v52 = vpop.f32.mrb[53].mxu1  ;;  %v4631_v0 = vpop.f32.mrb[35].mxu0 }
 0xaf8   :  { %v8239_v59 = vadd.f32 %v9045_v43, %v4631_v0 }
 0xaf9   :  { %v6963_v4 = vmul.f32 -1.442695, %v8237_v56 }
 0xafa   :  { %v6964_v23 = vmul.f32 -1.442695, %v8239_v59 }
 0xafb   :  { %8491 = vpow2.f32 %v6963_v4  ;;  %v4701_v4 = vadd.f32 %v4700_v55, %v9056_v45 }
 0xafc   :  { %8493 = vpow2.f32 %v6964_v23 }
 0xafe   :  { %v4799_v31 = vpop.f32.mrb[36].mxu0  ;;  %v4870_v20 = vpop.f32.mrb[54].mxu1 }
 0xaff   :  { %v4800_v26 = vadd.f32 %v4799_v31, %v8951_v8  ;;  %v4801_v29 = vpop.f32.mrb[37].mxu0  ;;  %v7522_v41 = vpop.f32.mrb[55].mxu1 }
 0xb00   :  { %v4802_v46 = vadd.f32 %v4801_v29, %v8955_v11  ;;  %v4871_v41 = vadd.f32 %v4870_v20, %v8971_v35 }
 0xb01   :  { %v4874_v47 = vadd.f32 %v4800_v26, %v278_v21  ;;  %v277_v26 = vmul.f32 %v273_v3, %v8968_v34 }
 0xb02   :  { %v4881_v54 = vadd.f32 %v4802_v46, %v279_v32 }
 0xb03   :  { %v6967_v57 = vmul.f32 -1.442695, %v4874_v47  ;;  %v280_v47 = vadd.f32 %v277_v26, %v8974_v39 }
 0xb04   :  { %v6968_v61 = vmul.f32 -1.442695, %v4881_v54 }
 0xb05   :  { %v8492_v49 = vpop.eup %8491  ;;  %8495 = vpow2.f32 %v6967_v57 }
 0xb06   :  { %v4708_v53 = vadd.f32 1.0, %v8492_v49  ;;  %v8494_v56 = vpop.eup %8493 }
 0xb07   :  { %v4715_v0 = vadd.f32 1.0, %v8494_v56 }
 0xb08   :  { %8497 = vrcp.f32 %v4708_v53 }
 0xb09   :  { %8499 = vpow2.f32 %v6968_v61 }
 0xb0f   :  { %v8496_v52 = vpop.eup %8495 }
 0xb10   :  { %v4878_v27 = vadd.f32 1.0, %v8496_v52 }
 0xb12   :  { %v8498_v59 = vpop.eup %8497  ;;  %8501 = vrcp.f32 %v4878_v27 }
 0xb13   :  { %v4718_v21 = vmul.f32 %v8498_v59, %v4701_v4  ;;  %8503 = vrcp.f32 %v4715_v0  ;;  %v8500_v31 = vpop.eup %8499  ;;  %v9649_v0 = vpop.permute.xlu1 %4727 }
 0xb14   :  { %v4885_v29 = vadd.f32 1.0, %v8500_v31  ;;  %vm4729_vm12 = vcmp.eq.s32.totalorder %v9649_v0, 1 }
 0xb15   :  { %v4719_v23 = vadd.f32 %v4718_v21, %v4557_v17 }
 0xb17   :  { %8505 = vtanh.f32 %v4719_v23 }
 0xb18   :  { %8507 = vrcp.f32 %v4885_v29  ;;  %v287_v29 = vpop.permute.xlu1 %286 }
 0xb1c   :  { %v8502_v32 = vpop.eup %8501 }
 0xb1d   :  { %v8504_v46 = vpop.eup %8503  ;;  %v4888_v57 = vmul.f32 %v8502_v32, %v4871_v41  ;;  %v289_v41 = vmul.f32 %v287_v29, %v8942_v63 }
 0xb1e   :  { %v4721_v54 = vsub.f32 1.0, %v8504_v46  ;;  %v4723_v53 = vmul.f32 %v8504_v46, %v9603_v15 }
 0xb1f   :  { %v4889_v55 = vadd.f32 %v4888_v57, %v280_v47  ;;  %v290_v47 = vmul.f32 %v287_v29, %v8945_v5  ;;  %v292_v57 = vadd.f32 %v289_v41, %v8948_v7 }
 0xb21   :  { %v8506_v49 = vpop.eup %8505  ;;  %8509 = vtanh.f32 %v4889_v55 }
 0xb22   :  { %v4722_v28 = vmul.f32 %v8506_v49, %v4721_v54  ;;  %v8508_v56 = vpop.eup %8507 }
 0xb23   :  { %v4891_v52 = vsub.f32 1.0, %v8508_v56  ;;  %v4893_v27 = vmul.f32 %v8508_v56, %v9583_v38  ;;  %v293_v56 = vadd.f32 %v290_v47, %v8958_v12 }
 0xb24   :  { %v4724_v61 = vadd.f32 %v4723_v53, %v4722_v28 }
 0xb2b   :  { %v8510_v3 = vpop.eup %8509 }
 0xb2c   :  { %v4892_v20 = vmul.f32 %v8510_v3, %v4891_v52 }
 0xb2e   :  { %v4894_v4 = vadd.f32 %v4893_v27, %v4892_v20 }
 0xb30   :  { %v9656_v59 = vsel %vm4729_vm12, %v4894_v4, %v9583_v38  ;;  %v9676_v38 = vsel %vm4249_vm11, %v4724_v61, %v9603_v15 }
 0xb31   :  { %6969 = vmatmul.mubr.msk.f32.vlgmr.msra.gmra.mrb[38].mxu0 %vm351_vm3, %v9656_v59  ;;  %7532 = vmatmul.mubr.msk.f32.vlgmr.msra.gmra.mrb[56].mxu1 %vm351_vm3, %v9656_v59 }
 0xb32   :  { %8069 = vmatpush1.bf16.msra.mxu0 %v8982_v9  ;;  %8076 = vmatpush3.bf16.msra.mxu1 %v8984_v13 }
 0xb33   :  { %8071 = vmatprep.subr.bf16.mxu0 %v8986_v16  ;;  %8077 = vmatprep.subr.bf16.mxu1 %v8710_v2 }
 0xb34   :  { %7542 = vmatprep.mubr.msk.f32.mxu1 %vm8711_vm0, %v8709_v1  ;;  %5107 = vmatprep.mubr.f32.mxu0 %v8709_v1 }
 0xb36   :  { %8073 = vmatpush1.bf16.msra.mxu0 %v8998_v24  ;;  %8079 = vmatpush3.bf16.msra.mxu1 %v9000_v25 }
 0xb37   :  { %8081 = vmatprep.subr.bf16.mxu0 %v8859_v6  ;;  %8088 = vmatprep.subr.bf16.mxu1 %v8710_v2 }
 0xb39   :  { %7543 = vmatmul.mubr.msk.f32.vlgmr.msra.gmra.mrb[58].mxu1 %vm351_vm3, %v9676_v38  ;;  %6971 = vmatmul.mubr.msk.f32.vlgmr.msra.gmra.mrb[38].mxu0 %vm351_vm3, %v9676_v38 }
 0xb3a   :  { %8083 = vmatpush1.bf16.msra.mxu0 %v8861_v10  ;;  %8090 = vmatpush3.bf16.msra.mxu1 %v8871_v19 }
 0xb3b   :  { %8085 = vmatprep.subr.bf16.mxu0 %v8864_v14  ;;  %8091 = vmatprep.subr.bf16.mxu1 %v8710_v2 }
 0xb3c   :  { %5277 = vmatprep.mubr.f32.mxu0 %v8709_v1  ;;  %7553 = vmatprep.mubr.msk.f32.mxu1 %vm8711_vm0, %v8709_v1 }
 0xb3e   :  { %8087 = vmatpush1.bf16.msra.mxu0 %v8869_v18  ;;  %8093 = vmatpush3.bf16.msra.mxu1 %v8876_v22 }
 0xb3f   :  { %8095 = vmatprep.subr.bf16.mxu0 %v8892_v30  ;;  %8102 = vmatprep.subr.bf16.mxu1 %v8710_v2 }
 0xb41   :  { %6975 = vmatmul.mubr.msk.f32.vlgmr.msra.gmra.mrb[40].mxu0 %vm351_vm3, %v9656_v59  ;;  %7554 = vmatmul.mubr.msk.f32.vlgmr.msra.gmra.mrb[60].mxu1 %vm351_vm3, %v9656_v59 }
 0xb42   :  { %8097 = vmatpush1.bf16.msra.mxu0 %v8896_v36  ;;  %8104 = vmatpush3.bf16.msra.mxu1 %v8898_v37 }
 0xb43   :  { %8099 = vmatprep.subr.bf16.mxu0 %v8903_v40  ;;  %8105 = vmatprep.subr.bf16.mxu1 %v8710_v2 }
 0xb44   :  { %5443 = vmatprep.mubr.f32.mxu0 %v8709_v1  ;;  %7564 = vmatprep.mubr.msk.f32.mxu1 %vm8711_vm0, %v8709_v1 }
 0xb46   :  { %8101 = vmatpush1.bf16.msra.mxu0 %v8906_v44  ;;  %8107 = vmatpush3.bf16.msra.mxu1 %v8908_v48 }
 0xb47   :  { %8109 = vmatprep.subr.bf16.mxu0 %v8914_v51  ;;  %8116 = vmatprep.subr.bf16.mxu1 %v8710_v2 }
 0xc04   :  { %v5036_v58 = vpop.f32.mrb[56].mxu1 }
 0xc05   :  { %v7533_v15 = vpop.f32.mrb[57].mxu1  ;;  %v5037_v47 = vadd.f32 %v5036_v58, %v9059_v50 }
 0xc0c   :  { %v5180_v17 = vpop.f32.mrb[58].mxu1  ;;  %v5109_v21 = vpop.f32.mrb[38].mxu0 }
 0xc0d   :  { %v8241_v23 = vadd.f32 %v9043_v42, %v5109_v21  ;;  %v7544_v31 = vpop.f32.mrb[59].mxu1  ;;  %v5111_v26 = vpop.f32.mrb[39].mxu0 }
 0xc0e   :  { %v8243_v46 = vadd.f32 %v9045_v43, %v5111_v26 }
 0xc0f   :  { %v6973_v32 = vmul.f32 -1.442695, %v8241_v23 }
 0xc10   :  { %v6974_v55 = vmul.f32 -1.442695, %v8243_v46 }
 0xc11   :  { %8511 = vpow2.f32 %v6973_v32  ;;  %v5181_v32 = vadd.f32 %v5180_v17, %v9056_v45 }
 0xc12   :  { %8513 = vpow2.f32 %v6974_v55 }
 0xc14   :  { %v5279_v54 = vpop.f32.mrb[40].mxu0  ;;  %v5350_v49 = vpop.f32.mrb[60].mxu1 }
 0xc15   :  { %v5280_v28 = vadd.f32 %v5279_v54, %v8951_v8  ;;  %v5281_v53 = vpop.f32.mrb[41].mxu0  ;;  %v7555_v61 = vpop.f32.mrb[61].mxu1 }
 0xc16   :  { %v5282_v52 = vadd.f32 %v5281_v53, %v8955_v11  ;;  %v5351_v61 = vadd.f32 %v5350_v49, %v8971_v35 }
 0xc17   :  { %v5354_v3 = vadd.f32 %v5280_v28, %v292_v57  ;;  %v291_v28 = vmul.f32 %v287_v29, %v8968_v34 }
 0xc18   :  { %v5361_v27 = vadd.f32 %v5282_v52, %v293_v56 }
 0xc19   :  { %v6977_v20 = vmul.f32 -1.442695, %v5354_v3  ;;  %v294_v3 = vadd.f32 %v291_v28, %v8974_v39 }
 0xc1a   :  { %v6978_v21 = vmul.f32 -1.442695, %v5361_v27 }
 0xc1b   :  { %v8512_v4 = vpop.eup %8511  ;;  %8515 = vpow2.f32 %v6977_v20 }
 0xc1c   :  { %v5188_v15 = vadd.f32 1.0, %v8512_v4  ;;  %v8514_v23 = vpop.eup %8513 }
 0xc1d   :  { %v5195_v26 = vadd.f32 1.0, %v8514_v23 }
 0xc1e   :  { %8517 = vrcp.f32 %v5188_v15 }
 0xc1f   :  { %8519 = vpow2.f32 %v6978_v21 }
 0xc25   :  { %v8516_v31 = vpop.eup %8515 }
 0xc26   :  { %v5358_v41 = vadd.f32 1.0, %v8516_v31 }
 0xc28   :  { %v8518_v46 = vpop.eup %8517  ;;  %8521 = vrcp.f32 %v5358_v41 }
 0xc29   :  { %v5198_v57 = vmul.f32 %v8518_v46, %v5181_v32  ;;  %8523 = vrcp.f32 %v5195_v26  ;;  %v8520_v54 = vpop.eup %8519  ;;  %v9722_v26 = vpop.permute.xlu0 %5207 }
 0xc2a   :  { %v5365_v53 = vadd.f32 1.0, %v8520_v54  ;;  %vm5209_vm13 = vcmp.eq.s32.totalorder %v9722_v26, 1  ;;  %v6166_v26 = vld [vmem:[%s9968_s9] sm:$0xff] }
 0xc2b   :  { %v5199_v55 = vadd.f32 %v5198_v57, %v5037_v47 }
 0xc2d   :  { %8525 = vtanh.f32 %v5199_v55 }
 0xc2e   :  { %8527 = vrcp.f32 %v5365_v53 }
 0xc32   :  { %v8522_v56 = vpop.eup %8521 }
 0xc33   :  { %v8524_v52 = vpop.eup %8523  ;;  %v5368_v20 = vmul.f32 %v8522_v56, %v5351_v61 }
 0xc34   :  { %v5201_v27 = vsub.f32 1.0, %v8524_v52  ;;  %v5203_v15 = vmul.f32 %v8524_v52, %v9676_v38 }
 0xc35   :  { %v5369_v17 = vadd.f32 %v5368_v20, %v294_v3 }
 0xc37   :  { %v8526_v4 = vpop.eup %8525  ;;  %8529 = vtanh.f32 %v5369_v17 }
 0xc38   :  { %v5202_v58 = vmul.f32 %v8526_v4, %v5201_v27  ;;  %v8528_v23 = vpop.eup %8527 }
 0xc39   :  { %v5371_v31 = vsub.f32 1.0, %v8528_v23  ;;  %v5373_v41 = vmul.f32 %v8528_v23, %v9656_v59 }
 0xc3a   :  { %v5204_v21 = vadd.f32 %v5203_v15, %v5202_v58 }
 0xc41   :  { %v8530_v29 = vpop.eup %8529 }
 0xc42   :  { %v5372_v49 = vmul.f32 %v8530_v29, %v5371_v31 }
 0xc44   :  { %v5374_v32 = vadd.f32 %v5373_v41, %v5372_v49 }
 0xc46   :  { %v9729_v46 = vsel %vm5209_vm13, %v5374_v32, %v9656_v59  ;;  %v9749_v59 = vsel %vm4729_vm12, %v5204_v21, %v9676_v38 }
 0xc47   :  { %6979 = vmatmul.mubr.msk.f32.vlgmr.msra.gmra.mrb[42].mxu0 %vm351_vm3, %v9729_v46  ;;  %7565 = vmatmul.mubr.msk.f32.vlgmr.msra.gmra.mrb[62].mxu1 %vm351_vm3, %v9729_v46 }
 0xc48   :  { %8111 = vmatpush1.bf16.msra.mxu0 %v8982_v9  ;;  %8118 = vmatpush3.bf16.msra.mxu1 %v8984_v13 }
 0xc49   :  { %8113 = vmatprep.subr.bf16.mxu0 %v8986_v16  ;;  %8119 = vmatprep.subr.bf16.mxu1 %v8710_v2 }
 0xc4a   :  { %7575 = vmatprep.mubr.msk.f32.mxu1 %vm8711_vm0, %v8709_v1  ;;  %5587 = vmatprep.mubr.f32.mxu0 %v8709_v1 }
 0xc4c   :  { %8115 = vmatpush1.bf16.msra.mxu0 %v8998_v24  ;;  %8121 = vmatpush3.bf16.msra.mxu1 %v9000_v25 }
 0xc4d   :  { %8123 = vmatprep.subr.bf16.mxu0 %v8859_v6  ;;  %8130 = vmatprep.subr.bf16.mxu1 %v8710_v2 }
 0xc4f   :  { %7576 = vmatmul.mubr.msk.f32.vlgmr.msra.gmra.mrb[64].mxu1 %vm351_vm3, %v9749_v59  ;;  %6981 = vmatmul.mubr.msk.f32.vlgmr.msra.gmra.mrb[42].mxu0 %vm351_vm3, %v9749_v59 }
 0xc50   :  { %8125 = vmatpush1.bf16.msra.mxu0 %v8861_v10  ;;  %8132 = vmatpush3.bf16.msra.mxu1 %v8871_v19 }
 0xc51   :  { %8127 = vmatprep.subr.bf16.mxu0 %v8864_v14  ;;  %8133 = vmatprep.subr.bf16.mxu1 %v8710_v2 }
 0xc52   :  { %5757 = vmatprep.mubr.f32.mxu0 %v8709_v1  ;;  %7586 = vmatprep.mubr.msk.f32.mxu1 %vm8711_vm0, %v8709_v1 }
 0xc54   :  { %8129 = vmatpush1.bf16.msra.mxu0 %v8869_v18  ;;  %8135 = vmatpush3.bf16.msra.mxu1 %v8876_v22 }
 0xc55   :  { %8137 = vmatprep.subr.bf16.mxu0 %v8892_v30  ;;  %8144 = vmatprep.subr.bf16.mxu1 %v8710_v2 }
 0xc57   :  { %6985 = vmatmul.mubr.msk.f32.vlgmr.msra.gmra.mrb[44].mxu0 %vm351_vm3, %v9729_v46  ;;  %7587 = vmatmul.mubr.msk.f32.vlgmr.msra.gmra.mrb[66].mxu1 %vm351_vm3, %v9729_v46 }
 0xc58   :  { %8139 = vmatpush1.bf16.msra.mxu0 %v8896_v36  ;;  %8146 = vmatpush3.bf16.msra.mxu1 %v8898_v37  ;;  %v301_v36 = vpop.permute.xlu1 %300 }
 0xc59   :  { %8141 = vmatprep.subr.bf16.mxu0 %v8903_v40  ;;  %8147 = vmatprep.subr.bf16.mxu1 %v8710_v2  ;;  %v303_v37 = vmul.f32 %v301_v36, %v8942_v63  ;;  %v305_v21 = vmul.f32 %v301_v36, %v8968_v34 }
 0xc5a   :  { %5923 = vmatprep.mubr.f32.mxu0 %v8709_v1  ;;  %7597 = vmatprep.mubr.msk.f32.mxu1 %vm8711_vm0, %v8709_v1 }
 0xc5b   :  { %v308_v41 = vadd.f32 %v305_v21, %v8974_v39 }
 0xc5c   :  { %8143 = vmatpush1.bf16.msra.mxu0 %v8906_v44  ;;  %8149 = vmatpush3.bf16.msra.mxu1 %v8908_v48  ;;  %v304_v48 = vmul.f32 %v301_v36, %v8945_v5  ;;  %v9795_v36 = vpop.permute.xlu1 %5687 }
 0xc5d   :  { %8151 = vmatprep.subr.bf16.mxu0 %v8914_v51  ;;  %8158 = vmatprep.subr.bf16.mxu1 %v8710_v2  ;;  %v306_v51 = vadd.f32 %v303_v37, %v8948_v7  ;;  %vm5689_vm14 = vcmp.eq.s32.totalorder %v9795_v36, 1 }
 0xc5e   :  { %v307_v28 = vadd.f32 %v304_v48, %v8958_v12  ;;  %v6249_v48 = vld [vmem:[%s9965_s6 + $0x8] sm:$0xff] }
 0xd1a   :  { %v5516_v6 = vpop.f32.mrb[62].mxu1 }
 0xd1b   :  { %v7566_v10 = vpop.f32.mrb[63].mxu1 }
 0xd22   :  { %v5660_v14 = vpop.f32.mrb[64].mxu1  ;;  %v5589_v18 = vpop.f32.mrb[42].mxu0 }
 0xd23   :  { %v8245_v19 = vadd.f32 %v9043_v42, %v5589_v18  ;;  %v7577_v22 = vpop.f32.mrb[65].mxu1  ;;  %v5591_v30 = vpop.f32.mrb[43].mxu0  ;;  %v5661_v27 = vadd.f32 %v5660_v14, %v9056_v45 }
 0xd24   :  { %v8247_v44 = vadd.f32 %v9045_v43, %v5591_v30 }
 0xd25   :  { %v6983_v40 = vmul.f32 -1.442695, %v8245_v19 }
 0xd26   :  { %v6984_v0 = vmul.f32 -1.442695, %v8247_v44 }
 0xd27   :  { %8531 = vpow2.f32 %v6983_v40 }
 0xd28   :  { %8533 = vpow2.f32 %v6984_v0  ;;  %v6248_v0 = vld [vmem:[%s9965_s6] sm:$0xff] }
 0xd2a   :  { %v5759_v38 = vpop.f32.mrb[44].mxu0  ;;  %v5830_v47 = vpop.f32.mrb[66].mxu1 }
 0xd2b   :  { %v5760_v57 = vadd.f32 %v5759_v38, %v8951_v8  ;;  %v5761_v55 = vpop.f32.mrb[45].mxu0  ;;  %v7588_v54 = vpop.f32.mrb[67].mxu1  ;;  %v5831_v31 = vadd.f32 %v5830_v47, %v8971_v35  ;;  %v6251_v47 = vld [vmem:[%s9965_s6 + $0x18] sm:$0xff] }
 0xd2c   :  { %v5762_v53 = vadd.f32 %v5761_v55, %v8955_v11  ;;  %v5517_v11 = vadd.f32 %v5516_v6, %v9059_v50  ;;  %v6169_v55 = vld [vmem:[%s9968_s9 + $0x18] sm:$0xff]  ;;  %v8172_v54 = vpack.c.bf16 %v6251_v47, %v6248_v0  ;;  %v6604_v47 = vld [vmem:[#allocation10 + $0x40] sm:$0xff] }
 0xd2d   :  { %v5834_v63 = vadd.f32 %v5760_v57, %v306_v51  ;;  %v6252_v51 = vld [vmem:[%s9965_s6 + $0x20] sm:$0xff]  ;;  %v6168_v57 = vld [vmem:[%s9968_s9 + $0x10] sm:$0xff] }
 0xd2e   :  { %v5841_v56 = vadd.f32 %v5762_v53, %v307_v28  ;;  %v8170_v38 = vpack.c.bf16 %v6252_v51, %v6249_v48  ;;  %v6255_v28 = vld [vmem:[%s9965_s6 + $0x38] sm:$0xff]  ;;  %v6258_v53 = vld [vmem:[%s9965_s6 + $0x50] sm:$0xff] }
 0xd2f   :  { %v6987_v61 = vmul.f32 -1.442695, %v5834_v63  ;;  %v8168_v63 = vpack.c.bf16 %v6169_v55, %v6168_v57  ;;  %v6606_v48 = vld [vmem:[#allocation10 + $0x50] sm:$0xff]  ;;  %v6607_v57 = vld [vmem:[#allocation10 + $0x58] sm:$0xff] }
 0xd30   :  { %v6988_v7 = vmul.f32 -1.442695, %v5841_v56  ;;  %v6254_v56 = vld [vmem:[%s9965_s6 + $0x30] sm:$0xff] }
 0xd31   :  { %v8532_v52 = vpop.eup %8531  ;;  %8535 = vpow2.f32 %v6987_v61  ;;  %v8174_v61 = vpack.c.bf16 %v6258_v53, %v6255_v28  ;;  %v6602_v51 = vld [vmem:[#allocation10 + $0x30] sm:$0xff]  ;;  %v6560_v28 = vld [vmem:[%s9967_s8] ss:$2 sm:$0x7] }
 0xd32   :  { %v5668_v5 = vadd.f32 1.0, %v8532_v52  ;;  %v8534_v3 = vpop.eup %8533  ;;  %v6257_v52 = vld [vmem:[%s9965_s6 + $0x48] sm:$0xff]  ;;  %v6565_v53 = vrot.slane %v6560_v28, %v8937_v60 }
 0xd33   :  { %v5675_v17 = vadd.f32 1.0, %v8534_v3 }
 0xd34   :  { %8537 = vrcp.f32 %v5668_v5  ;;  %v8176_v5 = vpack.c.bf16 %v6257_v52, %v6254_v56 }
 0xd35   :  { %8539 = vpow2.f32 %v6988_v7 }
 0xd3b   :  { %v8536_v20 = vpop.eup %8535 }
 0xd3c   :  { %v5838_v8 = vadd.f32 1.0, %v8536_v20 }
 0xd3e   :  { %v8538_v4 = vpop.eup %8537  ;;  %8541 = vrcp.f32 %v5838_v8 }
 0xd3f   :  { %v5678_v12 = vmul.f32 %v8538_v4, %v5661_v27  ;;  %8543 = vrcp.f32 %v5675_v17  ;;  %v8540_v15 = vpop.eup %8539 }
 0xd40   :  { %v5845_v23 = vadd.f32 1.0, %v8540_v15 }
 0xd41   :  { %v5679_v58 = vadd.f32 %v5678_v12, %v5517_v11 }
 0xd43   :  { %8545 = vtanh.f32 %v5679_v58 }
 0xd44   :  { %8547 = vrcp.f32 %v5845_v23 }
 0xd48   :  { %v8542_v29 = vpop.eup %8541 }
 0xd49   :  { %v8544_v49 = vpop.eup %8543  ;;  %v5848_v32 = vmul.f32 %v8542_v29, %v5831_v31 }
 0xd4a   :  { %v5681_v14 = vsub.f32 1.0, %v8544_v49  ;;  %v5683_v19 = vmul.f32 %v8544_v49, %v9749_v59 }
 0xd4b   :  { %v5849_v10 = vadd.f32 %v5848_v32, %v308_v41 }
 0xd4d   :  { %v8546_v18 = vpop.eup %8545  ;;  %8549 = vtanh.f32 %v5849_v10 }
 0xd4e   :  { %v5682_v6 = vmul.f32 %v8546_v18, %v5681_v14  ;;  %v8548_v30 = vpop.eup %8547  ;;  %v6250_v18 = vld [vmem:[%s9965_s6 + $0x10] sm:$0xff] }
 0xd4f   :  { %v5851_v37 = vsub.f32 1.0, %v8548_v30  ;;  %v5853_v40 = vmul.f32 %v8548_v30, %v9729_v46  ;;  %v6256_v30 = vld [vmem:[%s9965_s6 + $0x40] sm:$0xff] }
 0xd50   :  { %v5684_v22 = vadd.f32 %v5683_v19, %v5682_v6  ;;  %v6253_v6 = vld [vmem:[%s9965_s6 + $0x28] sm:$0xff] }
 0xd57   :  { %v8550_v34 = vpop.eup %8549 }
 0xd58   :  { %v5852_v35 = vmul.f32 %v8550_v34, %v5851_v37  ;;  %v6259_v37 = vld [vmem:[%s9965_s6 + $0x58] sm:$0xff] }
 0xd5a   :  { %v5854_v44 = vadd.f32 %v5853_v40, %v5852_v35  ;;  %v8182_v35 = vpack.c.bf16 %v6259_v37, %v6256_v30 }
 0xd5c   :  { %v5855_v39 = vsel %vm5689_vm14, %v5854_v44, %v9729_v46  ;;  %v6167_v46 = vld [vmem:[%s9968_s9 + $0x8] sm:$0xff] }
 0xd5d   :  { %6989 = vmatmul.mubr.msk.f32.vlgmr.msra.gmra.mrb[46].mxu0 %vm351_vm3, %v5855_v39  ;;  %7598 = vmatmul.mubr.msk.f32.vlgmr.msra.gmra.mrb[68].mxu1 %vm351_vm3, %v5855_v39  ;;  %v6597_v44 = vld [vmem:[#allocation10 + $0x8] sm:$0xff]  ;;  %v6600_v39 = vld [vmem:[#allocation10 + $0x20] sm:$0xff] }
 0xd5e   :  { %8153 = vmatpush1.bf16.msra.mxu0 %v8982_v9  ;;  %8160 = vmatpush3.bf16.msra.mxu1 %v8984_v13  ;;  %v9817_v9 = vsel %vm5209_vm13, %v5684_v22, %v9749_v59  ;;  %v6262_v13 = vld [vmem:[%s9965_s6 + $0x68] sm:$0xf]  ;;  %v8165_v59 = vpack.c.bf16 %v6167_v46, %v6166_v26 }
 0xd5f   :  { %8155 = vmatprep.subr.bf16.mxu0 %v8986_v16  ;;  %8161 = vmatprep.subr.bf16.mxu1 %v8710_v2  ;;  %v6261_v16 = vld [vmem:[%s9965_s6 + $0x60] sm:$0xf] }
 0xd60   :  { %7608 = vmatprep.mubr.msk.f32.mxu1 %vm8711_vm0, %v8709_v1  ;;  %6067 = vmatprep.mubr.f32.mxu0 %v8709_v1 }
 0xd62   :  { %8157 = vmatpush1.bf16.msra.mxu0 %v8998_v24  ;;  %8163 = vmatpush3.bf16.msra.mxu1 %v9000_v25  ;;  %v6260_v24 = vld [vmem:[%s9961_s2] sm:$0xff]  ;;  %v6263_v25 = vld [vmem:[%s9965_s6 + $0x70] sm:$0xf] }
 0xd63   :  { %8164 = vmatprep.subr.bf16.mxu0 %v8710_v2  ;;  %6997 = vmatprep.subr.msk.mxu1 %vm6268_vm15, %v6262_v13  ;;  %v8184_v13 = vpack.c.bf16 %v6600_v39, %v6597_v44 }
 0xd65   :  { %7609 = vmatmul.mubr.msk.f32.vlgmr.msra.gmra.mrb[70].mxu1 %vm351_vm3, %v9817_v9  ;;  %6991 = vmatmul.mubr.msk.f32.vlgmr.msra.gmra.mrb[46].mxu0 %vm351_vm3, %v9817_v9 }
 0xd66   :  { %6342 = vmatprep.mubr.f32.mxu1 %v8709_v1  ;;  %7619 = vmatprep.mubr.msk.f32.mxu0 %vm8711_vm0, %v8709_v1 }
 0xd67   :  { %6998 = vmatpush1.msk.msra.mxu1 %vm6268_vm15, %v6261_v16  ;;  %8166 = vmatpush3.bf16.msra.mxu0 %v8165_v59  ;;  %v6599_v16 = vld [vmem:[#allocation10 + $0x18] sm:$0xff] }
 0xd68   :  { %7622 = vmatprep.subr.mxu1 %v8709_v1  ;;  %8167 = vmatprep.subr.bf16.mxu0 %v8710_v2  ;;  %v6603_v59 = vld [vmem:[#allocation10 + $0x38] sm:$0xff] }
 0xd69   :  { %6999 = vmatmul.mubr.msk.f32.vlgmr.msra.gmra.mrb[72].mxu1 %vm6264_vm1, %v6260_v24  ;;  %v8188_v0 = vpack.c.bf16 %v6606_v48, %v6603_v59  ;;  %v6995_v48 = vld [vmem:[%s9968_s9 + $0x20] ss:$0 sm:$0xff] }
 0xd6a   :  { %7623 = vmatpush3.msk.msra.mxu1 %vm6268_vm15, %v6263_v25  ;;  %7624 = vmatprep.mubr.msk.f32.mxu1 %vm8711_vm0, %v8709_v1  ;;  %v6601_v25 = vld [vmem:[#allocation10 + $0x28] sm:$0xff] }
 0xd6b   :  { %8171 = vmatprep.subr.bf16.mxu1 %v8170_v38  ;;  %8169 = vmatpush3.bf16.msra.mxu0 %v8168_v63  ;;  %v6605_v38 = vld [vmem:[#allocation10 + $0x48] sm:$0xff] }
 0xd6c   :  { %8178 = vmatprep.subr.bf16.mxu0 %v8710_v2  ;;  %v8190_v55 = vpack.c.bf16 %v6605_v38, %v6602_v51 }
 0xd6d   :  { %7625 = vmatmul.mubr.msk.f32.vlgmr.msra.gmra.mrb[74].mxu1 %vm6264_vm1, %v6260_v24  ;;  %v6598_v24 = vld [vmem:[#allocation10 + $0x10] sm:$0xff] }
 0xd6e   :  { %8173 = vmatpush1.bf16.msra.mxu1 %v8172_v54  ;;  %6483 = vmatprep.mubr.f32.mxu1 %v8709_v1  ;;  %v8193_v46 = vpack.c.bf16 %v6601_v25, %v6598_v24  ;;  %v8196_v54 = vpack.c.bf16 %v6607_v57, %v6604_v47 }
 0xd6f   :  { %8175 = vmatprep.subr.bf16.mxu1 %v8174_v61 }
 0xd72   :  { %8177 = vmatpush1.bf16.msra.mxu1 %v8176_v5 }
 0xd73   :  { %8192 = vmatprep.subr.bf16.mxu1 %v8710_v2 }
 0xe30   :  { %v5996_v7 = vpop.f32.mrb[68].mxu1 }
 0xe31   :  { %v7599_v3 = vpop.f32.mrb[69].mxu1  ;;  %v5997_v41 = vadd.f32 %v5996_v7, %v9059_v50  ;;  %v8179_v50 = vpack.c.bf16 %v6253_v6, %v6250_v18  ;;  %v6789_v6 = vld [vmem:[%s9969_s10 + $0x18] sm:$0xff] }
 0xe32   :  { %v6573_v3 = vrot.slane %v6560_v28, %v8965_v33 }
 0xe38   :  { %v6140_v20 = vpop.f32.mrb[70].mxu1  ;;  %v6069_v17 = vpop.f32.mrb[46].mxu0 }
 0xe39   :  { %v8249_v8 = vadd.f32 %v9043_v42, %v6069_v17  ;;  %v7610_v27 = vpop.f32.mrb[71].mxu1  ;;  %v6071_v4 = vpop.f32.mrb[47].mxu0  ;;  %v6141_v29 = vadd.f32 %v6140_v20, %v9056_v45  ;;  %v6569_v17 = vrot.slane %v6560_v28, %v8939_v62 }
 0xe3a   :  { %v8251_v12 = vadd.f32 %v9045_v43, %v6071_v4 }
 0xe3b   :  { %v6993_v11 = vmul.f32 -1.442695, %v8249_v8 }
 0xe3c   :  { %v6994_v58 = vmul.f32 -1.442695, %v8251_v12 }
 0xe3d   :  { %8551 = vpow2.f32 %v6993_v11 }
 0xe3e   :  { %8553 = vpow2.f32 %v6994_v58 }
 0xe40   :  { %v6415_v36 = vpop.f32.mrb[74].mxu1 }
 0xe41   :  { %v7626_v40 = vpop.f32.mrb[75].mxu1 }
 0xe47   :  { %v8552_v15 = vpop.eup %8551 }
 0xe48   :  { %v6148_v21 = vadd.f32 1.0, %v8552_v15  ;;  %v8554_v23 = vpop.eup %8553 }
 0xe49   :  { %v6155_v31 = vadd.f32 1.0, %v8554_v23 }
 0xe4a   :  { %8555 = vrcp.f32 %v6148_v21 }
 0xe4b   :  { %8557 = vrcp.f32 %v6155_v31 }
 0xe54   :  { %v8556_v49 = vpop.eup %8555 }
 0xe55   :  { %v6158_v32 = vmul.f32 %v8556_v49, %v6141_v29  ;;  %v8558_v10 = vpop.eup %8557 }
 0xe56   :  { %v6161_v14 = vsub.f32 1.0, %v8558_v10  ;;  %v6163_v45 = vmul.f32 %v8558_v10, %v9817_v9  ;;  %v6786_v10 = vld [vmem:[%s9969_s10] sm:$0xff] }
 0xe57   :  { %v6159_v42 = vadd.f32 %v6158_v32, %v5997_v41 }
 0xe59   :  { %8559 = vtanh.f32 %v6159_v42 }
 0xe63   :  { %v8560_v43 = vpop.eup %8559 }
 0xe64   :  { %v6162_v19 = vmul.f32 %v8560_v43, %v6161_v14  ;;  %v6787_v14 = vld [vmem:[%s9969_s10 + $0x8] sm:$0xff]  ;;  %v6788_v43 = vld [vmem:[%s9969_s10 + $0x10] sm:$0xff] }
 0xe65   :  { %v8199_v18 = vpack.c.bf16 %v6787_v14, %v6786_v10 }
 0xe66   :  { %v6164_v22 = vadd.f32 %v6163_v45, %v6162_v19  ;;  %v8202_v19 = vpack.c.bf16 %v6789_v6, %v6788_v43 }
 0xe68   :  { %v6165_v34 = vsel %vm5689_vm14, %v6164_v22, %v9817_v9  ;;  %v6596_v9 = vld [vmem:[#allocation10] sm:$0xff] }
 0xe69   :  { %7620 = vmatmul.mubr.msk.f32.vlgmr.msra.gmra.mrb[48].mxu0 %vm351_vm3, %v6165_v34  ;;  %7002 = vmatmul.mubr.msk.f32.vlgmr.msra.gmra.mrb[72].mxu1 %vm351_vm3, %v6165_v34  ;;  %v8186_v26 = vpack.c.bf16 %v6599_v16, %v6596_v9 }
 0xe6a   :  { %8180 = vmatpush3.bf16.msra.mxu0 %v8179_v50  ;;  %7635 = vmatprep.mubr.msk.f32.mxu0 %vm8711_vm0, %v8709_v1 }
 0xe6b   :  { %8181 = vmatprep.subr.bf16.mxu0 %v8710_v2  ;;  %7646 = vmatprep.mubr.msk.f32.mxu1 %vm8711_vm0, %v8709_v1 }
 0xe6c   :  { %8194 = vmatpush3.bf16.msra.mxu1 %v8193_v46 }
 0xe6d   :  { %8195 = vmatprep.subr.bf16.mxu1 %v8710_v2 }
 0xe6e   :  { %8183 = vmatpush3.bf16.msra.mxu0 %v8182_v35 }
 0xe6f   :  { %8185 = vmatprep.subr.bf16.mxu0 %v8184_v13 }
 0xe70   :  { %8197 = vmatpush3.bf16.msra.mxu1 %v8196_v54 }
 0xe71   :  { %7636 = vmatmul.mubr.msk.f32.vlgmr.msra.gmra.mrb[50].mxu0 %vm351_vm3, %v6165_v34 }
 0xe72   :  { %6693 = vmatprep.mubr.f32.mxu0 %v8709_v1  ;;  %8187 = vmatpush1.bf16.msra.mxu0 %v8186_v26 }
 0xe73   :  { %8189 = vmatprep.subr.bf16.mxu0 %v8188_v0 }
 0xe76   :  { %8191 = vmatpush1.bf16.msra.mxu0 %v8190_v55 }
 0xe77   :  { %8198 = vmatprep.subr.bf16.mxu0 %v8710_v2 }
 0xf3c   :  { %v9921_v63 = vpop.f32.mrb[48].mxu0  ;;  %v6485_v61 = vpop.f32.mrb[72].mxu1 }
 0xf3d   :  { %v6577_v56 = vadd.f32 %v6565_v53, %v6485_v61  ;;  %v7621_v52 = vpop.f32.mrb[49].mxu0  ;;  %v6487_v5 = vpop.f32.mrb[73].mxu1  ;;  %v6245_v47 = vadd.f32 %v6995_v48, %v9921_v63 }
 0xf3e   :  { %v6578_v11 = vadd.f32 %v6569_v17, %v6487_v5 }
 0xf3f   :  { %v7004_v7 = vmul.f32 -1.442695, %v6577_v56 }
 0xf41   :  { %8561 = vpow2.f32 %v7004_v7 }
 0xf44   :  { %v6556_v20 = vpop.f32.mrb[50].mxu0 }
 0xf45   :  { %v6557_v8 = vadd.f32 %v6556_v20, %v6415_v36  ;;  %v7637_v27 = vpop.f32.mrb[51].mxu0 }
 0xf47   :  { %v6579_v4 = vadd.f32 %v6573_v3, %v6557_v8 }
 0xf49   :  { %v7005_v12 = vmul.f32 -1.442695, %v6579_v4 }
 0xf4b   :  { %v8562_v58 = vpop.eup %8561  ;;  %8563 = vpow2.f32 %v7005_v12 }
 0xf4c   :  { %v6583_v15 = vadd.f32 1.0, %v8562_v58  ;;  %8565 = vtanh.f32 %v6578_v11 }
 0xf4e   :  { %8567 = vrcp.f32 %v6583_v15 }
 0xf55   :  { %v8564_v21 = vpop.eup %8563 }
 0xf56   :  { %v6590_v23 = vadd.f32 1.0, %v8564_v21  ;;  %v8566_v31 = vpop.eup %8565 }
 0xf58   :  { %v8568_v29 = vpop.eup %8567  ;;  %8569 = vrcp.f32 %v6590_v23 }
 0xf59   :  { %v6593_v49 = vmul.f32 %v8568_v29, %v8566_v31 }
 0xf5b   :  { %8571 = vtanh.f32 %v6593_v49 }
 0xf62   :  { %v8570_v41 = vpop.eup %8569 }
 0xf65   :  { %v8572_v32 = vpop.eup %8571 }
 0xf66   :  { %v6595_v42 = vmul.f32 %v8572_v32, %v8570_v41 }
 0xf68   :  { %7007 = vmatmul.mubr.msk.f32.vlgmr.msra.gmra.mrb[52].mxu0 %vm351_vm3, %v6595_v42  ;;  %7647 = vmatmul.mubr.msk.f32.vlgmr.msra.gmra.mrb[76].mxu1 %vm351_vm3, %v6595_v42 }
 0xf69   :  { %7657 = vmatprep.mubr.msk.f32.mxu0 %vm8711_vm0, %v8709_v1  ;;  %8200 = vmatpush3.bf16.msra.mxu0 %v8199_v18  ;;  %v7006_v1 = vld [vmem:[%s9967_s8 + $0x1] ss:$2 sm:$0x7]  ;;  %vm6870_vm0 = vcmask 7168  }
 0xf6a   :  { %8201 = vmatprep.subr.bf16.mxu0 %v8710_v2  ;;  %v6614_v45 = vrot.slane %v7006_v1, %v8937_v60  ;;  %v6622_v37 = vrot.slane %v7006_v1, %v8965_v33  ;;  %v6618_v2 = vrot.slane %v7006_v1, %v8939_v62  ;;  %v7011_v62 = vld [vmem:[%s9969_s10 + $0x20] ss:$0 sm:$0xff] }
 0xf6d   :  { %8203 = vmatpush3.bf16.msra.mxu0 %v8202_v19 }
0x103b   :  { %v6695_v22 = vpop.f32.mrb[52].mxu0  ;;  %v6766_v50 = vpop.f32.mrb[76].mxu1 }
0x103c   :  { %v6696_v30 = vadd.f32 %v6695_v22, %v6614_v45  ;;  %v6697_v34 = vpop.f32.mrb[53].mxu0  ;;  %v7648_v35 = vpop.f32.mrb[77].mxu1  ;;  %v6767_v40 = vadd.f32 %v6766_v50, %v6622_v37 }
0x103d   :  { %v6698_v39 = vadd.f32 %v6697_v34, %v6618_v2 }
0x103e   :  { %v7009_v36 = vmul.f32 -1.442695, %v6696_v30  ;;  %v7010_v44 = vmul.f32 -1.442695, %v6767_v40 }
0x1040   :  { %8573 = vpow2.f32 %v7009_v36 }
0x1041   :  { %8575 = vpow2.f32 %v7010_v44 }
0x1042   :  { %8577 = vtanh.f32 %v6698_v39 }
0x104a   :  { %v8574_v9 = vpop.eup %8573 }
0x104b   :  { %v6773_v13 = vadd.f32 1.0, %v8574_v9  ;;  %v8576_v60 = vpop.eup %8575 }
0x104c   :  { %v6780_v16 = vadd.f32 1.0, %v8576_v60  ;;  %v8578_v24 = vpop.eup %8577 }
0x104d   :  { %8579 = vrcp.f32 %v6773_v13 }
0x104e   :  { %8581 = vrcp.f32 %v6780_v16 }
0x1057   :  { %v8580_v25 = vpop.eup %8579 }
0x1058   :  { %v6783_v26 = vmul.f32 %v8580_v25, %v8578_v24  ;;  %v8582_v33 = vpop.eup %8581 }
0x105a   :  { %8583 = vtanh.f32 %v6783_v26 }
0x1064   :  { %v8584_v46 = vpop.eup %8583 }
0x1065   :  { %v6785_v59 = vmul.f32 %v8584_v46, %v8582_v33 }
0x1067   :  { %7658 = vmatmul.mubr.msk.f32.vlgmr.msra.gmra.mrb[54].mxu0 %vm351_vm3, %v6785_v59 }
0x113a   :  { %v6864_v51 = vpop.f32.mrb[54].mxu0 }
0x113b   :  { %v6865_v0 = vadd.f32 %v7011_v62, %v6864_v51  ;;  %v7659_v38 = vpop.f32.mrb[55].mxu0 }
0x113d   :  { %v6868_v57 = vmul.f32 0.1, %v6865_v0 }
0x113f   :  { %v6869_v55 = vadd.f32 %v6868_v57, %v6245_v47 }
0x1141   :  { %6871 = vst.msk [vmem:[%s9970_s11] sm:$0xff] %vm6870_vm0, %v6869_v55 }
0x1142   :  { %6876 = vsyncpa [#allocation4], 1 }
0x1143   :  { %6877 = vsyncpa [#allocation6], 1 }
0x1144   :  { %6878 = vsyncpa [#allocation9], 1 }

</bundles_post_ra>
